<compile_context>
chip_gen: v6e
topology: v6e:2x2x1
jax: 0.10.0
libtpu: 0.0.40
codegen_flags: <defaults>
</compile_context>

<pallas_src>
import numpy as np

import jax
import jax.numpy as jnp
from jax import lax
from jax.experimental import pallas as pl
from jax.experimental.pallas import tpu as pltpu

_LANE = 128
_EPS = 1e-5
_SLOPE = 0.2


# ------------------------------ static geometry ----------------------------

def _geometry(n_batch, ndf):
    # 24 -(4,2,1)-> 12 -(4,2,1)-> 6 -(4,2,1)-> 3 -(3,1,0)-> 1
    spatial_in = [24, 12, 6]                    # stride-2 conv input sizes
    h2 = [(s + 2) // 2 for s in spatial_in]     # padded-grid pair sizes 13,7,4
    ho = [s // 2 for s in spatial_in]           # conv output sizes 12,6,3
    return {
        "n": n_batch,
        "chans": [1, ndf, 2 * ndf, 4 * ndf, 8 * ndf],
        "h2": h2,
        "ho": ho,
        "rows": [n_batch * v * v for v in h2],   # 338, 98, 32
        "count": [n_batch * v * v for v in ho],  # 288, 72, 18
    }


def _build_constants(geom):
    """Validity masks and the constant 0/1 repacking matrices (numpy)."""
    n = geom["n"]
    consts = {"masks": [], "repack": []}

    # Rows of each layer's output live on its (H2, W2) pair grid; rows with
    # oh == Ho or ow == Ho are junk produced by the shift trick -> mask them
    # out of the BatchNorm statistics.
    for h2, ho in zip(geom["h2"], geom["ho"]):
        m = np.zeros((n * h2 * h2, 1), np.float32)
        for bi in range(n):
            for oh in range(ho):
                for ow in range(ho):
                    m[bi * h2 * h2 + oh * h2 + ow, 0] = 1.0
        consts["masks"].append(jnp.asarray(m))

    # Layers 1,2: repack activations into the NEXT layer's phase-packed padded
    # grid (pad=1).  One 0/1 row-selection block per parity phase q = 2a+b.
    for layer in range(2):
        h2, ho = geom["h2"][layer], geom["ho"][layer]
        h2n = geom["h2"][layer + 1]
        rin = n * h2 * h2
        rph = n * h2n * h2n
        s = np.zeros((4 * rph, rin), np.float32)
        for pa in range(2):
            for pb in range(2):
                q = 2 * pa + pb
                for bi in range(n):
                    for hh in range(h2n):
                        for ww in range(h2n):
                            oh = 2 * hh + pa - 1
                            ow = 2 * ww + pb - 1
                            if 0 <= oh < ho and 0 <= ow < ho:
                                ro = q * rph + bi * h2n * h2n + hh * h2n + ww
                                ri = bi * h2 * h2 + oh * h2 + ow
                                s[ro, ri] = 1.0
        consts["repack"].append(jnp.asarray(s, jnp.bfloat16))

    # Layer 3 -> layer 4 input: plain row-major (n*3*3, C), no padding.
    h2, ho = geom["h2"][2], geom["ho"][2]
    s = np.zeros((n * ho * ho, n * h2 * h2), np.float32)
    for bi in range(n):
        for hh in range(ho):
            for ww in range(ho):
                s[bi * ho * ho + hh * ho + ww, bi * h2 * h2 + hh * h2 + ww] = 1.0
    consts["repack"].append(jnp.asarray(s, jnp.bfloat16))
    return consts


# ------------------------------ parameters ---------------------------------

def init_torch_params(key, ndf=8):
    """Synthetic parameters in PyTorch layout (shared by kernel & reference)."""
    chans = [1, ndf, 2 * ndf, 4 * ndf, 8 * ndf]
    kernels = [4, 4, 4, 3]
    keys = jax.random.split(key, 6)
    convs = []
    for layer in range(4):
        cin, cout, k = chans[layer], chans[layer + 1], kernels[layer]
        w = 0.05 * jax.random.normal(keys[layer], (cout, cin, k, k), jnp.float32)
        gamma = jnp.ones((cout,), jnp.float32)   # BN weight init
        beta = jnp.zeros((cout,), jnp.float32)   # BN bias init
        convs.append((w, gamma, beta))
    w5 = 0.05 * jax.random.normal(keys[4], (8 * ndf, 100), jnp.float32)
    b5 = jnp.zeros((100,), jnp.float32)
    w6 = 0.05 * jax.random.normal(keys[5], (100, 1), jnp.float32)
    b6 = jnp.zeros((1,), jnp.float32)
    return {"convs": convs, "head": (w5, b5, w6, b6)}


def _conv_weight_stride2(w):
    """torch (cout,cin,4,4) -> (4*cin, 4*128): rows grouped by input parity
    phase q=2a+b, column blocks grouped by the row-shift group g=2di+dj."""
    cout, cin = w.shape[0], w.shape[1]
    wk = jnp.zeros((4 * cin, 4 * _LANE), jnp.float32)
    for pa in range(2):
        for pb in range(2):
            q = 2 * pa + pb
            for di in range(2):
                for dj in range(2):
                    gsh = 2 * di + dj
                    blk = w[:, :, 2 * di + pa, 2 * dj + pb].T   # (cin, cout)
                    wk = wk.at[q * cin:(q + 1) * cin,
                               gsh * _LANE:gsh * _LANE + cout].set(blk)
    return wk.astype(jnp.bfloat16)


def _conv_weight_3x3(w):
    """torch (cout,cin,3,3) -> (cin, 9*128): one 128-lane block per tap."""
    cout, cin = w.shape[0], w.shape[1]
    wk = jnp.zeros((cin, 9 * _LANE), jnp.float32)
    for i in range(3):
        for j in range(3):
            t = 3 * i + j
            wk = wk.at[:, t * _LANE:t * _LANE + cout].set(w[:, :, i, j].T)
    return wk.astype(jnp.bfloat16)


def _pad_vec(v):
    out = jnp.zeros((1, _LANE), v.dtype)
    return out.at[0, :v.shape[0]].set(v)


def _to_kernel_params(tp):
    convs = []
    for layer, (w, gamma, beta) in enumerate(tp["convs"]):
        wk = _conv_weight_stride2(w) if layer < 3 else _conv_weight_3x3(w)
        convs.append((wk, _pad_vec(gamma), _pad_vec(beta)))
    w5, b5, w6, b6 = tp["head"]
    w5p = jnp.zeros((_LANE, _LANE), jnp.float32)
    w5p = w5p.at[:w5.shape[0], :w5.shape[1]].set(w5).astype(jnp.bfloat16)
    return {"convs": convs,
            "head": (w5p, _pad_vec(b5), _pad_vec(w6[:, 0]), b6.reshape(1, 1))}


def _pack_input(x, geom):
    """(N,1,24,24) -> phase-packed (N*13*13, 4) bf16 rows of the padded grid."""
    n = x.shape[0]
    h2 = geom["h2"][0]
    xp = jnp.pad(x, ((0, 0), (0, 0), (1, 1), (1, 1)))
    phases = []
    for pa in range(2):
        for pb in range(2):
            phases.append(xp[:, 0, pa::2, pb::2])        # (n, 13, 13)
    packed = jnp.stack(phases, axis=-1)                  # (n, 13, 13, 4)
    return packed.reshape(n * h2 * h2, 4).astype(jnp.bfloat16)


# ------------------------------ fused kernel -------------------------------

def _make_kernel(geom):
    n = geom["n"]
    h2s = geom["h2"]
    counts = geom["count"]
    chans = geom["chans"]
    rphase = [n * h2s[1] * h2s[1], n * h2s[2] * h2s[2]]   # 98, 32

    def bn_lrelu(y, gamma, beta, count):
        # one-pass sum / sum-of-squares, folded into a single scale/bias FMA
        s1 = jnp.sum(y, axis=0, keepdims=True)
        s2 = jnp.sum(y * y, axis=0, keepdims=True)
        inv = 1.0 / count
        mean = s1 * inv
        var = jnp.maximum(s2 * inv - mean * mean, 0.0)
        scale = gamma * lax.rsqrt(var + _EPS)
        off = beta - mean * scale
        z = y * scale + off
        return jnp.where(z >= 0.0, z, _SLOPE * z)

    def conv_stride2(x_bf, w_all, w2_grid):
        # x_bf: (R, 4*cin) bf16 phase-packed rows; w_all: (4*cin, 4*128) bf16.
        # One matmul; each 128-lane output block is shifted by its static row
        # offset (0, 1, W2, W2+1) and accumulated.  f32 accumulation.
        p = jnp.dot(x_bf, w_all, preferred_element_type=jnp.float32)
        acc = p[:, 0:_LANE]
        for di in range(2):
            for dj in range(2):
                gsh = 2 * di + dj
                if gsh == 0:
                    continue
                s = di * w2_grid + dj
                blk = p[:, gsh * _LANE:(gsh + 1) * _LANE]
                blk = jnp.concatenate(
                    [blk[s:, :], jnp.zeros((s, _LANE), jnp.float32)], axis=0)
                acc = acc + blk
        return acc

    def kernel(x1_ref,
               w1_ref, g1_ref, b1_ref, m1_ref, s1_ref,
               w2_ref, g2_ref, b2_ref, m2_ref, s2_ref,
               w3_ref, g3_ref, b3_ref, m3_ref, s3_ref,
               w4_ref, g4_ref, b4_ref,
               w5_ref, b5_ref, w6_ref, b6_ref,
               o_ref):
        # ---- conv1 + BN + LeakyReLU ----
        y = conv_stride2(x1_ref[...], w1_ref[...], h2s[0]) * m1_ref[...]
        a = bn_lrelu(y, g1_ref[...], b1_ref[...], float(counts[0]))
        pr = jnp.dot(s1_ref[...], a.astype(jnp.bfloat16),
                     preferred_element_type=jnp.float32)
        x = jnp.concatenate(
            [pr[q * rphase[0]:(q + 1) * rphase[0], 0:chans[1]]
             for q in range(4)], axis=1).astype(jnp.bfloat16)
        # ---- conv2 ----
        y = conv_stride2(x, w2_ref[...], h2s[1]) * m2_ref[...]
        a = bn_lrelu(y, g2_ref[...], b2_ref[...], float(counts[1]))
        pr = jnp.dot(s2_ref[...], a.astype(jnp.bfloat16),
                     preferred_element_type=jnp.float32)
        x = jnp.concatenate(
            [pr[q * rphase[1]:(q + 1) * rphase[1], 0:chans[2]]
             for q in range(4)], axis=1).astype(jnp.bfloat16)
        # ---- conv3 ----
        y = conv_stride2(x, w3_ref[...], h2s[2]) * m3_ref[...]
        a = bn_lrelu(y, g3_ref[...], b3_ref[...], float(counts[2]))
        pr = jnp.dot(s3_ref[...], a.astype(jnp.bfloat16),
                     preferred_element_type=jnp.float32)     # (n*9, 128)
        x = pr[:, 0:chans[3]].astype(jnp.bfloat16)           # (n*9, cin4)
        # ---- conv4 (3x3, stride 1, valid) -> (n, 128) features ----
        p4 = jnp.dot(x, w4_ref[...], preferred_element_type=jnp.float32)
        feat_rows = []
        for bi in range(n):
            acc = p4[bi * 9:bi * 9 + 1, 0:_LANE]
            for t in range(1, 9):
                acc = acc + p4[bi * 9 + t:bi * 9 + t + 1,
                               t * _LANE:(t + 1) * _LANE]
            feat_rows.append(acc)
        feat = jnp.concatenate(feat_rows, axis=0)            # (n, 128)
        a4 = bn_lrelu(feat, g4_ref[...], b4_ref[...], float(n))
        # ---- head: Linear -> LeakyReLU -> Linear (lane reduce) -> sigmoid ---
        h = jnp.dot(a4.astype(jnp.bfloat16), w5_ref[...],
                    preferred_element_type=jnp.float32) + b5_ref[...]
        h = jnp.where(h >= 0.0, h, _SLOPE * h)
        logit = jnp.sum(h * w6_ref[...], axis=1, keepdims=True) + b6_ref[...]
        e = jnp.exp(-jnp.abs(logit))                         # stable sigmoid
        o_ref[...] = jnp.where(logit >= 0.0, 1.0 / (1.0 + e), e / (1.0 + e))

    return kernel


def make_forward(n_batch=2, ndf=8):
    geom = _geometry(n_batch, ndf)
    consts = _build_constants(geom)
    kernel = _make_kernel(geom)
    vmem = pl.BlockSpec(memory_space=pltpu.MemorySpace.VMEM)

    @jax.jit
    def apply(x, torch_params):
        kp = _to_kernel_params(torch_params)
        (w1, g1, b1), (w2, g2, b2), (w3, g3, b3), (w4, g4, b4) = kp["convs"]
        w5, b5, w6, b6 = kp["head"]
        m1, m2, m3 = consts["masks"]
        s1, s2, s3 = consts["repack"]
        args = (
            _pack_input(x, geom),
            w1, g1, b1, m1, s1,
            w2, g2, b2, m2, s2,
            w3, g3, b3, m3, s3,
            w4, g4, b4,
            w5, b5, w6, b6,
        )
        # Single un-gridded invocation: total VMEM footprint < 2 MiB.  For the
        # module default ndf=64 / large batch, tile the row dimension with a
        # grid instead of a single whole-array block.
        return pl.pallas_call(
            kernel,
            out_shape=jax.ShapeDtypeStruct((n_batch, 1), jnp.float32),
            in_specs=[vmem] * len(args),
            out_specs=vmem,
        )(*args)

    return apply


# --------------------------- pure-JAX reference ----------------------------

@jax.jit
def reference_forward(x, params):
    """Plain lax/XLA implementation with matching numerics (bf16 operands,
    f32 accumulation, training-mode batch statistics)."""
    a = x
    cfg = [(2, 1), (2, 1), (2, 1), (1, 0)]
    for (w, gamma, beta), (stride, pad) in zip(params["convs"], cfg):
        y = lax.conv_general_dilated(
            a.astype(jnp.bfloat16), w.astype(jnp.bfloat16),
            window_strides=(stride, stride),
            padding=[(pad, pad), (pad, pad)],
            dimension_numbers=("NCHW", "OIHW", "NCHW"),
            preferred_element_type=jnp.float32)
        nb, c, hh, ww = y.shape
        yf = jnp.transpose(y, (0, 2, 3, 1)).reshape(-1, c)
        cnt = yf.shape[0]
        mean = jnp.sum(yf, axis=0, keepdims=True) / cnt
        var = jnp.maximum(
            jnp.sum(yf * yf, axis=0, keepdims=True) / cnt - mean * mean, 0.0)
        scale = gamma[None, :] * lax.rsqrt(var + _EPS)
        z = yf * scale + (beta[None, :] - mean * scale)
        z = jnp.where(z >= 0.0, z, _SLOPE * z)
        a = jnp.transpose(z.reshape(nb, hh, ww, c), (0, 3, 1, 2))
    feat = a.reshape(a.shape[0], -1)
    w5, b5, w6, b6 = params["head"]
    h = jnp.dot(feat.astype(jnp.bfloat16), w5.astype(jnp.bfloat16),
                preferred_element_type=jnp.float32) + b5[None, :]
    h = jnp.where(h >= 0.0, h, _SLOPE * h)
    logit = h @ w6 + b6[None, :]
    return jax.nn.sigmoid(logit)


# ----------------------------------- main -----------------------------------

if __name__ == "__main__":
    ndf, n_batch = 8, 2
    key = jax.random.PRNGKey(0)
    k_x, k_p = jax.random.split(key)
    # The architecture forces 1x24x24 inputs so Flatten sees ndf*8 features:
    # 24 -(4,2,1)-> 12 -(4,2,1)-> 6 -(4,2,1)-> 3 -(3,1,0)-> 1
    x = jax.random.normal(k_x, (n_batch, 1, 24, 24), jnp.float32)
    params = init_torch_params(k_p, ndf=ndf)

    forward = make_forward(n_batch=n_batch, ndf=ndf)
    out = jax.block_until_ready(forward(x, params))
    ref = jax.block_until_ready(reference_forward(x, params))

    assert out.shape == (n_batch, 1)
    assert bool(jnp.all(jnp.isfinite(out)))
    assert bool(jnp.all((out > 0.0) & (out < 1.0)))
    assert bool(jnp.all(jnp.abs(out - ref) < 2e-2)), (out, ref)
    print("KERNEL_OK")
</pallas_src>

<mosaic_0001>
module attributes {stable_mosaic.version = 11 : i64} {
  func.func @kernel(%arg0: memref<338x4xbf16, #tpu.memory_space<vmem>>, %arg1: memref<4x512xbf16, #tpu.memory_space<vmem>>, %arg2: memref<1x128xf32, #tpu.memory_space<vmem>>, %arg3: memref<1x128xf32, #tpu.memory_space<vmem>>, %arg4: memref<338x1xf32, #tpu.memory_space<vmem>>, %arg5: memref<392x338xbf16, #tpu.memory_space<vmem>>, %arg6: memref<32x512xbf16, #tpu.memory_space<vmem>>, %arg7: memref<1x128xf32, #tpu.memory_space<vmem>>, %arg8: memref<1x128xf32, #tpu.memory_space<vmem>>, %arg9: memref<98x1xf32, #tpu.memory_space<vmem>>, %arg10: memref<128x98xbf16, #tpu.memory_space<vmem>>, %arg11: memref<64x512xbf16, #tpu.memory_space<vmem>>, %arg12: memref<1x128xf32, #tpu.memory_space<vmem>>, %arg13: memref<1x128xf32, #tpu.memory_space<vmem>>, %arg14: memref<32x1xf32, #tpu.memory_space<vmem>>, %arg15: memref<18x32xbf16, #tpu.memory_space<vmem>>, %arg16: memref<32x1152xbf16, #tpu.memory_space<vmem>>, %arg17: memref<1x128xf32, #tpu.memory_space<vmem>>, %arg18: memref<1x128xf32, #tpu.memory_space<vmem>>, %arg19: memref<128x128xbf16, #tpu.memory_space<vmem>>, %arg20: memref<1x128xf32, #tpu.memory_space<vmem>>, %arg21: memref<1x128xf32, #tpu.memory_space<vmem>>, %arg22: memref<1x1xf32, #tpu.memory_space<vmem>>, %arg23: memref<2x1xf32, #tpu.memory_space<vmem>>) attributes {dimension_semantics = [], scalar_prefetch = 0 : i64, scratch_operands = 0 : i64, tpu.core_type = #tpu.core_type<tc>} {
    %c0 = arith.constant 0 : index
    %c0_0 = arith.constant 0 : index
    %0 = vector.load %arg0[%c0, %c0_0] : memref<338x4xbf16, #tpu.memory_space<vmem>>, vector<338x4xbf16>
    %c0_1 = arith.constant 0 : index
    %c0_2 = arith.constant 0 : index
    %1 = vector.load %arg1[%c0_1, %c0_2] : memref<4x512xbf16, #tpu.memory_space<vmem>>, vector<4x512xbf16>
    %cst = arith.constant dense<0.000000e+00> : vector<338x512xf32>
    %2 = tpu.matmul %0, %1, %cst {dimension_numbers = #tpu.dot_dimension_numbers<[1], [0], [0], [1], [0, 0, 1, 1], [], []>} : vector<338x4xbf16>, vector<4x512xbf16>, vector<338x512xf32> -> vector<338x512xf32>
    %3 = vector.extract_strided_slice %2 {offsets = [0, 0], sizes = [338, 128], strides = [1, 1]} : vector<338x512xf32> to vector<338x128xf32>
    %4 = vector.extract_strided_slice %2 {offsets = [0, 128], sizes = [338, 128], strides = [1, 1]} : vector<338x512xf32> to vector<338x128xf32>
    %5 = vector.extract_strided_slice %4 {offsets = [1, 0], sizes = [337, 128], strides = [1, 1]} : vector<338x128xf32> to vector<337x128xf32>
    %cst_3 = arith.constant 0.000000e+00 : f32
    %6 = vector.broadcast %cst_3 : f32 to vector<1x128xf32>
    %7 = tpu.concatenate %5, %6 in 0 : vector<337x128xf32>, vector<1x128xf32> -> vector<338x128xf32>
    %8 = arith.addf %3, %7 : vector<338x128xf32>
    %9 = vector.extract_strided_slice %2 {offsets = [0, 256], sizes = [338, 128], strides = [1, 1]} : vector<338x512xf32> to vector<338x128xf32>
    %10 = vector.extract_strided_slice %9 {offsets = [13, 0], sizes = [325, 128], strides = [1, 1]} : vector<338x128xf32> to vector<325x128xf32>
    %cst_4 = arith.constant 0.000000e+00 : f32
    %11 = vector.broadcast %cst_4 : f32 to vector<13x128xf32>
    %12 = tpu.concatenate %10, %11 in 0 : vector<325x128xf32>, vector<13x128xf32> -> vector<338x128xf32>
    %13 = arith.addf %8, %12 : vector<338x128xf32>
    %14 = vector.extract_strided_slice %2 {offsets = [0, 384], sizes = [338, 128], strides = [1, 1]} : vector<338x512xf32> to vector<338x128xf32>
    %15 = vector.extract_strided_slice %14 {offsets = [14, 0], sizes = [324, 128], strides = [1, 1]} : vector<338x128xf32> to vector<324x128xf32>
    %cst_5 = arith.constant 0.000000e+00 : f32
    %16 = vector.broadcast %cst_5 : f32 to vector<14x128xf32>
    %17 = tpu.concatenate %15, %16 in 0 : vector<324x128xf32>, vector<14x128xf32> -> vector<338x128xf32>
    %18 = arith.addf %13, %17 : vector<338x128xf32>
    %c0_6 = arith.constant 0 : index
    %c0_7 = arith.constant 0 : index
    %19 = vector.load %arg4[%c0_6, %c0_7] : memref<338x1xf32, #tpu.memory_space<vmem>>, vector<338x1xf32>
    %20 = vector.broadcast %19 : vector<338x1xf32> to vector<338x128xf32>
    %21 = arith.mulf %18, %20 : vector<338x128xf32>
    %c0_8 = arith.constant 0 : index
    %c0_9 = arith.constant 0 : index
    %22 = vector.load %arg2[%c0_8, %c0_9] : memref<1x128xf32, #tpu.memory_space<vmem>>, vector<1x128xf32>
    %c0_10 = arith.constant 0 : index
    %c0_11 = arith.constant 0 : index
    %23 = vector.load %arg3[%c0_10, %c0_11] : memref<1x128xf32, #tpu.memory_space<vmem>>, vector<1x128xf32>
    %cst_12 = arith.constant dense<0.000000e+00> : vector<128xf32>
    %24 = vector.multi_reduction <add>, %21, %cst_12 [0] : vector<338x128xf32> to vector<128xf32>
    %25 = vector.shape_cast %24 : vector<128xf32> to vector<1x128xf32>
    %26 = arith.mulf %21, %21 : vector<338x128xf32>
    %cst_13 = arith.constant dense<0.000000e+00> : vector<128xf32>
    %27 = vector.multi_reduction <add>, %26, %cst_13 [0] : vector<338x128xf32> to vector<128xf32>
    %28 = vector.shape_cast %27 : vector<128xf32> to vector<1x128xf32>
    %cst_14 = arith.constant 0.00347222225 : f32
    %29 = vector.broadcast %cst_14 : f32 to vector<1x128xf32>
    %30 = arith.mulf %25, %29 : vector<1x128xf32>
    %cst_15 = arith.constant 0.00347222225 : f32
    %31 = vector.broadcast %cst_15 : f32 to vector<1x128xf32>
    %32 = arith.mulf %28, %31 : vector<1x128xf32>
    %33 = arith.mulf %30, %30 : vector<1x128xf32>
    %34 = arith.subf %32, %33 : vector<1x128xf32>
    %cst_16 = arith.constant 0.000000e+00 : f32
    %35 = vector.broadcast %cst_16 : f32 to vector<1x128xf32>
    %36 = arith.maximumf %34, %35 : vector<1x128xf32>
    %cst_17 = arith.constant 9.99999974E-6 : f32
    %37 = vector.broadcast %cst_17 : f32 to vector<1x128xf32>
    %38 = arith.addf %36, %37 : vector<1x128xf32>
    %39 = math.rsqrt %38 : vector<1x128xf32>
    %40 = arith.mulf %22, %39 : vector<1x128xf32>
    %41 = arith.mulf %30, %40 : vector<1x128xf32>
    %42 = arith.subf %23, %41 : vector<1x128xf32>
    %43 = vector.broadcast %40 : vector<1x128xf32> to vector<338x128xf32>
    %44 = arith.mulf %21, %43 : vector<338x128xf32>
    %45 = vector.broadcast %42 : vector<1x128xf32> to vector<338x128xf32>
    %46 = arith.addf %44, %45 : vector<338x128xf32>
    %cst_18 = arith.constant 0.000000e+00 : f32
    %47 = vector.broadcast %cst_18 : f32 to vector<338x128xf32>
    %48 = arith.cmpf oge, %46, %47 : vector<338x128xf32>
    %cst_19 = arith.constant 2.000000e-01 : f32
    %49 = vector.broadcast %cst_19 : f32 to vector<338x128xf32>
    %50 = arith.mulf %49, %46 : vector<338x128xf32>
    %51 = arith.select %48, %46, %50 : vector<338x128xi1>, vector<338x128xf32>
    %c0_20 = arith.constant 0 : index
    %c0_21 = arith.constant 0 : index
    %52 = vector.load %arg5[%c0_20, %c0_21] : memref<392x338xbf16, #tpu.memory_space<vmem>>, vector<392x338xbf16>
    %53 = arith.truncf %51 : vector<338x128xf32> to vector<338x128xbf16>
    %cst_22 = arith.constant dense<0.000000e+00> : vector<392x128xf32>
    %54 = tpu.matmul %52, %53, %cst_22 {dimension_numbers = #tpu.dot_dimension_numbers<[1], [0], [0], [1], [0, 0, 1, 1], [], []>} : vector<392x338xbf16>, vector<338x128xbf16>, vector<392x128xf32> -> vector<392x128xf32>
    %55 = vector.extract_strided_slice %54 {offsets = [0, 0], sizes = [98, 8], strides = [1, 1]} : vector<392x128xf32> to vector<98x8xf32>
    %56 = vector.extract_strided_slice %54 {offsets = [98, 0], sizes = [98, 8], strides = [1, 1]} : vector<392x128xf32> to vector<98x8xf32>
    %57 = vector.extract_strided_slice %54 {offsets = [196, 0], sizes = [98, 8], strides = [1, 1]} : vector<392x128xf32> to vector<98x8xf32>
    %58 = vector.extract_strided_slice %54 {offsets = [294, 0], sizes = [98, 8], strides = [1, 1]} : vector<392x128xf32> to vector<98x8xf32>
    %59 = tpu.concatenate %55, %56, %57, %58 in 1 : vector<98x8xf32>, vector<98x8xf32>, vector<98x8xf32>, vector<98x8xf32> -> vector<98x32xf32>
    %60 = arith.truncf %59 : vector<98x32xf32> to vector<98x32xbf16>
    %c0_23 = arith.constant 0 : index
    %c0_24 = arith.constant 0 : index
    %61 = vector.load %arg6[%c0_23, %c0_24] : memref<32x512xbf16, #tpu.memory_space<vmem>>, vector<32x512xbf16>
    %cst_25 = arith.constant dense<0.000000e+00> : vector<98x512xf32>
    %62 = tpu.matmul %60, %61, %cst_25 {dimension_numbers = #tpu.dot_dimension_numbers<[1], [0], [0], [1], [0, 0, 1, 1], [], []>} : vector<98x32xbf16>, vector<32x512xbf16>, vector<98x512xf32> -> vector<98x512xf32>
    %63 = vector.extract_strided_slice %62 {offsets = [0, 0], sizes = [98, 128], strides = [1, 1]} : vector<98x512xf32> to vector<98x128xf32>
    %64 = vector.extract_strided_slice %62 {offsets = [0, 128], sizes = [98, 128], strides = [1, 1]} : vector<98x512xf32> to vector<98x128xf32>
    %65 = vector.extract_strided_slice %64 {offsets = [1, 0], sizes = [97, 128], strides = [1, 1]} : vector<98x128xf32> to vector<97x128xf32>
    %cst_26 = arith.constant 0.000000e+00 : f32
    %66 = vector.broadcast %cst_26 : f32 to vector<1x128xf32>
    %67 = tpu.concatenate %65, %66 in 0 : vector<97x128xf32>, vector<1x128xf32> -> vector<98x128xf32>
    %68 = arith.addf %63, %67 : vector<98x128xf32>
    %69 = vector.extract_strided_slice %62 {offsets = [0, 256], sizes = [98, 128], strides = [1, 1]} : vector<98x512xf32> to vector<98x128xf32>
    %70 = vector.extract_strided_slice %69 {offsets = [7, 0], sizes = [91, 128], strides = [1, 1]} : vector<98x128xf32> to vector<91x128xf32>
    %cst_27 = arith.constant 0.000000e+00 : f32
    %71 = vector.broadcast %cst_27 : f32 to vector<7x128xf32>
    %72 = tpu.concatenate %70, %71 in 0 : vector<91x128xf32>, vector<7x128xf32> -> vector<98x128xf32>
    %73 = arith.addf %68, %72 : vector<98x128xf32>
    %74 = vector.extract_strided_slice %62 {offsets = [0, 384], sizes = [98, 128], strides = [1, 1]} : vector<98x512xf32> to vector<98x128xf32>
    %75 = vector.extract_strided_slice %74 {offsets = [8, 0], sizes = [90, 128], strides = [1, 1]} : vector<98x128xf32> to vector<90x128xf32>
    %cst_28 = arith.constant 0.000000e+00 : f32
    %76 = vector.broadcast %cst_28 : f32 to vector<8x128xf32>
    %77 = tpu.concatenate %75, %76 in 0 : vector<90x128xf32>, vector<8x128xf32> -> vector<98x128xf32>
    %78 = arith.addf %73, %77 : vector<98x128xf32>
    %c0_29 = arith.constant 0 : index
    %c0_30 = arith.constant 0 : index
    %79 = vector.load %arg9[%c0_29, %c0_30] : memref<98x1xf32, #tpu.memory_space<vmem>>, vector<98x1xf32>
    %80 = vector.broadcast %79 : vector<98x1xf32> to vector<98x128xf32>
    %81 = arith.mulf %78, %80 : vector<98x128xf32>
    %c0_31 = arith.constant 0 : index
    %c0_32 = arith.constant 0 : index
    %82 = vector.load %arg7[%c0_31, %c0_32] : memref<1x128xf32, #tpu.memory_space<vmem>>, vector<1x128xf32>
    %c0_33 = arith.constant 0 : index
    %c0_34 = arith.constant 0 : index
    %83 = vector.load %arg8[%c0_33, %c0_34] : memref<1x128xf32, #tpu.memory_space<vmem>>, vector<1x128xf32>
    %cst_35 = arith.constant dense<0.000000e+00> : vector<128xf32>
    %84 = vector.multi_reduction <add>, %81, %cst_35 [0] : vector<98x128xf32> to vector<128xf32>
    %85 = vector.shape_cast %84 : vector<128xf32> to vector<1x128xf32>
    %86 = arith.mulf %81, %81 : vector<98x128xf32>
    %cst_36 = arith.constant dense<0.000000e+00> : vector<128xf32>
    %87 = vector.multi_reduction <add>, %86, %cst_36 [0] : vector<98x128xf32> to vector<128xf32>
    %88 = vector.shape_cast %87 : vector<128xf32> to vector<1x128xf32>
    %cst_37 = arith.constant 0.013888889 : f32
    %89 = vector.broadcast %cst_37 : f32 to vector<1x128xf32>
    %90 = arith.mulf %85, %89 : vector<1x128xf32>
    %cst_38 = arith.constant 0.013888889 : f32
    %91 = vector.broadcast %cst_38 : f32 to vector<1x128xf32>
    %92 = arith.mulf %88, %91 : vector<1x128xf32>
    %93 = arith.mulf %90, %90 : vector<1x128xf32>
    %94 = arith.subf %92, %93 : vector<1x128xf32>
    %cst_39 = arith.constant 0.000000e+00 : f32
    %95 = vector.broadcast %cst_39 : f32 to vector<1x128xf32>
    %96 = arith.maximumf %94, %95 : vector<1x128xf32>
    %cst_40 = arith.constant 9.99999974E-6 : f32
    %97 = vector.broadcast %cst_40 : f32 to vector<1x128xf32>
    %98 = arith.addf %96, %97 : vector<1x128xf32>
    %99 = math.rsqrt %98 : vector<1x128xf32>
    %100 = arith.mulf %82, %99 : vector<1x128xf32>
    %101 = arith.mulf %90, %100 : vector<1x128xf32>
    %102 = arith.subf %83, %101 : vector<1x128xf32>
    %103 = vector.broadcast %100 : vector<1x128xf32> to vector<98x128xf32>
    %104 = arith.mulf %81, %103 : vector<98x128xf32>
    %105 = vector.broadcast %102 : vector<1x128xf32> to vector<98x128xf32>
    %106 = arith.addf %104, %105 : vector<98x128xf32>
    %cst_41 = arith.constant 0.000000e+00 : f32
    %107 = vector.broadcast %cst_41 : f32 to vector<98x128xf32>
    %108 = arith.cmpf oge, %106, %107 : vector<98x128xf32>
    %cst_42 = arith.constant 2.000000e-01 : f32
    %109 = vector.broadcast %cst_42 : f32 to vector<98x128xf32>
    %110 = arith.mulf %109, %106 : vector<98x128xf32>
    %111 = arith.select %108, %106, %110 : vector<98x128xi1>, vector<98x128xf32>
    %c0_43 = arith.constant 0 : index
    %c0_44 = arith.constant 0 : index
    %112 = vector.load %arg10[%c0_43, %c0_44] : memref<128x98xbf16, #tpu.memory_space<vmem>>, vector<128x98xbf16>
    %113 = arith.truncf %111 : vector<98x128xf32> to vector<98x128xbf16>
    %cst_45 = arith.constant dense<0.000000e+00> : vector<128x128xf32>
    %114 = tpu.matmul %112, %113, %cst_45 {dimension_numbers = #tpu.dot_dimension_numbers<[1], [0], [0], [1], [0, 0, 1, 1], [], []>} : vector<128x98xbf16>, vector<98x128xbf16>, vector<128x128xf32> -> vector<128x128xf32>
    %115 = vector.extract_strided_slice %114 {offsets = [0, 0], sizes = [32, 16], strides = [1, 1]} : vector<128x128xf32> to vector<32x16xf32>
    %116 = vector.extract_strided_slice %114 {offsets = [32, 0], sizes = [32, 16], strides = [1, 1]} : vector<128x128xf32> to vector<32x16xf32>
    %117 = vector.extract_strided_slice %114 {offsets = [64, 0], sizes = [32, 16], strides = [1, 1]} : vector<128x128xf32> to vector<32x16xf32>
    %118 = vector.extract_strided_slice %114 {offsets = [96, 0], sizes = [32, 16], strides = [1, 1]} : vector<128x128xf32> to vector<32x16xf32>
    %119 = tpu.concatenate %115, %116, %117, %118 in 1 : vector<32x16xf32>, vector<32x16xf32>, vector<32x16xf32>, vector<32x16xf32> -> vector<32x64xf32>
    %120 = arith.truncf %119 : vector<32x64xf32> to vector<32x64xbf16>
    %c0_46 = arith.constant 0 : index
    %c0_47 = arith.constant 0 : index
    %121 = vector.load %arg11[%c0_46, %c0_47] : memref<64x512xbf16, #tpu.memory_space<vmem>>, vector<64x512xbf16>
    %cst_48 = arith.constant dense<0.000000e+00> : vector<32x512xf32>
    %122 = tpu.matmul %120, %121, %cst_48 {dimension_numbers = #tpu.dot_dimension_numbers<[1], [0], [0], [1], [0, 0, 1, 1], [], []>} : vector<32x64xbf16>, vector<64x512xbf16>, vector<32x512xf32> -> vector<32x512xf32>
    %123 = vector.extract_strided_slice %122 {offsets = [0, 0], sizes = [32, 128], strides = [1, 1]} : vector<32x512xf32> to vector<32x128xf32>
    %124 = vector.extract_strided_slice %122 {offsets = [0, 128], sizes = [32, 128], strides = [1, 1]} : vector<32x512xf32> to vector<32x128xf32>
    %125 = vector.extract_strided_slice %124 {offsets = [1, 0], sizes = [31, 128], strides = [1, 1]} : vector<32x128xf32> to vector<31x128xf32>
    %cst_49 = arith.constant 0.000000e+00 : f32
    %126 = vector.broadcast %cst_49 : f32 to vector<1x128xf32>
    %127 = tpu.concatenate %125, %126 in 0 : vector<31x128xf32>, vector<1x128xf32> -> vector<32x128xf32>
    %128 = arith.addf %123, %127 : vector<32x128xf32>
    %129 = vector.extract_strided_slice %122 {offsets = [0, 256], sizes = [32, 128], strides = [1, 1]} : vector<32x512xf32> to vector<32x128xf32>
    %130 = vector.extract_strided_slice %129 {offsets = [4, 0], sizes = [28, 128], strides = [1, 1]} : vector<32x128xf32> to vector<28x128xf32>
    %cst_50 = arith.constant 0.000000e+00 : f32
    %131 = vector.broadcast %cst_50 : f32 to vector<4x128xf32>
    %132 = tpu.concatenate %130, %131 in 0 : vector<28x128xf32>, vector<4x128xf32> -> vector<32x128xf32>
    %133 = arith.addf %128, %132 : vector<32x128xf32>
    %134 = vector.extract_strided_slice %122 {offsets = [0, 384], sizes = [32, 128], strides = [1, 1]} : vector<32x512xf32> to vector<32x128xf32>
    %135 = vector.extract_strided_slice %134 {offsets = [5, 0], sizes = [27, 128], strides = [1, 1]} : vector<32x128xf32> to vector<27x128xf32>
    %cst_51 = arith.constant 0.000000e+00 : f32
    %136 = vector.broadcast %cst_51 : f32 to vector<5x128xf32>
    %137 = tpu.concatenate %135, %136 in 0 : vector<27x128xf32>, vector<5x128xf32> -> vector<32x128xf32>
    %138 = arith.addf %133, %137 : vector<32x128xf32>
    %c0_52 = arith.constant 0 : index
    %c0_53 = arith.constant 0 : index
    %139 = vector.load %arg14[%c0_52, %c0_53] : memref<32x1xf32, #tpu.memory_space<vmem>>, vector<32x1xf32>
    %140 = vector.broadcast %139 : vector<32x1xf32> to vector<32x128xf32>
    %141 = arith.mulf %138, %140 : vector<32x128xf32>
    %c0_54 = arith.constant 0 : index
    %c0_55 = arith.constant 0 : index
    %142 = vector.load %arg12[%c0_54, %c0_55] : memref<1x128xf32, #tpu.memory_space<vmem>>, vector<1x128xf32>
    %c0_56 = arith.constant 0 : index
    %c0_57 = arith.constant 0 : index
    %143 = vector.load %arg13[%c0_56, %c0_57] : memref<1x128xf32, #tpu.memory_space<vmem>>, vector<1x128xf32>
    %cst_58 = arith.constant dense<0.000000e+00> : vector<128xf32>
    %144 = vector.multi_reduction <add>, %141, %cst_58 [0] : vector<32x128xf32> to vector<128xf32>
    %145 = vector.shape_cast %144 : vector<128xf32> to vector<1x128xf32>
    %146 = arith.mulf %141, %141 : vector<32x128xf32>
    %cst_59 = arith.constant dense<0.000000e+00> : vector<128xf32>
    %147 = vector.multi_reduction <add>, %146, %cst_59 [0] : vector<32x128xf32> to vector<128xf32>
    %148 = vector.shape_cast %147 : vector<128xf32> to vector<1x128xf32>
    %cst_60 = arith.constant 0.055555556 : f32
    %149 = vector.broadcast %cst_60 : f32 to vector<1x128xf32>
    %150 = arith.mulf %145, %149 : vector<1x128xf32>
    %cst_61 = arith.constant 0.055555556 : f32
    %151 = vector.broadcast %cst_61 : f32 to vector<1x128xf32>
    %152 = arith.mulf %148, %151 : vector<1x128xf32>
    %153 = arith.mulf %150, %150 : vector<1x128xf32>
    %154 = arith.subf %152, %153 : vector<1x128xf32>
    %cst_62 = arith.constant 0.000000e+00 : f32
    %155 = vector.broadcast %cst_62 : f32 to vector<1x128xf32>
    %156 = arith.maximumf %154, %155 : vector<1x128xf32>
    %cst_63 = arith.constant 9.99999974E-6 : f32
    %157 = vector.broadcast %cst_63 : f32 to vector<1x128xf32>
    %158 = arith.addf %156, %157 : vector<1x128xf32>
    %159 = math.rsqrt %158 : vector<1x128xf32>
    %160 = arith.mulf %142, %159 : vector<1x128xf32>
    %161 = arith.mulf %150, %160 : vector<1x128xf32>
    %162 = arith.subf %143, %161 : vector<1x128xf32>
    %163 = vector.broadcast %160 : vector<1x128xf32> to vector<32x128xf32>
    %164 = arith.mulf %141, %163 : vector<32x128xf32>
    %165 = vector.broadcast %162 : vector<1x128xf32> to vector<32x128xf32>
    %166 = arith.addf %164, %165 : vector<32x128xf32>
    %cst_64 = arith.constant 0.000000e+00 : f32
    %167 = vector.broadcast %cst_64 : f32 to vector<32x128xf32>
    %168 = arith.cmpf oge, %166, %167 : vector<32x128xf32>
    %cst_65 = arith.constant 2.000000e-01 : f32
    %169 = vector.broadcast %cst_65 : f32 to vector<32x128xf32>
    %170 = arith.mulf %169, %166 : vector<32x128xf32>
    %171 = arith.select %168, %166, %170 : vector<32x128xi1>, vector<32x128xf32>
    %c0_66 = arith.constant 0 : index
    %c0_67 = arith.constant 0 : index
    %172 = vector.load %arg15[%c0_66, %c0_67] : memref<18x32xbf16, #tpu.memory_space<vmem>>, vector<18x32xbf16>
    %173 = arith.truncf %171 : vector<32x128xf32> to vector<32x128xbf16>
    %cst_68 = arith.constant dense<0.000000e+00> : vector<18x128xf32>
    %174 = tpu.matmul %172, %173, %cst_68 {dimension_numbers = #tpu.dot_dimension_numbers<[1], [0], [0], [1], [0, 0, 1, 1], [], []>} : vector<18x32xbf16>, vector<32x128xbf16>, vector<18x128xf32> -> vector<18x128xf32>
    %175 = vector.extract_strided_slice %174 {offsets = [0, 0], sizes = [18, 32], strides = [1, 1]} : vector<18x128xf32> to vector<18x32xf32>
    %176 = arith.truncf %175 : vector<18x32xf32> to vector<18x32xbf16>
    %c0_69 = arith.constant 0 : index
    %c0_70 = arith.constant 0 : index
    %177 = vector.load %arg16[%c0_69, %c0_70] : memref<32x1152xbf16, #tpu.memory_space<vmem>>, vector<32x1152xbf16>
    %cst_71 = arith.constant dense<0.000000e+00> : vector<18x1152xf32>
    %178 = tpu.matmul %176, %177, %cst_71 {dimension_numbers = #tpu.dot_dimension_numbers<[1], [0], [0], [1], [0, 0, 1, 1], [], []>} : vector<18x32xbf16>, vector<32x1152xbf16>, vector<18x1152xf32> -> vector<18x1152xf32>
    %179 = vector.extract_strided_slice %178 {offsets = [0, 0], sizes = [1, 128], strides = [1, 1]} : vector<18x1152xf32> to vector<1x128xf32>
    %180 = vector.extract_strided_slice %178 {offsets = [1, 128], sizes = [1, 128], strides = [1, 1]} : vector<18x1152xf32> to vector<1x128xf32>
    %181 = arith.addf %179, %180 : vector<1x128xf32>
    %182 = vector.extract_strided_slice %178 {offsets = [2, 256], sizes = [1, 128], strides = [1, 1]} : vector<18x1152xf32> to vector<1x128xf32>
    %183 = arith.addf %181, %182 : vector<1x128xf32>
    %184 = vector.extract_strided_slice %178 {offsets = [3, 384], sizes = [1, 128], strides = [1, 1]} : vector<18x1152xf32> to vector<1x128xf32>
    %185 = arith.addf %183, %184 : vector<1x128xf32>
    %186 = vector.extract_strided_slice %178 {offsets = [4, 512], sizes = [1, 128], strides = [1, 1]} : vector<18x1152xf32> to vector<1x128xf32>
    %187 = arith.addf %185, %186 : vector<1x128xf32>
    %188 = vector.extract_strided_slice %178 {offsets = [5, 640], sizes = [1, 128], strides = [1, 1]} : vector<18x1152xf32> to vector<1x128xf32>
    %189 = arith.addf %187, %188 : vector<1x128xf32>
    %190 = vector.extract_strided_slice %178 {offsets = [6, 768], sizes = [1, 128], strides = [1, 1]} : vector<18x1152xf32> to vector<1x128xf32>
    %191 = arith.addf %189, %190 : vector<1x128xf32>
    %192 = vector.extract_strided_slice %178 {offsets = [7, 896], sizes = [1, 128], strides = [1, 1]} : vector<18x1152xf32> to vector<1x128xf32>
    %193 = arith.addf %191, %192 : vector<1x128xf32>
    %194 = vector.extract_strided_slice %178 {offsets = [8, 1024], sizes = [1, 128], strides = [1, 1]} : vector<18x1152xf32> to vector<1x128xf32>
    %195 = arith.addf %193, %194 : vector<1x128xf32>
    %196 = vector.extract_strided_slice %178 {offsets = [9, 0], sizes = [1, 128], strides = [1, 1]} : vector<18x1152xf32> to vector<1x128xf32>
    %197 = vector.extract_strided_slice %178 {offsets = [10, 128], sizes = [1, 128], strides = [1, 1]} : vector<18x1152xf32> to vector<1x128xf32>
    %198 = arith.addf %196, %197 : vector<1x128xf32>
    %199 = vector.extract_strided_slice %178 {offsets = [11, 256], sizes = [1, 128], strides = [1, 1]} : vector<18x1152xf32> to vector<1x128xf32>
    %200 = arith.addf %198, %199 : vector<1x128xf32>
    %201 = vector.extract_strided_slice %178 {offsets = [12, 384], sizes = [1, 128], strides = [1, 1]} : vector<18x1152xf32> to vector<1x128xf32>
    %202 = arith.addf %200, %201 : vector<1x128xf32>
    %203 = vector.extract_strided_slice %178 {offsets = [13, 512], sizes = [1, 128], strides = [1, 1]} : vector<18x1152xf32> to vector<1x128xf32>
    %204 = arith.addf %202, %203 : vector<1x128xf32>
    %205 = vector.extract_strided_slice %178 {offsets = [14, 640], sizes = [1, 128], strides = [1, 1]} : vector<18x1152xf32> to vector<1x128xf32>
    %206 = arith.addf %204, %205 : vector<1x128xf32>
    %207 = vector.extract_strided_slice %178 {offsets = [15, 768], sizes = [1, 128], strides = [1, 1]} : vector<18x1152xf32> to vector<1x128xf32>
    %208 = arith.addf %206, %207 : vector<1x128xf32>
    %209 = vector.extract_strided_slice %178 {offsets = [16, 896], sizes = [1, 128], strides = [1, 1]} : vector<18x1152xf32> to vector<1x128xf32>
    %210 = arith.addf %208, %209 : vector<1x128xf32>
    %211 = vector.extract_strided_slice %178 {offsets = [17, 1024], sizes = [1, 128], strides = [1, 1]} : vector<18x1152xf32> to vector<1x128xf32>
    %212 = arith.addf %210, %211 : vector<1x128xf32>
    %213 = tpu.concatenate %195, %212 in 0 : vector<1x128xf32>, vector<1x128xf32> -> vector<2x128xf32>
    %c0_72 = arith.constant 0 : index
    %c0_73 = arith.constant 0 : index
    %214 = vector.load %arg17[%c0_72, %c0_73] : memref<1x128xf32, #tpu.memory_space<vmem>>, vector<1x128xf32>
    %c0_74 = arith.constant 0 : index
    %c0_75 = arith.constant 0 : index
    %215 = vector.load %arg18[%c0_74, %c0_75] : memref<1x128xf32, #tpu.memory_space<vmem>>, vector<1x128xf32>
    %cst_76 = arith.constant dense<0.000000e+00> : vector<128xf32>
    %216 = vector.multi_reduction <add>, %213, %cst_76 [0] : vector<2x128xf32> to vector<128xf32>
    %217 = vector.shape_cast %216 : vector<128xf32> to vector<1x128xf32>
    %218 = arith.mulf %213, %213 : vector<2x128xf32>
    %cst_77 = arith.constant dense<0.000000e+00> : vector<128xf32>
    %219 = vector.multi_reduction <add>, %218, %cst_77 [0] : vector<2x128xf32> to vector<128xf32>
    %220 = vector.shape_cast %219 : vector<128xf32> to vector<1x128xf32>
    %cst_78 = arith.constant 5.000000e-01 : f32
    %221 = vector.broadcast %cst_78 : f32 to vector<1x128xf32>
    %222 = arith.mulf %217, %221 : vector<1x128xf32>
    %cst_79 = arith.constant 5.000000e-01 : f32
    %223 = vector.broadcast %cst_79 : f32 to vector<1x128xf32>
    %224 = arith.mulf %220, %223 : vector<1x128xf32>
    %225 = arith.mulf %222, %222 : vector<1x128xf32>
    %226 = arith.subf %224, %225 : vector<1x128xf32>
    %cst_80 = arith.constant 0.000000e+00 : f32
    %227 = vector.broadcast %cst_80 : f32 to vector<1x128xf32>
    %228 = arith.maximumf %226, %227 : vector<1x128xf32>
    %cst_81 = arith.constant 9.99999974E-6 : f32
    %229 = vector.broadcast %cst_81 : f32 to vector<1x128xf32>
    %230 = arith.addf %228, %229 : vector<1x128xf32>
    %231 = math.rsqrt %230 : vector<1x128xf32>
    %232 = arith.mulf %214, %231 : vector<1x128xf32>
    %233 = arith.mulf %222, %232 : vector<1x128xf32>
    %234 = arith.subf %215, %233 : vector<1x128xf32>
    %235 = vector.broadcast %232 : vector<1x128xf32> to vector<2x128xf32>
    %236 = arith.mulf %213, %235 : vector<2x128xf32>
    %237 = vector.broadcast %234 : vector<1x128xf32> to vector<2x128xf32>
    %238 = arith.addf %236, %237 : vector<2x128xf32>
    %cst_82 = arith.constant 0.000000e+00 : f32
    %239 = vector.broadcast %cst_82 : f32 to vector<2x128xf32>
    %240 = arith.cmpf oge, %238, %239 : vector<2x128xf32>
    %cst_83 = arith.constant 2.000000e-01 : f32
    %241 = vector.broadcast %cst_83 : f32 to vector<2x128xf32>
    %242 = arith.mulf %241, %238 : vector<2x128xf32>
    %243 = arith.select %240, %238, %242 : vector<2x128xi1>, vector<2x128xf32>
    %244 = arith.truncf %243 : vector<2x128xf32> to vector<2x128xbf16>
    %c0_84 = arith.constant 0 : index
    %c0_85 = arith.constant 0 : index
    %245 = vector.load %arg19[%c0_84, %c0_85] : memref<128x128xbf16, #tpu.memory_space<vmem>>, vector<128x128xbf16>
    %cst_86 = arith.constant dense<0.000000e+00> : vector<2x128xf32>
    %246 = tpu.matmul %244, %245, %cst_86 {dimension_numbers = #tpu.dot_dimension_numbers<[1], [0], [0], [1], [0, 0, 1, 1], [], []>} : vector<2x128xbf16>, vector<128x128xbf16>, vector<2x128xf32> -> vector<2x128xf32>
    %c0_87 = arith.constant 0 : index
    %c0_88 = arith.constant 0 : index
    %247 = vector.load %arg20[%c0_87, %c0_88] : memref<1x128xf32, #tpu.memory_space<vmem>>, vector<1x128xf32>
    %248 = vector.broadcast %247 : vector<1x128xf32> to vector<2x128xf32>
    %249 = arith.addf %246, %248 : vector<2x128xf32>
    %cst_89 = arith.constant 0.000000e+00 : f32
    %250 = vector.broadcast %cst_89 : f32 to vector<2x128xf32>
    %251 = arith.cmpf oge, %249, %250 : vector<2x128xf32>
    %cst_90 = arith.constant 2.000000e-01 : f32
    %252 = vector.broadcast %cst_90 : f32 to vector<2x128xf32>
    %253 = arith.mulf %252, %249 : vector<2x128xf32>
    %254 = arith.select %251, %249, %253 : vector<2x128xi1>, vector<2x128xf32>
    %c0_91 = arith.constant 0 : index
    %c0_92 = arith.constant 0 : index
    %255 = vector.load %arg21[%c0_91, %c0_92] : memref<1x128xf32, #tpu.memory_space<vmem>>, vector<1x128xf32>
    %256 = vector.broadcast %255 : vector<1x128xf32> to vector<2x128xf32>
    %257 = arith.mulf %254, %256 : vector<2x128xf32>
    %cst_93 = arith.constant dense<0.000000e+00> : vector<2xf32>
    %258 = vector.multi_reduction <add>, %257, %cst_93 [1] : vector<2x128xf32> to vector<2xf32>
    %259 = vector.shape_cast %258 : vector<2xf32> to vector<2x1xf32>
    %c0_94 = arith.constant 0 : index
    %c0_95 = arith.constant 0 : index
    %260 = vector.load %arg22[%c0_94, %c0_95] : memref<1x1xf32, #tpu.memory_space<vmem>>, vector<1x1xf32>
    %261 = vector.broadcast %260 : vector<1x1xf32> to vector<2x1xf32>
    %262 = arith.addf %259, %261 : vector<2x1xf32>
    %263 = math.absf %262 : vector<2x1xf32>
    %cst_96 = arith.constant 0.000000e+00 : f32
    %264 = vector.broadcast %cst_96 : f32 to vector<2x1xf32>
    %265 = arith.subf %264, %263 : vector<2x1xf32>
    %266 = math.exp %265 : vector<2x1xf32>
    %cst_97 = arith.constant 0.000000e+00 : f32
    %267 = vector.broadcast %cst_97 : f32 to vector<2x1xf32>
    %268 = arith.cmpf oge, %262, %267 : vector<2x1xf32>
    %cst_98 = arith.constant 1.000000e+00 : f32
    %269 = vector.broadcast %cst_98 : f32 to vector<2x1xf32>
    %270 = arith.addf %269, %266 : vector<2x1xf32>
    %cst_99 = arith.constant 1.000000e+00 : f32
    %271 = vector.broadcast %cst_99 : f32 to vector<2x1xf32>
    %272 = arith.divf %271, %270 : vector<2x1xf32>
    %cst_100 = arith.constant 1.000000e+00 : f32
    %273 = vector.broadcast %cst_100 : f32 to vector<2x1xf32>
    %274 = arith.addf %273, %266 : vector<2x1xf32>
    %275 = arith.divf %266, %274 : vector<2x1xf32>
    %276 = arith.select %268, %272, %275 : vector<2x1xi1>, vector<2x1xf32>
    %c0_101 = arith.constant 0 : index
    %c0_102 = arith.constant 0 : index
    %277 = vector.load %arg23[%c0_101, %c0_102] : memref<2x1xf32, #tpu.memory_space<vmem>>, vector<2x1xf32>
    tpu.vector_store %arg23[%c0_101, %c0_102], %276 {strides = array<i32>} : memref<2x1xf32, #tpu.memory_space<vmem>>, vector<2x1xf32>,
    return
  }
}

</mosaic_0001>

<bundles_post_ra>
// kernel: apply.1
= control target key start
LH: loop header
LB: loop body
LE: loop exit
PB: predicated region body
PF: predicated region fallthrough
CT: control target
= control target key end

     0   :  { %v234_v0 = vlaneseq  ;;  %v8730_v1 = vmov 0   ;;  %v6261_v3 = vmov 1983009808   ;;  %vm314_vm0 = vcmask 1041408   ;;  %s6265_s28 = smov 16   ;;  %s8701_s4 = inlined_call_operand.vmem [shape: f32[338,1], index: 4, kind: input, shape index: {}]   ;;  %s8702_s1 = inlined_call_operand.vmem [shape: bf16[4,512], index: 1, kind: input, shape index: {}]   ;;  %s8703_s0 = inlined_call_operand.vmem [shape: bf16[338,4], index: 0, kind: input, shape index: {}]   ;;  %s8704_s5 = inlined_call_operand.vmem [shape: bf16[392,338], index: 5, kind: input, shape index: {}]   ;;  %s8705_s2 = inlined_call_operand.vmem [shape: f32[1,128], index: 2, kind: input, shape index: {}]   ;;  %s8706_s3 = inlined_call_operand.vmem [shape: f32[1,128], index: 3, kind: input, shape index: {}]   ;;  %s8707_s6 = inlined_call_operand.vmem [shape: bf16[32,512], index: 6, kind: input, shape index: {}]   ;;  %s8708_s9 = inlined_call_operand.vmem [shape: f32[98,1], index: 9, kind: input, shape index: {}]   ;;  %s8709_s10 = inlined_call_operand.vmem [shape: bf16[128,98], index: 10, kind: input, shape index: {}]   ;;  %s8710_s7 = inlined_call_operand.vmem [shape: f32[1,128], index: 7, kind: input, shape index: {}]   ;;  %s8711_s8 = inlined_call_operand.vmem [shape: f32[1,128], index: 8, kind: input, shape index: {}]   ;;  %s8712_s11 = inlined_call_operand.vmem [shape: bf16[64,512], index: 11, kind: input, shape index: {}]   ;;  %s8713_s14 = inlined_call_operand.vmem [shape: f32[32,1], index: 14, kind: input, shape index: {}]   ;;  %s8714_s15 = inlined_call_operand.vmem [shape: bf16[18,32], index: 15, kind: input, shape index: {}]   ;;  %s8715_s12 = inlined_call_operand.vmem [shape: f32[1,128], index: 12, kind: input, shape index: {}]   ;;  %s8716_s13 = inlined_call_operand.vmem [shape: f32[1,128], index: 13, kind: input, shape index: {}]   ;;  %s8717_s16 = inlined_call_operand.vmem [shape: bf16[32,1152], index: 16, kind: input, shape index: {}]   ;;  %s8718_s19 = inlined_call_operand.vmem [shape: bf16[128,128], index: 19, kind: input, shape index: {}]   ;;  %s8719_s17 = inlined_call_operand.vmem [shape: f32[1,128], index: 17, kind: input, shape index: {}]   ;;  %s8720_s18 = inlined_call_operand.vmem [shape: f32[1,128], index: 18, kind: input, shape index: {}]   ;;  %s8721_s22 = inlined_call_operand.<no memory space> [shape: f32[1,1], index: 22, kind: input, shape index: {}]   ;;  %s8722_s20 = inlined_call_operand.vmem [shape: f32[1,128], index: 20, kind: input, shape index: {}]   ;;  %s8723_s21 = inlined_call_operand.vmem [shape: f32[1,128], index: 21, kind: input, shape index: {}]   ;;  %s8724_s23 = inlined_call_operand.vmem [shape: f32[2,1], index: 23, kind: output, shape index: {}]  }
   0x1   :  { %8749 = sst [smem:[#allocation15_spill]] %s8701_s4  ;;  %5924 = vset.pattern.permute.xlu0 %v8730_v1  ;;  %v232_v4 = vunpack.c.l.s4 %v6261_v3  ;;  %359 = vmatprep.mubr.bf16.mxu0 %v8730_v1  ;;  %vm247_vm1 = vcmask 31744   ;;  %vm999_vm2 = vcmask 1040384   ;;  %vm870_vm3 = vcmask 1046528  }
   0x2   :  { %8750 = sst [smem:[#allocation16_spill]] %s8702_s1  ;;  %v6397_v6 = vshrl.u32 %v234_v0, 7  ;;  %569 = vmatprep.mubr.bf16.mxu1 %v8730_v1  ;;  %5925 = vset.pattern.permute.xlu1 %v8730_v1  ;;  %vm1086_vm4 = vcmask 1042432   ;;  %vm1211_vm5 = vcmask 1044480   ;;  %vm1422_vm6 = vcmask 1043456  }
   0x3   :  { %8751 = sst [smem:[#allocation17_spill]] %s8703_s0  ;;  %v233_v9 = vunpack.c.0.s8 %v232_v4  ;;  %vm6263_vm7 = vmmov 0  }
   0x4   :  { %8752 = sst [smem:[#allocation18_spill]] %s8704_s5 }
   0x5   :  { %8753 = sst [smem:[#allocation19_spill]] %s8705_s2  ;;  %v236_v10 = vsub.s32 %v233_v9, %v6397_v6 }
   0x6   :  { %8754 = sst [smem:[#allocation20_spill]] %s8706_s3 }
   0x7   :  { %8755 = sst [smem:[#allocation21_spill]] %s8707_s6 }
   0x8   :  { %8756 = sst [smem:[#allocation22_spill]] %s8708_s9  ;;  %s6267_s9 = smov 32  }
   0x9   :  { %s8757_s24 = sld [smem:[#allocation15_spill]] }
   0xa   :  { %s8758_s1 = sld [smem:[#allocation16_spill]] }
   0xb   :  { %s8759_s29 = sld [smem:[#allocation17_spill]] }
   0xc   :  { %s8774_s25 = sld [smem:[#allocation18_spill]] }
   0xd   :  { %s8775_s26 = sld [smem:[#allocation19_spill]] }
   0xe   :  { %s8776_s27 = sld [smem:[#allocation20_spill]] }
   0xf   :  { %v1467_v2 = vld [vmem:[%s8757_s24] sm:$0xff]  ;;  %v1468_v7 = vld [vmem:[%s8757_s24 + $0x8] sm:$0xff]  ;;  %v1473_v19 = vld [vmem:[%s8757_s24 + $0x30] sm:$0xff]  ;;  %s8790_s3 = sld [smem:[#allocation21_spill]] }
  0x10   :  { %1512 = vperm.xlu0 %5924, %v1467_v2   ;;  %v120_v5 = vld [vmem:[%s8758_s1] sm:$0xff]  ;;  %v1477_v23 = vld [vmem:[%s8757_s24 + $0x50] sm:$0xff]  ;;  %v1470_v26 = vld [vmem:[%s8757_s24 + $0x18] sm:$0xff] }
  0x11   :  { %v230_v8 = vcombine.high %v120_v5, %v120_v5  ;;  %v237_v11 = vrot.slane %v120_v5, %v236_v10  ;;  %v1471_v13 = vld [vmem:[%s8757_s24 + $0x20] sm:$0xff]  ;;  %v6415_v18 = vld [vmem:[%s8759_s29 + $0xa8] ss:$0 sps:$4 sm:$0x11]   ;;  %v1469_v24 = vld [vmem:[%s8757_s24 + $0x10] sm:$0xff] }
  0x12   :  { %v6047_v17 = vld [vmem:[%s8759_s29] sm:$0xff]   ;;  %v6049_v22 = vld [vmem:[%s8759_s29 + $0x8] sm:$0xff]   ;;  %1522 = vperm.xlu1 %5925, %v1469_v24   ;;  %v6050_v27 = vld [vmem:[%s8759_s29 + $0x10] sm:$0xff]  }
  0x13   :  { %v244_v12 = vrot.slane %v230_v8, %v236_v10  ;;  %v245_v14 = vcombine.high %v237_v11, %v237_v11  ;;  %v316_v15 = vsel %vm314_vm0, %v237_v11, 0  ;;  %v1475_v21 = vld [vmem:[%s8757_s24 + $0x40] sm:$0xff]  ;;  %v1481_v28 = vld [vmem:[%s8757_s24 + $0x70] sm:$0xff]  ;;  %v1472_v29 = vld [vmem:[%s8757_s24 + $0x28] sm:$0xff] }
  0x14   :  { %1517 = vperm.xlu0 %5924, %v1468_v7   ;;  %v1479_v25 = vld [vmem:[%s8757_s24 + $0x60] sm:$0xff]  ;;  %v1474_v31 = vld [vmem:[%s8757_s24 + $0x38] sm:$0xff]  ;;  %v1485_v33 = vld [vmem:[%s8757_s24 + $0x90] sm:$0xff] }
  0x15   :  { %v246_v16 = vcombine.high %v244_v12, %v244_v12  ;;  %5424 = vmatprep.subr.msk.bf16.mxu0 %vm314_vm0, %v245_v14  ;;  %5912 = vmatprep.subr.msk.bf16.mxu1 %vm314_vm0, %v245_v14  ;;  %v322_v20 = vsel %vm314_vm0, %v244_v12, 0  ;;  %v1483_v30 = vld [vmem:[%s8757_s24 + $0x80] sm:$0xff]  ;;  %v6051_v32 = vld [vmem:[%s8759_s29 + $0x18] sm:$0xff]   ;;  %v1476_v34 = vld [vmem:[%s8757_s24 + $0x48] sm:$0xff] }
  0x16   :  { %342 = vmatpush1.bf16.msra.mxu0 %v316_v15  ;;  %5913 = vmatpush1.bf16.msra.mxu1 %v316_v15  ;;  %v1487_v35 = vld [vmem:[%s8757_s24 + $0xa0] sm:$0xff]  ;;  %v1478_v36 = vld [vmem:[%s8757_s24 + $0x58] sm:$0xff]  ;;  %v1489_v38 = vld [vmem:[%s8757_s24 + $0xb0] sm:$0xff] }
  0x17   :  { %5447 = vmatprep.subr.msk.bf16.mxu1 %vm314_vm0, %v246_v16  ;;  %2717 = vmatprep.subr.bf16.mxu0 %v8730_v1  ;;  %v6052_v37 = vld [vmem:[%s8759_s29 + $0x20] sm:$0xff]   ;;  %v1480_v39 = vld [vmem:[%s8757_s24 + $0x68] sm:$0xff]  ;;  %v1482_v41 = vld [vmem:[%s8757_s24 + $0x78] sm:$0xff] }
  0x18   :  { %1532 = vperm.xlu0 %5924, %v1471_v13   ;;  %1527 = vperm.xlu1 %5925, %v1470_v26   ;;  %v1491_v40 = vld [vmem:[%s8757_s24 + $0xc0] sm:$0xff]  ;;  %v6053_v42 = vld [vmem:[%s8759_s29 + $0x28] sm:$0xff]   ;;  %v1493_v43 = vld [vmem:[%s8757_s24 + $0xd0] sm:$0xff] }
  0x19   :  { %5425 = vmatmul.mubr.msk.bf16.vlgmr.msra.gmra.mxu0 %vm247_vm1, %v6047_v17  ;;  %5446 = vmatmul.mubr.msk.bf16.vlgmr.msra.gmra.mxu1 %vm247_vm1, %v6415_v18  ;;  %v1484_v44 = vld [vmem:[%s8757_s24 + $0x88] sm:$0xff]  ;;  %v1495_v45 = vld [vmem:[%s8757_s24 + $0xe0] sm:$0xff]  ;;  %v1486_v46 = vld [vmem:[%s8757_s24 + $0x98] sm:$0xff] }
  0x1a   :  { %593 = vmatpush1.bf16.msra.mxu1 %v322_v20  ;;  %369 = vmatprep.mubr.bf16.mxu0 %v8730_v1  ;;  %v6054_v47 = vld [vmem:[%s8759_s29 + $0x30] sm:$0xff]   ;;  %v1488_v49 = vld [vmem:[%s8757_s24 + $0xa8] sm:$0xff]  ;;  %v1499_v50 = vld [vmem:[%s8757_s24 + $0x100] sm:$0xff] }
  0x1b   :  { %610 = vmatprep.mubr.bf16.mxu1 %v8730_v1  ;;  %v1497_v48 = vld [vmem:[%s8757_s24 + $0xf0] sm:$0xff]  ;;  %v1490_v51 = vld [vmem:[%s8757_s24 + $0xb8] sm:$0xff]  ;;  %v1492_v54 = vld [vmem:[%s8757_s24 + $0xc8] sm:$0xff] }
  0x1c   :  { %1542 = vperm.xlu0 %5924, %v1473_v19   ;;  %1537 = vperm.xlu1 %5925, %v1472_v29   ;;  %v6055_v52 = vld [vmem:[%s8759_s29 + $0x38] sm:$0xff]   ;;  %v1501_v53 = vld [vmem:[%s8757_s24 + $0x110] sm:$0xff]  ;;  %v1503_v55 = vld [vmem:[%s8757_s24 + $0x120] sm:$0xff] }
  0x1d   :  { %v1494_v56 = vld [vmem:[%s8757_s24 + $0xd8] sm:$0xff]  ;;  %v6056_v57 = vld [vmem:[%s8759_s29 + $0x40] sm:$0xff]   ;;  %v1505_v58 = vld [vmem:[%s8757_s24 + $0x130] sm:$0xff] }
  0x1e   :  { %v1496_v59 = vld [vmem:[%s8757_s24 + $0xe8] sm:$0xff]  ;;  %v1507_v60 = vld [vmem:[%s8757_s24 + $0x140] sm:$0xff]  ;;  %v1498_v61 = vld [vmem:[%s8757_s24 + $0xf8] sm:$0xff] }
  0x1f   :  { %v6057_v62 = vld [vmem:[%s8759_s29 + $0x48] sm:$0xff]   ;;  %v1509_v63 = vld [vmem:[%s8757_s24 + $0x150] sm:$0x3]  ;;  %v1502_v2 = vld [vmem:[%s8757_s24 + $0x118] sm:$0xff] }
  0x20   :  { %1552 = vperm.xlu0 %5924, %v1475_v21   ;;  %1547 = vperm.xlu1 %5925, %v1474_v31   ;;  %v1500_v0 = vld [vmem:[%s8757_s24 + $0x108] sm:$0xff]  ;;  %v6058_v3 = vld [vmem:[%s8759_s29 + $0x50] sm:$0xff]   ;;  %v1506_v5 = vld [vmem:[%s8757_s24 + $0x138] sm:$0xff] }
  0x21   :  { %5426 = vmatmul.mubr.msk.bf16.gmra.mxu0 %vm247_vm1, %v6049_v22  ;;  %5448 = vmatmul.mubr.msk.bf16.vlgmr.msra.gmra.mxu1 %vm247_vm1, %v6047_v17  ;;  %v1504_v4 = vld [vmem:[%s8757_s24 + $0x128] sm:$0xff]  ;;  %v6059_v7 = vld [vmem:[%s8759_s29 + $0x58] sm:$0xff]   ;;  %v6060_v9 = vld [vmem:[%s8759_s29 + $0x60] sm:$0xff]  }
  0x22   :  { %379 = vmatprep.mubr.bf16.mxu0 %v8730_v1  ;;  %618 = vmatprep.mubr.bf16.mxu1 %v8730_v1  ;;  %v1508_v8 = vld [vmem:[%s8757_s24 + $0x148] sm:$0xff]  ;;  %v6062_v11 = vld [vmem:[%s8759_s29 + $0x70] sm:$0xff]   ;;  %v6063_v12 = vld [vmem:[%s8759_s29 + $0x78] sm:$0xff]  }
  0x23   :  { %v6061_v10 = vld [vmem:[%s8759_s29 + $0x68] sm:$0xff]   ;;  %v6064_v13 = vld [vmem:[%s8759_s29 + $0x80] sm:$0xff]   ;;  %v6066_v15 = vld [vmem:[%s8759_s29 + $0x90] sm:$0xff]  }
  0x24   :  { %1562 = vperm.xlu0 %5924, %v1477_v23   ;;  %1557 = vperm.xlu1 %5925, %v1476_v34   ;;  %v6065_v14 = vld [vmem:[%s8759_s29 + $0x88] sm:$0xff]   ;;  %v6067_v16 = vld [vmem:[%s8759_s29 + $0x98] sm:$0xff]   ;;  %v6068_v17 = vld [vmem:[%s8759_s29 + $0xa0] sm:$0xff]  }
  0x28   :  { %1572 = vperm.xlu0 %5924, %v1479_v25   ;;  %1567 = vperm.xlu1 %5925, %v1478_v36  }
  0x29   :  { %5427 = vmatmul.mubr.msk.bf16.gmra.mxu0 %vm247_vm1, %v6050_v27  ;;  %5449 = vmatmul.mubr.msk.bf16.gmra.mxu1 %vm247_vm1, %v6049_v22 }
  0x2a   :  { %389 = vmatprep.mubr.bf16.mxu0 %v8730_v1  ;;  %628 = vmatprep.mubr.bf16.mxu1 %v8730_v1 }
  0x2c   :  { %1582 = vperm.xlu0 %5924, %v1481_v28   ;;  %1577 = vperm.xlu1 %5925, %v1480_v39  }
  0x30   :  { %1592 = vperm.xlu0 %5924, %v1483_v30   ;;  %1587 = vperm.xlu1 %5925, %v1482_v41  }
  0x31   :  { %5428 = vmatmul.mubr.msk.bf16.gmra.mxu0 %vm247_vm1, %v6051_v32  ;;  %5450 = vmatmul.mubr.msk.bf16.gmra.mxu1 %vm247_vm1, %v6050_v27 }
  0x32   :  { %399 = vmatprep.mubr.bf16.mxu0 %v8730_v1  ;;  %638 = vmatprep.mubr.bf16.mxu1 %v8730_v1 }
  0x34   :  { %1602 = vperm.xlu0 %5924, %v1485_v33   ;;  %1597 = vperm.xlu1 %5925, %v1484_v44  }
  0x38   :  { %1612 = vperm.xlu0 %5924, %v1487_v35   ;;  %1607 = vperm.xlu1 %5925, %v1486_v46  }
  0x39   :  { %5429 = vmatmul.mubr.msk.bf16.gmra.mxu0 %vm247_vm1, %v6052_v37  ;;  %5451 = vmatmul.mubr.msk.bf16.gmra.mxu1 %vm247_vm1, %v6051_v32 }
  0x3a   :  { %409 = vmatprep.mubr.bf16.mxu0 %v8730_v1  ;;  %648 = vmatprep.mubr.bf16.mxu1 %v8730_v1 }
  0x3c   :  { %1622 = vperm.xlu0 %5924, %v1489_v38   ;;  %1617 = vperm.xlu1 %5925, %v1488_v49  }
  0x40   :  { %1632 = vperm.xlu0 %5924, %v1491_v40   ;;  %1627 = vperm.xlu1 %5925, %v1490_v51  }
  0x41   :  { %5430 = vmatmul.mubr.msk.bf16.gmra.mxu0 %vm247_vm1, %v6053_v42  ;;  %5452 = vmatmul.mubr.msk.bf16.gmra.mxu1 %vm247_vm1, %v6052_v37 }
  0x42   :  { %419 = vmatprep.mubr.bf16.mxu0 %v8730_v1  ;;  %658 = vmatprep.mubr.bf16.mxu1 %v8730_v1 }
  0x44   :  { %1642 = vperm.xlu0 %5924, %v1493_v43   ;;  %1637 = vperm.xlu1 %5925, %v1492_v54  }
  0x48   :  { %1652 = vperm.xlu0 %5924, %v1495_v45   ;;  %1647 = vperm.xlu1 %5925, %v1494_v56  }
  0x49   :  { %5431 = vmatmul.mubr.msk.bf16.gmra.mxu0 %vm247_vm1, %v6054_v47  ;;  %5453 = vmatmul.mubr.msk.bf16.gmra.mxu1 %vm247_vm1, %v6053_v42 }
  0x4a   :  { %429 = vmatprep.mubr.bf16.mxu0 %v8730_v1  ;;  %668 = vmatprep.mubr.bf16.mxu1 %v8730_v1 }
  0x4c   :  { %1662 = vperm.xlu0 %5924, %v1497_v48   ;;  %1657 = vperm.xlu1 %5925, %v1496_v59  }
  0x50   :  { %1672 = vperm.xlu0 %5924, %v1499_v50   ;;  %1667 = vperm.xlu1 %5925, %v1498_v61  }
  0x51   :  { %5432 = vmatmul.mubr.msk.bf16.gmra.mxu0 %vm247_vm1, %v6055_v52  ;;  %5454 = vmatmul.mubr.msk.bf16.gmra.mxu1 %vm247_vm1, %v6054_v47 }
  0x52   :  { %439 = vmatprep.mubr.bf16.mxu0 %v8730_v1  ;;  %678 = vmatprep.mubr.bf16.mxu1 %v8730_v1 }
  0x54   :  { %1682 = vperm.xlu0 %5924, %v1501_v53   ;;  %1677 = vperm.xlu1 %5925, %v1500_v0  }
  0x58   :  { %1692 = vperm.xlu0 %5924, %v1503_v55   ;;  %1687 = vperm.xlu1 %5925, %v1502_v2  }
  0x59   :  { %5433 = vmatmul.mubr.msk.bf16.gmra.mxu0 %vm247_vm1, %v6056_v57  ;;  %5455 = vmatmul.mubr.msk.bf16.gmra.mxu1 %vm247_vm1, %v6055_v52 }
  0x5a   :  { %449 = vmatprep.mubr.bf16.mxu0 %v8730_v1  ;;  %688 = vmatprep.mubr.bf16.mxu1 %v8730_v1 }
  0x5c   :  { %1702 = vperm.xlu0 %5924, %v1505_v58   ;;  %1697 = vperm.xlu1 %5925, %v1504_v4  }
  0x60   :  { %1712 = vperm.xlu0 %5924, %v1507_v60   ;;  %1707 = vperm.xlu1 %5925, %v1506_v5  }
  0x61   :  { %5434 = vmatmul.mubr.msk.bf16.gmra.mxu0 %vm247_vm1, %v6057_v62  ;;  %5456 = vmatmul.mubr.msk.bf16.gmra.mxu1 %vm247_vm1, %v6056_v57 }
  0x62   :  { %459 = vmatprep.mubr.bf16.mxu0 %v8730_v1  ;;  %698 = vmatprep.mubr.bf16.mxu1 %v8730_v1 }
  0x64   :  { %1722 = vperm.xlu0 %5924, %v1509_v63   ;;  %1717 = vperm.xlu1 %5925, %v1508_v8  }
  0x69   :  { %5435 = vmatmul.mubr.msk.bf16.gmra.mxu0 %vm247_vm1, %v6058_v3  ;;  %5457 = vmatmul.mubr.msk.bf16.gmra.mxu1 %vm247_vm1, %v6057_v62 }
  0x6a   :  { %469 = vmatprep.mubr.bf16.mxu0 %v8730_v1  ;;  %708 = vmatprep.mubr.bf16.mxu1 %v8730_v1 }
  0x71   :  { %5436 = vmatmul.mubr.msk.bf16.gmra.mxu0 %vm247_vm1, %v6059_v7  ;;  %5458 = vmatmul.mubr.msk.bf16.gmra.mxu1 %vm247_vm1, %v6058_v3 }
  0x72   :  { %479 = vmatprep.mubr.bf16.mxu0 %v8730_v1  ;;  %718 = vmatprep.mubr.bf16.mxu1 %v8730_v1 }
  0x79   :  { %5437 = vmatmul.mubr.msk.bf16.gmra.mxu0 %vm247_vm1, %v6060_v9  ;;  %5459 = vmatmul.mubr.msk.bf16.gmra.mxu1 %vm247_vm1, %v6059_v7 }
  0x7a   :  { %489 = vmatprep.mubr.bf16.mxu0 %v8730_v1  ;;  %728 = vmatprep.mubr.bf16.mxu1 %v8730_v1 }
  0x81   :  { %5438 = vmatmul.mubr.msk.bf16.gmra.mxu0 %vm247_vm1, %v6061_v10  ;;  %5460 = vmatmul.mubr.msk.bf16.gmra.mxu1 %vm247_vm1, %v6060_v9 }
  0x82   :  { %499 = vmatprep.mubr.bf16.mxu0 %v8730_v1  ;;  %738 = vmatprep.mubr.bf16.mxu1 %v8730_v1 }
  0x89   :  { %5439 = vmatmul.mubr.msk.bf16.gmra.mxu0 %vm247_vm1, %v6062_v11  ;;  %5461 = vmatmul.mubr.msk.bf16.gmra.mxu1 %vm247_vm1, %v6061_v10 }
  0x8a   :  { %509 = vmatprep.mubr.bf16.mxu0 %v8730_v1  ;;  %748 = vmatprep.mubr.bf16.mxu1 %v8730_v1 }
  0x91   :  { %5440 = vmatmul.mubr.msk.bf16.gmra.mxu0 %vm247_vm1, %v6063_v12  ;;  %5462 = vmatmul.mubr.msk.bf16.gmra.mxu1 %vm247_vm1, %v6062_v11 }
  0x92   :  { %519 = vmatprep.mubr.bf16.mxu0 %v8730_v1  ;;  %758 = vmatprep.mubr.bf16.mxu1 %v8730_v1 }
  0x99   :  { %5441 = vmatmul.mubr.msk.bf16.gmra.mxu0 %vm247_vm1, %v6064_v13  ;;  %5463 = vmatmul.mubr.msk.bf16.gmra.mxu1 %vm247_vm1, %v6063_v12 }
  0x9a   :  { %529 = vmatprep.mubr.bf16.mxu0 %v8730_v1  ;;  %768 = vmatprep.mubr.bf16.mxu1 %v8730_v1 }
  0xa1   :  { %5442 = vmatmul.mubr.msk.bf16.gmra.mxu0 %vm247_vm1, %v6065_v14  ;;  %5464 = vmatmul.mubr.msk.bf16.gmra.mxu1 %vm247_vm1, %v6064_v13 }
  0xa2   :  { %539 = vmatprep.mubr.bf16.mxu0 %v8730_v1  ;;  %778 = vmatprep.mubr.bf16.mxu1 %v8730_v1 }
  0xa9   :  { %5443 = vmatmul.mubr.msk.bf16.gmra.mxu0 %vm247_vm1, %v6066_v15  ;;  %5465 = vmatmul.mubr.msk.bf16.gmra.mxu1 %vm247_vm1, %v6065_v14 }
  0xaa   :  { %549 = vmatprep.mubr.bf16.mxu0 %v8730_v1  ;;  %788 = vmatprep.mubr.bf16.mxu1 %v8730_v1 }
  0xb1   :  { %5444 = vmatmul.mubr.msk.bf16.gmra.mxu0 %vm247_vm1, %v6067_v16  ;;  %5466 = vmatmul.mubr.msk.bf16.gmra.mxu1 %vm247_vm1, %v6066_v15 }
  0xb2   :  { %559 = vmatprep.mubr.bf16.mxu0 %v8730_v1  ;;  %798 = vmatprep.mubr.bf16.mxu1 %v8730_v1 }
  0xb9   :  { %5445 = vmatmul.mubr.msk.bf16.gmra.mxu0 %vm247_vm1, %v6068_v17  ;;  %5467 = vmatmul.mubr.msk.bf16.gmra.mxu1 %vm247_vm1, %v6067_v16 }
  0xba   :  { %808 = vmatprep.mubr.bf16.mxu1 %v8730_v1 }
  0xc1   :  { %5468 = vmatmul.mubr.msk.bf16.gmra.mxu1 %vm247_vm1, %v6068_v17 }
  0xc2   :  { %818 = vmatprep.mubr.bf16.mxu1 %v8730_v1 }
  0xc9   :  { %5469 = vmatmul.mubr.msk.bf16.gmra.mxu1 %vm247_vm1, %v6415_v18 }
  0xd9   :  { %v361_v19 = vpop.f32.mrf.mxu0  ;;  %v571_v20 = vpop.f32.mrf.mxu1 }
  0xdb   :  { %v363_v21 = vpop.f32.mrf.mxu0  ;;  %v6690_v22 = vpop.f32.mrf.mxu1 }
  0xdc   :  { %v8732_v23 = vrot.slane %v6690_v22, 1  ;;  %v871_v26 = vrot.slane %v363_v21, 1 }
  0xdd   :  { %v365_v24 = vpop.f32.mrf.mxu0  ;;  %v575_v25 = vpop.f32.mrf.mxu1 }
  0xde   :  { %v1000_v27 = vsel %vm999_vm2, %v8732_v23, 0.0 }
  0xdf   :  { %v367_v28 = vpop.f32.mrf.mxu0  ;;  %v576_v29 = vpop.f32.mrf.mxu1  ;;  %v6696_v30 = vadd.f32 %v1000_v27, %v571_v20 }
  0xe0   :  { %v872_v18 = vrot.slane %v367_v28, 1 }
  0xe1   :  { %v371_v31 = vpop.f32.mrf.mxu0  ;;  %v612_v32 = vpop.f32.mrf.mxu1 }
  0xe2   :  { %v873_v33 = vsel %vm870_vm3, %v871_v26, %v872_v18 }
  0xe3   :  { %v1001_v34 = vadd.f32 %v873_v33, %v361_v19  ;;  %v373_v35 = vpop.f32.mrf.mxu0  ;;  %v613_v36 = vpop.f32.mrf.mxu1 }
  0xe4   :  { %v874_v37 = vrot.slane %v373_v35, 1 }
  0xe5   :  { %v375_v38 = vpop.f32.mrf.mxu0  ;;  %v614_v39 = vpop.f32.mrf.mxu1 }
  0xe6   :  { %v875_v40 = vsel %vm870_vm3, %v872_v18, %v874_v37  ;;  %v1087_v47 = vrot.slane %v614_v39, 5 }
  0xe7   :  { %v1002_v41 = vadd.f32 %v875_v40, %v365_v24  ;;  %v377_v42 = vpop.f32.mrf.mxu0  ;;  %v616_v43 = vpop.f32.mrf.mxu1 }
  0xe8   :  { %v876_v44 = vrot.slane %v377_v42, 1  ;;  %v1298_v53 = vrot.slane %v616_v43, 6 }
  0xe9   :  { %v381_v45 = vpop.f32.mrf.mxu0  ;;  %v620_v46 = vpop.f32.mrf.mxu1 }
  0xea   :  { %v877_v48 = vsel %vm870_vm3, %v874_v37, %v876_v44  ;;  %v1088_v49 = vrot.slane %v620_v46, 5 }
  0xeb   :  { %v1003_v50 = vadd.f32 %v877_v48, %v371_v31  ;;  %v383_v51 = vpop.f32.mrf.mxu0  ;;  %v622_v52 = vpop.f32.mrf.mxu1 }
  0xec   :  { %v1089_v54 = vsel %vm1086_vm4, %v1087_v47, %v1088_v49  ;;  %v878_v55 = vrot.slane %v383_v51, 1  ;;  %v1299_v56 = vrot.slane %v622_v52, 6 }
  0xed   :  { %v1213_v57 = vadd.f32 %v1089_v54, %v1001_v34  ;;  %v385_v58 = vpop.f32.mrf.mxu0  ;;  %v624_v59 = vpop.f32.mrf.mxu1 }
  0xee   :  { %v879_v60 = vsel %vm870_vm3, %v876_v44, %v878_v55  ;;  %v1300_v61 = vsel %vm314_vm0, %v1298_v53, %v1299_v56  ;;  %v1090_v62 = vrot.slane %v624_v59, 5 }
  0xef   :  { %v1004_v63 = vadd.f32 %v879_v60, %v375_v38  ;;  %v6704_v0 = vadd.f32 %v1300_v61, %v1213_v57  ;;  %v387_v2 = vpop.f32.mrf.mxu0  ;;  %v626_v3 = vpop.f32.mrf.mxu1 }
  0xf0   :  { %v1091_v4 = vsel %vm1086_vm4, %v1088_v49, %v1090_v62  ;;  %v880_v5 = vrot.slane %v387_v2, 1  ;;  %v1301_v7 = vrot.slane %v626_v3, 6 }
  0xf1   :  { %v1214_v8 = vadd.f32 %v1091_v4, %v1002_v41  ;;  %v391_v9 = vpop.f32.mrf.mxu0  ;;  %v630_v10 = vpop.f32.mrf.mxu1 }
  0xf2   :  { %v881_v11 = vsel %vm870_vm3, %v878_v55, %v880_v5  ;;  %v1302_v12 = vsel %vm314_vm0, %v1299_v56, %v1301_v7  ;;  %v1092_v13 = vrot.slane %v630_v10, 5 }
  0xf3   :  { %v1005_v14 = vadd.f32 %v881_v11, %v381_v45  ;;  %v6709_v15 = vadd.f32 %v1302_v12, %v1214_v8  ;;  %v393_v16 = vpop.f32.mrf.mxu0  ;;  %v632_v17 = vpop.f32.mrf.mxu1 }
  0xf4   :  { %v1093_v19 = vsel %vm1086_vm4, %v1090_v62, %v1092_v13  ;;  %v882_v20 = vrot.slane %v393_v16, 1  ;;  %v1303_v21 = vrot.slane %v632_v17, 6 }
  0xf5   :  { %v1215_v24 = vadd.f32 %v1093_v19, %v1003_v50  ;;  %v395_v25 = vpop.f32.mrf.mxu0  ;;  %v634_v26 = vpop.f32.mrf.mxu1 }
  0xf6   :  { %v883_v27 = vsel %vm870_vm3, %v880_v5, %v882_v20  ;;  %v1304_v28 = vsel %vm314_vm0, %v1301_v7, %v1303_v21  ;;  %v1094_v29 = vrot.slane %v634_v26, 5 }
  0xf7   :  { %v1006_v18 = vadd.f32 %v883_v27, %v385_v58  ;;  %v6714_v31 = vadd.f32 %v1304_v28, %v1215_v24  ;;  %v397_v32 = vpop.f32.mrf.mxu0  ;;  %v636_v33 = vpop.f32.mrf.mxu1 }
  0xf8   :  { %v1095_v34 = vsel %vm1086_vm4, %v1092_v13, %v1094_v29  ;;  %v884_v35 = vrot.slane %v397_v32, 1  ;;  %v1305_v36 = vrot.slane %v636_v33, 6 }
  0xf9   :  { %v1216_v37 = vadd.f32 %v1095_v34, %v1004_v63  ;;  %v401_v38 = vpop.f32.mrf.mxu0  ;;  %v640_v39 = vpop.f32.mrf.mxu1 }
  0xfa   :  { %v885_v40 = vsel %vm870_vm3, %v882_v20, %v884_v35  ;;  %v1306_v41 = vsel %vm314_vm0, %v1303_v21, %v1305_v36  ;;  %v1096_v42 = vrot.slane %v640_v39, 5 }
  0xfb   :  { %v1007_v43 = vadd.f32 %v885_v40, %v391_v9  ;;  %v6719_v44 = vadd.f32 %v1306_v41, %v1216_v37  ;;  %v403_v45 = vpop.f32.mrf.mxu0  ;;  %v642_v46 = vpop.f32.mrf.mxu1 }
  0xfc   :  { %v1097_v47 = vsel %vm1086_vm4, %v1094_v29, %v1096_v42  ;;  %v886_v48 = vrot.slane %v403_v45, 1  ;;  %v1307_v49 = vrot.slane %v642_v46, 6 }
  0xfd   :  { %v1217_v50 = vadd.f32 %v1097_v47, %v1005_v14  ;;  %v405_v51 = vpop.f32.mrf.mxu0  ;;  %v644_v52 = vpop.f32.mrf.mxu1 }
  0xfe   :  { %v887_v53 = vsel %vm870_vm3, %v884_v35, %v886_v48  ;;  %v1308_v54 = vsel %vm314_vm0, %v1305_v36, %v1307_v49  ;;  %v1098_v55 = vrot.slane %v644_v52, 5 }
  0xff   :  { %v1008_v56 = vadd.f32 %v887_v53, %v395_v25  ;;  %v6724_v57 = vadd.f32 %v1308_v54, %v1217_v50  ;;  %v407_v58 = vpop.f32.mrf.mxu0  ;;  %v646_v59 = vpop.f32.mrf.mxu1 }
 0x100   :  { %v1099_v60 = vsel %vm1086_vm4, %v1096_v42, %v1098_v55  ;;  %v888_v61 = vrot.slane %v407_v58, 1  ;;  %v1309_v62 = vrot.slane %v646_v59, 6  ;;  %v1513_v53 = vpop.permute.xlu0 %1512 }
 0x101   :  { %v1218_v63 = vadd.f32 %v1099_v60, %v1006_v18  ;;  %v411_v2 = vpop.f32.mrf.mxu0  ;;  %v650_v3 = vpop.f32.mrf.mxu1 }
 0x102   :  { %v889_v4 = vsel %vm870_vm3, %v886_v48, %v888_v61  ;;  %v1310_v5 = vsel %vm314_vm0, %v1307_v49, %v1309_v62  ;;  %v1100_v7 = vrot.slane %v650_v3, 5 }
 0x103   :  { %v1009_v8 = vadd.f32 %v889_v4, %v401_v38  ;;  %v6729_v9 = vadd.f32 %v1310_v5, %v1218_v63  ;;  %v413_v10 = vpop.f32.mrf.mxu0  ;;  %v652_v11 = vpop.f32.mrf.mxu1 }
 0x104   :  { %v1101_v12 = vsel %vm1086_vm4, %v1098_v55, %v1100_v7  ;;  %v1311_v13 = vrot.slane %v652_v11, 6  ;;  %v890_v26 = vrot.slane %v413_v10, 1 }
 0x105   :  { %v1219_v14 = vadd.f32 %v1101_v12, %v1007_v43  ;;  %v415_v16 = vpop.f32.mrf.mxu0  ;;  %v654_v17 = vpop.f32.mrf.mxu1 }
 0x106   :  { %v1312_v19 = vsel %vm314_vm0, %v1309_v62, %v1311_v13  ;;  %v1102_v20 = vrot.slane %v654_v17, 5  ;;  %v891_v38 = vsel %vm870_vm3, %v888_v61, %v890_v26  ;;  %v1523_v62 = vpop.permute.xlu1 %1522 }
 0x107   :  { %v6733_v21 = vadd.f32 %v1312_v19, %v1219_v14  ;;  %v417_v24 = vpop.f32.mrf.mxu0  ;;  %v656_v25 = vpop.f32.mrf.mxu1  ;;  %v1010_v48 = vadd.f32 %v891_v38, %v405_v51 }
 0x108   :  { %v1103_v27 = vsel %vm1086_vm4, %v1100_v7, %v1102_v20  ;;  %v1313_v28 = vrot.slane %v656_v25, 6  ;;  %v892_v39 = vrot.slane %v417_v24, 1  ;;  %v1518_v19 = vpop.permute.xlu0 %1517 }
 0x109   :  { %v1220_v29 = vadd.f32 %v1103_v27, %v1008_v56  ;;  %v421_v18 = vpop.f32.mrf.mxu0  ;;  %v660_v32 = vpop.f32.mrf.mxu1 }
 0x10a   :  { %v1314_v33 = vsel %vm314_vm0, %v1311_v13, %v1313_v28  ;;  %v1104_v34 = vrot.slane %v660_v32, 5  ;;  %v893_v54 = vsel %vm870_vm3, %v890_v26, %v892_v39 }
 0x10b   :  { %v6737_v35 = vadd.f32 %v1314_v33, %v1220_v29  ;;  %v423_v36 = vpop.f32.mrf.mxu0  ;;  %v662_v37 = vpop.f32.mrf.mxu1  ;;  %v1011_v51 = vadd.f32 %v893_v54, %v411_v2 }
 0x10c   :  { %v1105_v40 = vsel %vm1086_vm4, %v1102_v20, %v1104_v34  ;;  %v1315_v41 = vrot.slane %v662_v37, 6  ;;  %v894_v55 = vrot.slane %v423_v36, 1 }
 0x10d   :  { %v1221_v42 = vadd.f32 %v1105_v40, %v1009_v8  ;;  %v6741_v43 = vpop.f32.mrf.mxu0  ;;  %v664_v45 = vpop.f32.mrf.mxu1 }
 0x10e   :  { %v1316_v46 = vsel %vm314_vm0, %v1313_v28, %v1315_v41  ;;  %v1106_v47 = vrot.slane %v664_v45, 5  ;;  %v895_v8 = vsel %vm870_vm3, %v892_v39, %v894_v55  ;;  %v1528_v28 = vpop.permute.xlu1 %1527 }
 0x10f   :  { %v6744_v49 = vadd.f32 %v1316_v46, %v1221_v42  ;;  %v427_v50 = vpop.f32.mrf.mxu0  ;;  %v666_v52 = vpop.f32.mrf.mxu1  ;;  %v1012_v2 = vadd.f32 %v895_v8, %v415_v16 }
 0x110   :  { %v1107_v56 = vsel %vm1086_vm4, %v1104_v34, %v1106_v47  ;;  %v1317_v58 = vrot.slane %v666_v52, 6  ;;  %v896_v10 = vrot.slane %v427_v50, 1  ;;  %v1533_v46 = vpop.permute.xlu0 %1532  ;;  %v6779_v52 = vmul.f32 %v1518_v19, %v6709_v15 }
 0x111   :  { %v1222_v59 = vadd.f32 %v1107_v56, %v1010_v48  ;;  %v6748_v60 = vpop.f32.mrf.mxu0  ;;  %v670_v61 = vpop.f32.mrf.mxu1  ;;  %v6821_v19 = vmul.f32 %v1533_v46, %v6724_v57 }
 0x112   :  { %v1318_v63 = vsel %vm314_vm0, %v1315_v41, %v1317_v58  ;;  %v1108_v3 = vrot.slane %v670_v61, 5  ;;  %v897_v29 = vsel %vm870_vm3, %v894_v55, %v896_v10  ;;  %v1538_v56 = vpop.permute.xlu1 %1537  ;;  %v6788_v61 = vmul.f32 %v1513_v53, %v6704_v0 }
 0x113   :  { %v6751_v4 = vadd.f32 %v1318_v63, %v1222_v59  ;;  %v6753_v5 = vpop.f32.mrf.mxu0  ;;  %v672_v7 = vpop.f32.mrf.mxu1  ;;  %v1013_v40 = vadd.f32 %v897_v29, %v421_v18  ;;  %v6791_v63 = vmul.f32 %v1523_v62, %v6714_v31  ;;  %v1820_v0 = vmul.f32 %v6779_v52, %v6779_v52 }
 0x114   :  { %v1109_v11 = vsel %vm1086_vm4, %v1106_v47, %v1108_v3  ;;  %v1319_v12 = vrot.slane %v672_v7, 6  ;;  %v898_v32 = vrot.slane %v6753_v5, 1  ;;  %v6807_v31 = vmul.f32 %v1528_v28, %v6719_v44 }
 0x115   :  { %v1223_v13 = vadd.f32 %v1109_v11, %v1011_v51  ;;  %v6757_v14 = vpop.f32.mrf.mxu0  ;;  %v674_v17 = vpop.f32.mrf.mxu1 }
 0x116   :  { %v1320_v20 = vsel %vm314_vm0, %v1317_v58, %v1319_v12  ;;  %v1110_v24 = vrot.slane %v674_v17, 5  ;;  %v899_v47 = vsel %vm870_vm3, %v896_v10, %v898_v32  ;;  %v1543_v11 = vpop.permute.xlu0 %1542  ;;  %v1821_v17 = vmul.f32 %v6791_v63, %v6791_v63 }
 0x117   :  { %v6760_v25 = vadd.f32 %v1320_v20, %v1223_v13  ;;  %v6762_v26 = vpop.f32.mrf.mxu0  ;;  %v676_v27 = vpop.f32.mrf.mxu1  ;;  %v1819_v13 = vmul.f32 %v6788_v61, %v6788_v61  ;;  %v1822_v29 = vmul.f32 %v6807_v31, %v6807_v31 }
 0x118   :  { %v1111_v33 = vsel %vm1086_vm4, %v1108_v3, %v1110_v24  ;;  %v1321_v34 = vrot.slane %v676_v27, 6  ;;  %v1014_v3 = vadd.f32 %v899_v47, %v6741_v43  ;;  %v1548_v27 = vpop.permute.xlu1 %1547 }
 0x119   :  { %v1224_v36 = vadd.f32 %v1111_v33, %v1012_v2  ;;  %v6767_v37 = vpop.f32.mrf.mxu0  ;;  %v680_v38 = vpop.f32.mrf.mxu1  ;;  %v1770_v2 = vadd.f32 %v6779_v52, %v6788_v61  ;;  %v1862_v28 = vadd.f32 %v1820_v0, %v1819_v13  ;;  %v6834_v33 = vmul.f32 %v1538_v56, %v6729_v9 }
 0x11a   :  { %v1322_v39 = vsel %vm314_vm0, %v1319_v12, %v1321_v34  ;;  %v1112_v16 = vrot.slane %v680_v38, 5  ;;  %v1553_v46 = vpop.permute.xlu0 %1552 }
 0x11b   :  { %v6770_v41 = vadd.f32 %v1322_v39, %v1224_v36  ;;  %v6772_v42 = vpop.f32.mrf.mxu0  ;;  %v682_v45 = vpop.f32.mrf.mxu1  ;;  %v1771_v36 = vadd.f32 %v1770_v2, %v6791_v63  ;;  %v1863_v38 = vadd.f32 %v1862_v28, %v1821_v17  ;;  %v1823_v39 = vmul.f32 %v6821_v19, %v6821_v19 }
 0x11c   :  { %v1113_v48 = vsel %vm1086_vm4, %v1110_v24, %v1112_v16  ;;  %v1323_v50 = vrot.slane %v682_v45, 6 }
 0x11d   :  { %v1225_v54 = vadd.f32 %v1113_v48, %v1013_v40  ;;  %v6781_v55 = vpop.f32.mrf.mxu0  ;;  %v6783_v18 = vpop.f32.mrf.mxu1  ;;  %v1772_v9 = vadd.f32 %v1771_v36, %v6807_v31  ;;  %v1864_v47 = vadd.f32 %v1863_v38, %v1822_v29  ;;  %v1824_v48 = vmul.f32 %v6834_v33, %v6834_v33 }
 0x11e   :  { %v1324_v58 = vsel %vm314_vm0, %v1321_v34, %v1323_v50  ;;  %v1114_v59 = vrot.slane %v6783_v18, 5  ;;  %v1563_v28 = vpop.permute.xlu0 %1562 }
 0x11f   :  { %v6794_v15 = vadd.f32 %v1324_v58, %v1225_v54  ;;  %v6796_v51 = vpop.f32.mrf.mxu0  ;;  %v6798_v7 = vpop.f32.mrf.mxu1 }
 0x120   :  { %v1115_v8 = vsel %vm1086_vm4, %v1112_v16, %v1114_v59  ;;  %v1325_v10 = vrot.slane %v6798_v7, 6  ;;  %v6844_v16 = vmul.f32 %v1543_v11, %v6733_v21  ;;  %v1773_v21 = vadd.f32 %v1772_v9, %v6821_v19  ;;  %v1558_v58 = vpop.permute.xlu1 %1557 }
 0x121   :  { %v1226_v53 = vadd.f32 %v1115_v8, %v1014_v3  ;;  %v6809_v43 = vpop.f32.mrf.mxu0  ;;  %v6811_v62 = vpop.f32.mrf.mxu1  ;;  %v900_v3 = vrot.slane %v6762_v26, 1  ;;  %v1865_v8 = vadd.f32 %v1864_v47, %v1823_v39  ;;  %v6881_v29 = vmul.f32 %v1558_v58, %v6751_v4 }
 0x122   :  { %v1326_v12 = vsel %vm314_vm0, %v1323_v50, %v1325_v10  ;;  %v6854_v50 = vmul.f32 %v1548_v27, %v6737_v35  ;;  %v1825_v0 = vmul.f32 %v6844_v16, %v6844_v16  ;;  %v1116_v13 = vrot.slane %v6811_v62, 5 }
 0x123   :  { %v6823_v44 = vadd.f32 %v1326_v12, %v1226_v53  ;;  %v6825_v20 = vpop.f32.mrf.mxu0  ;;  %v6827_v24 = vpop.f32.mrf.mxu1  ;;  %v6865_v53 = vmul.f32 %v1553_v46, %v6744_v49  ;;  %v1774_v12 = vadd.f32 %v1773_v21, %v6834_v33  ;;  %v1866_v17 = vadd.f32 %v1865_v8, %v1824_v48 }
 0x124   :  { %v1826_v2 = vmul.f32 %v6854_v50, %v6854_v50  ;;  %v901_v36 = vsel %vm870_vm3, %v898_v32, %v900_v3  ;;  %v902_v39 = vrot.slane %v6772_v42, 1  ;;  %v1568_v47 = vpop.permute.xlu1 %1567  ;;  %v6895_v4 = vmul.f32 %v1563_v28, %v6760_v25  ;;  %v1573_v28 = vpop.permute.xlu0 %1572 }
 0x125   :  { %v6836_v34 = vpop.f32.mrf.mxu0  ;;  %v6838_v57 = vpop.f32.mrf.mxu1  ;;  %v1775_v49 = vadd.f32 %v1774_v12, %v6844_v16  ;;  %v1867_v38 = vadd.f32 %v1866_v17, %v1825_v0  ;;  %v1827_v62 = vmul.f32 %v6865_v53, %v6865_v53  ;;  %v1117_v5 = vsel %vm1086_vm4, %v1114_v59, %v1116_v13 }
 0x126   :  { %8760 = vst [vmem:[#allocation3_spill] sm:$0xff] %v6895_v4  ;;  %v1327_v32 = vrot.slane %v6827_v24, 6  ;;  %v1015_v58 = vadd.f32 %v901_v36, %v6748_v60  ;;  %v1118_v42 = vrot.slane %v6838_v57, 5  ;;  %v1828_v25 = vmul.f32 %v6881_v29, %v6881_v29 }
 0x127   :  { %v6846_v40 = vpop.f32.mrf.mxu0  ;;  %v6848_v45 = vpop.f32.mrf.mxu1  ;;  %v1776_v48 = vadd.f32 %v1775_v49, %v6854_v50  ;;  %v1868_v21 = vadd.f32 %v1867_v38, %v1826_v2  ;;  %v6911_v18 = vmul.f32 %v1568_v47, %v6770_v41  ;;  %v903_v24 = vsel %vm870_vm3, %v900_v3, %v902_v39 }
 0x128   :  { %v904_v17 = vrot.slane %v6796_v51, 1  ;;  %v1227_v60 = vadd.f32 %v1117_v5, %v1015_v58  ;;  %v1829_v36 = vmul.f32 %v6895_v4, %v6895_v4  ;;  %v906_v38 = vrot.slane %v6825_v20, 1 }
 0x129   :  { %v6856_v54 = vpop.f32.mrf.mxu0  ;;  %v6858_v56 = vpop.f32.mrf.mxu1  ;;  %v1777_v12 = vadd.f32 %v1776_v48, %v6865_v53  ;;  %8761 = vst [vmem:[#allocation4_spill] sm:$0xff] %v6911_v18  ;;  %v1869_v59 = vadd.f32 %v1868_v21, %v1827_v62  ;;  %v1328_v41 = vsel %vm314_vm0, %v1325_v10, %v1327_v32  ;;  %v1119_v3 = vsel %vm1086_vm4, %v1116_v13, %v1118_v42 }
 0x12a   :  { %v1329_v51 = vrot.slane %v6848_v45, 6  ;;  %v1120_v62 = vrot.slane %v6858_v56, 5  ;;  %v1830_v20 = vmul.f32 %v6911_v18, %v6911_v18  ;;  %v1016_v7 = vadd.f32 %v903_v24, %v6757_v14 }
 0x12b   :  { %v6867_v11 = vpop.f32.mrf.mxu0  ;;  %v6869_v35 = vpop.f32.mrf.mxu1  ;;  %v1778_v49 = vadd.f32 %v1777_v12, %v6881_v29  ;;  %v1870_v5 = vadd.f32 %v1869_v59, %v1828_v25  ;;  %v6938_v10 = vmul.f32 %v1573_v28, %v6794_v15  ;;  %v905_v13 = vsel %vm870_vm3, %v902_v39, %v904_v17 }
 0x12c   :  { %v1438_v45 = vadd.f32 %v1328_v41, %v1227_v60  ;;  %v908_v56 = vrot.slane %v6846_v40, 1  ;;  %v1578_v25 = vpop.permute.xlu1 %1577  ;;  %v1228_v1 = vadd.f32 %v1119_v3, %v1016_v7  ;;  %v1330_v14 = vsel %vm314_vm0, %v1327_v32, %v1329_v51  ;;  %v1583_v28 = vpop.permute.xlu0 %1582 }
 0x12d   :  { %v6875_v26 = vpop.f32.mrf.mxu0  ;;  %v6877_v27 = vpop.f32.mrf.mxu1  ;;  %v1779_v21 = vadd.f32 %v1778_v49, %v6895_v4  ;;  %v1871_v59 = vadd.f32 %v1870_v5, %v1829_v36  ;;  %v907_v49 = vsel %vm870_vm3, %v904_v17, %v906_v38  ;;  %v1121_v15 = vsel %vm1086_vm4, %v1118_v42, %v1120_v62 }
 0x12e   :  { %v1122_v23 = vrot.slane %v6877_v27, 5  ;;  %v1331_v39 = vrot.slane %v6869_v35, 6  ;;  %v1017_v17 = vadd.f32 %v905_v13, %v6767_v37  ;;  %v6959_v27 = vmul.f32 %v1578_v25, %v6823_v44 }
 0x12f   :  { %v6889_v46 = vpop.f32.mrf.mxu0  ;;  %v6891_v9 = vpop.f32.mrf.mxu1  ;;  %v1780_v36 = vadd.f32 %v1779_v21, %v6911_v18  ;;  %v1872_v41 = vadd.f32 %v1871_v59, %v1830_v20  ;;  %v1831_v32 = vmul.f32 %v6938_v10, %v6938_v10  ;;  %v1018_v35 = vadd.f32 %v907_v49, %v6781_v55 }
 0x130   :  { %8762 = vst [vmem:[#allocation5_spill] sm:$0xff] %v6959_v27  ;;  %v6964_v42 = vmul.f32 %v1583_v28, %v1438_v45  ;;  %v1439_v21 = vadd.f32 %v1330_v14, %v1228_v1  ;;  %v1229_v20 = vadd.f32 %v1121_v15, %v1017_v17  ;;  %v1123_v37 = vsel %vm1086_vm4, %v1120_v62, %v1122_v23  ;;  %v1588_v59 = vpop.permute.xlu1 %1587  ;;  %v1593_v15 = vpop.permute.xlu0 %1592 }
 0x131   :  { %v6903_v8 = vpop.f32.mrf.mxu0  ;;  %v6905_v0 = vpop.f32.mrf.mxu1  ;;  %v1333_v44 = vrot.slane %v6891_v9, 6  ;;  %v910_v7 = vrot.slane %v6867_v11, 1  ;;  %v1332_v13 = vsel %vm314_vm0, %v1329_v51, %v1331_v39  ;;  %v1832_v1 = vmul.f32 %v6959_v27, %v6959_v27 }
 0x132   :  { %v1124_v24 = vrot.slane %v6905_v0, 5  ;;  %v909_v0 = vsel %vm870_vm3, %v906_v38, %v908_v56  ;;  %v912_v9 = vrot.slane %v6889_v46, 1  ;;  %v1781_v11 = vadd.f32 %v1780_v36, %v6938_v10 }
 0x133   :  { %v6915_v2 = vpop.f32.mrf.mxu0  ;;  %v6917_v57 = vpop.f32.mrf.mxu1  ;;  %v1019_v62 = vadd.f32 %v909_v0, %v6809_v43  ;;  %v1873_v49 = vadd.f32 %v1872_v41, %v1831_v32  ;;  %v1230_v51 = vadd.f32 %v1123_v37, %v1018_v35  ;;  %v6991_v28 = vmul.f32 %v1588_v59, %v1439_v21 }
 0x134   :  { %v1125_v55 = vsel %vm1086_vm4, %v1122_v23, %v1124_v24  ;;  %v1335_v45 = vrot.slane %v6917_v57, 6  ;;  %v1440_v17 = vadd.f32 %v1332_v13, %v1229_v20  ;;  %v1334_v18 = vsel %vm314_vm0, %v1331_v39, %v1333_v44 }
 0x135   :  { %v6929_v47 = vpop.f32.mrf.mxu0  ;;  %v6931_v48 = vpop.f32.mrf.mxu1  ;;  %v1231_v4 = vadd.f32 %v1125_v55, %v1019_v62  ;;  %v1833_v43 = vmul.f32 %v6964_v42, %v6964_v42  ;;  %v911_v46 = vsel %vm870_vm3, %v908_v56, %v910_v7  ;;  %v1782_v32 = vadd.f32 %v1781_v11, %v6959_v27 }
 0x136   :  { %v1126_v23 = vrot.slane %v6931_v48, 5  ;;  %v1336_v36 = vsel %vm314_vm0, %v1333_v44, %v1335_v45  ;;  %v1874_v35 = vadd.f32 %v1873_v49, %v1832_v1  ;;  %v913_v0 = vsel %vm870_vm3, %v910_v7, %v912_v9  ;;  %v1603_v11 = vpop.permute.xlu0 %1602  ;;  %v1598_v49 = vpop.permute.xlu1 %1597 }
 0x137   :  { %v6942_v58 = vpop.f32.mrf.mxu0  ;;  %v6944_v12 = vpop.f32.mrf.mxu1  ;;  %v1441_v39 = vadd.f32 %v1334_v18, %v1230_v51  ;;  %v914_v20 = vrot.slane %v6915_v2, 1  ;;  %v1834_v55 = vmul.f32 %v6991_v28, %v6991_v28  ;;  %v1020_v59 = vadd.f32 %v911_v46, %v6836_v34 }
 0x138   :  { %v1127_v37 = vsel %vm1086_vm4, %v1124_v24, %v1126_v23  ;;  %v1337_v56 = vrot.slane %v6944_v12, 6  ;;  %v7015_v1 = vmul.f32 %v1593_v15, %v1440_v17  ;;  %v1442_v7 = vadd.f32 %v1336_v36, %v1231_v4 }
 0x139   :  { %v6952_v40 = vpop.f32.mrf.mxu0  ;;  %v6954_v60 = vpop.f32.mrf.mxu1  ;;  %v1783_v18 = vadd.f32 %v1782_v32, %v6964_v42  ;;  %v916_v2 = vrot.slane %v6942_v58, 1  ;;  %v1021_v51 = vadd.f32 %v913_v0, %v6856_v54  ;;  %v1232_v27 = vadd.f32 %v1127_v37, %v1020_v59 }
 0x13a   :  { %v1128_v21 = vrot.slane %v6954_v60, 5  ;;  %v1875_v60 = vadd.f32 %v1874_v35, %v1833_v43  ;;  %v7027_v15 = vmul.f32 %v1598_v49, %v1441_v39  ;;  %v915_v17 = vsel %vm870_vm3, %v912_v9, %v914_v20 }
 0x13b   :  { %v6967_v3 = vpop.f32.mrf.mxu0  ;;  %v6969_v5 = vpop.f32.mrf.mxu1  ;;  %v1338_v58 = vsel %vm314_vm0, %v1335_v45, %v1337_v56  ;;  %v1784_v36 = vadd.f32 %v1783_v18, %v6991_v28  ;;  %v7039_v32 = vmul.f32 %v1603_v11, %v1442_v7  ;;  %v1022_v39 = vadd.f32 %v915_v17, %v6875_v26 }
 0x13c   :  { %v1129_v34 = vsel %vm1086_vm4, %v1126_v23, %v1128_v21  ;;  %v1339_v4 = vrot.slane %v6969_v5, 6  ;;  %v1876_v54 = vadd.f32 %v1875_v60, %v1834_v55  ;;  %v1835_v23 = vmul.f32 %v7015_v1, %v7015_v1  ;;  %v1613_v11 = vpop.permute.xlu0 %1612  ;;  %v1608_v26 = vpop.permute.xlu1 %1607 }
 0x13d   :  { %v6977_v25 = vpop.f32.mrf.mxu0  ;;  %v6979_v38 = vpop.f32.mrf.mxu1  ;;  %v917_v5 = vsel %vm870_vm3, %v914_v20, %v916_v2  ;;  %v1233_v35 = vadd.f32 %v1129_v34, %v1021_v51  ;;  %v1443_v37 = vadd.f32 %v1338_v58, %v1232_v27  ;;  %v918_v55 = vrot.slane %v6967_v3, 1 }
 0x13e   :  { %v1130_v24 = vrot.slane %v6979_v38, 5  ;;  %v1340_v59 = vsel %vm314_vm0, %v1337_v56, %v1339_v4  ;;  %v1785_v7 = vadd.f32 %v1784_v36, %v7015_v1  ;;  %v1836_v20 = vmul.f32 %v7027_v15, %v7027_v15 }
 0x13f   :  { %v6987_v14 = vpop.f32.mrf.mxu0  ;;  %v6989_v57 = vpop.f32.mrf.mxu1  ;;  %v1877_v27 = vadd.f32 %v1876_v54, %v1835_v23  ;;  %v1023_v3 = vadd.f32 %v917_v5, %v6903_v8  ;;  %v1837_v34 = vmul.f32 %v7039_v32, %v7039_v32  ;;  %v7068_v36 = vmul.f32 %v1608_v26, %v1443_v37 }
 0x140   :  { %v1131_v9 = vsel %vm1086_vm4, %v1128_v21, %v1130_v24  ;;  %v1341_v45 = vrot.slane %v6989_v57, 6  ;;  %v1786_v51 = vadd.f32 %v1785_v7, %v7027_v15  ;;  %v919_v54 = vsel %vm870_vm3, %v916_v2, %v918_v55 }
 0x141   :  { %v6998_v41 = vpop.f32.mrf.mxu0  ;;  %v7000_v48 = vpop.f32.mrf.mxu1  ;;  %v1234_v49 = vadd.f32 %v1131_v9, %v1022_v39  ;;  %8763 = vst [vmem:[#allocation6_spill] sm:$0xff] %v7068_v36  ;;  %v920_v8 = vrot.slane %v6987_v14, 1  ;;  %v1878_v5 = vadd.f32 %v1877_v27, %v1836_v20  ;;  %v1024_v20 = vadd.f32 %v919_v54, %v6929_v47 }
 0x142   :  { %v1132_v38 = vrot.slane %v7000_v48, 5  ;;  %v1618_v27 = vpop.permute.xlu1 %1617 }
 0x143   :  { %v7008_v13 = vpop.f32.mrf.mxu0  ;;  %v7010_v44 = vpop.f32.mrf.mxu1  ;;  %v1879_v14 = vadd.f32 %v1878_v5, %v1837_v34 }
 0x144   :  { %v1133_v21 = vsel %vm1086_vm4, %v1130_v24, %v1132_v38  ;;  %v1343_v57 = vrot.slane %v7010_v44, 6  ;;  %v1444_v24 = vadd.f32 %v1340_v59, %v1233_v35  ;;  %v1342_v44 = vsel %vm314_vm0, %v1339_v4, %v1341_v45 }
 0x145   :  { %v7020_v12 = vpop.f32.mrf.mxu0  ;;  %v7022_v62 = vpop.f32.mrf.mxu1  ;;  %v1235_v23 = vadd.f32 %v1133_v21, %v1023_v3  ;;  %v922_v9 = vrot.slane %v7008_v13, 1  ;;  %v1445_v59 = vadd.f32 %v1342_v44, %v1234_v49  ;;  %v921_v49 = vsel %vm870_vm3, %v918_v55, %v920_v8 }
 0x146   :  { %v1134_v56 = vrot.slane %v7022_v62, 5  ;;  %v1787_v62 = vadd.f32 %v1786_v51, %v7039_v32  ;;  %v1344_v39 = vsel %vm314_vm0, %v1341_v45, %v1343_v57  ;;  %v7083_v21 = vmul.f32 %v1613_v11, %v1444_v24  ;;  %v1623_v45 = vpop.permute.xlu0 %1622 }
 0x147   :  { %v7032_v43 = vpop.f32.mrf.mxu0  ;;  %v7034_v46 = vpop.f32.mrf.mxu1  ;;  %v7099_v44 = vmul.f32 %v1618_v27, %v1445_v59 }
 0x148   :  { %v1135_v37 = vsel %vm1086_vm4, %v1132_v38, %v1134_v56  ;;  %v1345_v7 = vrot.slane %v7034_v46, 6  ;;  %8764 = vst [vmem:[#allocation7_spill] sm:$0xff] %v7083_v21  ;;  %v1788_v3 = vadd.f32 %v1787_v62, %v7068_v36  ;;  %v1446_v38 = vadd.f32 %v1344_v39, %v1235_v23 }
 0x149   :  { %v7044_v48 = vpop.f32.mrf.mxu0  ;;  %v7046_v0 = vpop.f32.mrf.mxu1  ;;  %v1838_v46 = vmul.f32 %v7068_v36, %v7068_v36  ;;  %v1236_v47 = vadd.f32 %v1135_v37, %v1024_v20  ;;  %v924_v11 = vrot.slane %v7032_v43, 1  ;;  %8765 = vst [vmem:[#allocation8_spill] sm:$0xff] %v7099_v44  ;;  %v1839_v23 = vmul.f32 %v7083_v21, %v7083_v21 }
 0x14a   :  { %v1136_v2 = vrot.slane %v7046_v0, 5  ;;  %v923_v0 = vsel %vm870_vm3, %v920_v8, %v922_v9  ;;  %v1346_v54 = vsel %vm314_vm0, %v1343_v57, %v1345_v7  ;;  %v1025_v8 = vadd.f32 %v921_v49, %v6952_v40 }
 0x14b   :  { %v7056_v18 = vpop.f32.mrf.mxu0  ;;  %v7058_v60 = vpop.f32.mrf.mxu1  ;;  %v1026_v39 = vadd.f32 %v923_v0, %v6977_v25  ;;  %v7111_v59 = vmul.f32 %v1623_v45, %v1446_v38  ;;  %v8736_v37 = vmov 0.0   ;;  %v1447_v20 = vadd.f32 %v1346_v54, %v1236_v47 }
 0x14c   :  { %v1137_v55 = vsel %vm1086_vm4, %v1134_v56, %v1136_v2  ;;  %5734 = vmatprep.subr.bf16.mxu1 %v8736_v37  ;;  %v1633_v25 = vpop.permute.xlu0 %1632  ;;  %v1880_v45 = vadd.f32 %v1879_v14, %v1838_v46  ;;  %v1789_v38 = vadd.f32 %v1788_v3, %v7083_v21 }
 0x14d   :  { %v7066_v17 = vpop.f32.mrf.mxu0  ;;  %v744_v58 = vpop.f32.mrf.mxu1  ;;  %8766 = vst [vmem:[#allocation9_spill] sm:$0xff] %v7111_v59  ;;  %v1237_v40 = vadd.f32 %v1137_v55, %v1025_v8 }
 0x14e   :  { %v1138_v51 = vrot.slane %v744_v58, 5  ;;  %v1347_v58 = vrot.slane %v7058_v60, 6  ;;  %v925_v60 = vsel %vm870_vm3, %v922_v9, %v924_v11  ;;  %v1628_v8 = vpop.permute.xlu1 %1627  ;;  %v1881_v37 = vadd.f32 %v1880_v45, %v1839_v23 }
 0x14f   :  { %v7075_v35 = vpop.f32.mrf.mxu0  ;;  %v7077_v4 = vpop.f32.mrf.mxu1  ;;  %v1027_v14 = vadd.f32 %v925_v60, %v6998_v41  ;;  %v1790_v23 = vadd.f32 %v1789_v38, %v7099_v44 }
 0x150   :  { %v1139_v57 = vsel %vm1086_vm4, %v1136_v2, %v1138_v51  ;;  %v1349_v56 = vrot.slane %v7077_v4, 6  ;;  %v1840_v4 = vmul.f32 %v7099_v44, %v7099_v44  ;;  %v1348_v2 = vsel %vm314_vm0, %v1345_v7, %v1347_v58 }
 0x151   :  { %v7085_v26 = vpop.f32.mrf.mxu0  ;;  %v7087_v13 = vpop.f32.mrf.mxu1  ;;  %v1238_v0 = vadd.f32 %v1139_v57, %v1026_v39  ;;  %v928_v3 = vrot.slane %v7075_v35, 1  ;;  %v1841_v7 = vmul.f32 %v7111_v59, %v7111_v59  ;;  %v7135_v39 = vmul.f32 %v1628_v8, %v1447_v20 }
 0x152   :  { %v1140_v5 = vrot.slane %v7087_v13, 5  ;;  %v926_v13 = vrot.slane %v7056_v18, 1  ;;  %v1350_v46 = vsel %vm314_vm0, %v1347_v58, %v1349_v56  ;;  %v1882_v45 = vadd.f32 %v1881_v37, %v1840_v4 }
 0x153   :  { %v7095_v34 = vpop.f32.mrf.mxu0  ;;  %v7097_v24 = vpop.f32.mrf.mxu1  ;;  %8767 = vst [vmem:[#allocation10_spill] sm:$0xff] %v7135_v39  ;;  %v1449_v35 = vadd.f32 %v1350_v46, %v1238_v0  ;;  %v1842_v4 = vmul.f32 %v7135_v39, %v7135_v39 }
 0x154   :  { %v1141_v9 = vsel %vm1086_vm4, %v1138_v51, %v1140_v5  ;;  %v1351_v47 = vrot.slane %v7097_v24, 6  ;;  %v927_v51 = vsel %vm870_vm3, %v924_v11, %v926_v13  ;;  %v1448_v24 = vadd.f32 %v1348_v2, %v1237_v40  ;;  %v1643_v40 = vpop.permute.xlu0 %1642 }
 0x155   :  { %v7108_v43 = vpop.f32.mrf.mxu0  ;;  %v754_v62 = vpop.f32.mrf.mxu1  ;;  %v1239_v41 = vadd.f32 %v1141_v9, %v1027_v14  ;;  %v1791_v2 = vadd.f32 %v1790_v23, %v7111_v59  ;;  %v1028_v36 = vadd.f32 %v927_v51, %v7020_v12  ;;  %v929_v38 = vsel %vm870_vm3, %v926_v13, %v928_v3 }
 0x156   :  { %v1142_v54 = vrot.slane %v754_v62, 5  ;;  %v1352_v58 = vsel %vm314_vm0, %v1349_v56, %v1351_v47  ;;  %v1883_v37 = vadd.f32 %v1882_v45, %v1841_v7  ;;  %v7153_v0 = vmul.f32 %v1633_v25, %v1448_v24  ;;  %v1638_v9 = vpop.permute.xlu1 %1637 }
 0x157   :  { %v7118_v27 = vpop.f32.mrf.mxu0  ;;  %v7120_v49 = vpop.f32.mrf.mxu1  ;;  %v1029_v13 = vadd.f32 %v929_v38, %v7044_v48  ;;  %v7163_v7 = vmul.f32 %v1638_v9, %v1449_v35  ;;  %v1792_v23 = vadd.f32 %v1791_v2, %v7135_v39 }
 0x158   :  { %v1143_v21 = vsel %vm1086_vm4, %v1140_v5, %v1142_v54  ;;  %v1353_v20 = vrot.slane %v7120_v49, 6  ;;  %8768 = vst [vmem:[#allocation11_spill] sm:$0xff] %v7153_v0  ;;  %v930_v5 = vrot.slane %v7095_v34, 1  ;;  %v1884_v45 = vadd.f32 %v1883_v37, %v1842_v4 }
 0x159   :  { %v7128_v18 = vpop.f32.mrf.mxu0  ;;  %v760_v55 = vpop.f32.mrf.mxu1  ;;  %v1240_v14 = vadd.f32 %v1143_v21, %v1028_v36  ;;  %8769 = vst [vmem:[#allocation12_spill] sm:$0xff] %v7163_v7  ;;  %v1843_v36 = vmul.f32 %v7153_v0, %v7153_v0  ;;  %v932_v35 = vrot.slane %v7118_v27, 1  ;;  %v1793_v2 = vadd.f32 %v1792_v23, %v7153_v0 }
 0x15a   :  { %v1144_v60 = vrot.slane %v760_v55, 5  ;;  %v1450_v55 = vadd.f32 %v1352_v58, %v1239_v41  ;;  %v1354_v25 = vsel %vm314_vm0, %v1351_v47, %v1353_v20  ;;  %v931_v21 = vsel %vm870_vm3, %v928_v3, %v930_v5  ;;  %v1653_v41 = vpop.permute.xlu0 %1652 }
 0x15b   :  { %v7138_v62 = vpop.f32.mrf.mxu0  ;;  %v7140_v57 = vpop.f32.mrf.mxu1  ;;  %v1451_v58 = vadd.f32 %v1354_v25, %v1240_v14  ;;  %v1844_v38 = vmul.f32 %v7163_v7, %v7163_v7 }
 0x15c   :  { %v1145_v46 = vsel %vm1086_vm4, %v1142_v54, %v1144_v60  ;;  %v1355_v12 = vrot.slane %v7140_v57, 6  ;;  %v7178_v47 = vmul.f32 %v1643_v40, %v1450_v55  ;;  %v1030_v40 = vadd.f32 %v931_v21, %v7066_v17 }
 0x15d   :  { %v7146_v8 = vpop.f32.mrf.mxu0  ;;  %v764_v11 = vpop.f32.mrf.mxu1  ;;  %v1241_v54 = vadd.f32 %v1145_v46, %v1029_v13  ;;  %v1885_v55 = vadd.f32 %v1884_v45, %v1843_v36  ;;  %v934_v14 = vrot.slane %v7138_v62, 1 }
 0x15e   :  { %v1146_v51 = vrot.slane %v764_v11, 5  ;;  %8770 = vst [vmem:[#allocation13_spill] sm:$0xff] %v7178_v47  ;;  %v1356_v11 = vsel %vm314_vm0, %v1353_v20, %v1355_v12  ;;  %v1648_v46 = vpop.permute.xlu1 %1647  ;;  %v1794_v20 = vadd.f32 %v1793_v2, %v7163_v7  ;;  %v1663_v21 = vpop.permute.xlu0 %1662 }
 0x15f   :  { %v7156_v56 = vpop.f32.mrf.mxu0  ;;  %v7158_v49 = vpop.f32.mrf.mxu1  ;;  %v1452_v13 = vadd.f32 %v1356_v11, %v1241_v54  ;;  %v7198_v0 = vmul.f32 %v1648_v46, %v1451_v58  ;;  %v1886_v17 = vadd.f32 %v1885_v55, %v1844_v38  ;;  %v935_v58 = vsel %vm870_vm3, %v932_v35, %v934_v14 }
 0x160   :  { %v1147_v3 = vsel %vm1086_vm4, %v1144_v60, %v1146_v51  ;;  %v1357_v37 = vrot.slane %v7158_v49, 6  ;;  %v1845_v60 = vmul.f32 %v7178_v47, %v7178_v47  ;;  %v933_v49 = vsel %vm870_vm3, %v930_v5, %v932_v35 }
 0x161   :  { %v7166_v24 = vpop.f32.mrf.mxu0  ;;  %v7168_v34 = vpop.f32.mrf.mxu1  ;;  %8771 = vst [vmem:[#allocation14_spill] sm:$0xff] %v7198_v0  ;;  %v1242_v39 = vadd.f32 %v1147_v3, %v1030_v40  ;;  %v1795_v54 = vadd.f32 %v1794_v20, %v7178_v47  ;;  %v1031_v5 = vadd.f32 %v933_v49, %v7085_v26  ;;  %v7209_v38 = vmul.f32 %v1653_v41, %v1452_v13 }
 0x162   :  { %v1148_v27 = vrot.slane %v7168_v34, 5  ;;  %v936_v34 = vrot.slane %v7156_v56, 1  ;;  %v1358_v45 = vsel %vm314_vm0, %v1355_v12, %v1357_v37  ;;  %v1658_v46 = vpop.permute.xlu1 %1657  ;;  %v1887_v40 = vadd.f32 %v1886_v17, %v1845_v60 }
 0x163   :  { %v7174_v57 = vpop.f32.mrf.mxu0  ;;  %v7176_v48 = vpop.f32.mrf.mxu1  ;;  %v1796_v55 = vadd.f32 %v1795_v54, %v7198_v0  ;;  %v1453_v20 = vadd.f32 %v1358_v45, %v1242_v39  ;;  %v1032_v49 = vadd.f32 %v935_v58, %v7108_v43  ;;  %v1847_v39 = vmul.f32 %v7209_v38, %v7209_v38 }
 0x164   :  { %v1149_v11 = vsel %vm1086_vm4, %v1146_v51, %v1148_v27  ;;  %v1359_v2 = vrot.slane %v7176_v48, 6  ;;  %v1846_v51 = vmul.f32 %v7198_v0, %v7198_v0  ;;  %v937_v48 = vsel %vm870_vm3, %v934_v14, %v936_v34 }
 0x165   :  { %v7187_v4 = vpop.f32.mrf.mxu0  ;;  %v774_v9 = vpop.f32.mrf.mxu1  ;;  %v938_v26 = vrot.slane %v7174_v57, 1  ;;  %v1797_v0 = vadd.f32 %v1796_v55, %v7209_v38  ;;  %v1033_v43 = vadd.f32 %v937_v48, %v7128_v18 }
 0x166   :  { %v1150_v7 = vrot.slane %v774_v9, 5  ;;  %v1243_v9 = vadd.f32 %v1149_v11, %v1031_v5  ;;  %v1360_v60 = vsel %vm314_vm0, %v1357_v37, %v1359_v2  ;;  %v1673_v11 = vpop.permute.xlu0 %1672  ;;  %v1888_v5 = vadd.f32 %v1887_v40, %v1846_v51 }
 0x167   :  { %v7193_v25 = vpop.f32.mrf.mxu0  ;;  %v776_v23 = vpop.f32.mrf.mxu1  ;;  %v7231_v37 = vmul.f32 %v1658_v46, %v1453_v20 }
 0x168   :  { %v940_v41 = vrot.slane %v7193_v25, 1  ;;  %v1151_v17 = vsel %vm1086_vm4, %v1148_v27, %v1150_v7  ;;  %v939_v27 = vsel %vm870_vm3, %v936_v34, %v938_v26  ;;  %v1889_v51 = vadd.f32 %v1888_v5, %v1847_v39 }
 0x169   :  { %v7202_v36 = vpop.f32.mrf.mxu0  ;;  %v780_v62 = vpop.f32.mrf.mxu1  ;;  %v1244_v58 = vadd.f32 %v1151_v17, %v1032_v49 }
 0x16a   :  { %v1152_v56 = vrot.slane %v780_v62, 5  ;;  %v1361_v62 = vrot.slane %v776_v23, 6  ;;  %v1454_v23 = vadd.f32 %v1360_v60, %v1243_v9  ;;  %v941_v47 = vsel %vm870_vm3, %v938_v26, %v940_v41 }
 0x16b   :  { %v7211_v3 = vpop.f32.mrf.mxu0  ;;  %v782_v12 = vpop.f32.mrf.mxu1  ;;  %v1034_v9 = vadd.f32 %v939_v27, %v7146_v8  ;;  %v1035_v17 = vadd.f32 %v941_v47, %v7166_v24 }
 0x16c   :  { %v1153_v14 = vsel %vm1086_vm4, %v1150_v7, %v1152_v56  ;;  %v1363_v45 = vrot.slane %v782_v12, 6  ;;  %v1362_v59 = vsel %vm314_vm0, %v1359_v2, %v1361_v62  ;;  %v942_v40 = vrot.slane %v7211_v3, 1 }
 0x16d   :  { %v7219_v35 = vpop.f32.mrf.mxu0  ;;  %v784_v13 = vpop.f32.mrf.mxu1  ;;  %v1245_v44 = vadd.f32 %v1153_v14, %v1033_v43  ;;  %v1848_v3 = vmul.f32 %v7231_v37, %v7231_v37  ;;  %v7248_v60 = vmul.f32 %v1663_v21, %v1454_v23 }
 0x16e   :  { %v1154_v54 = vrot.slane %v784_v13, 5  ;;  %v1668_v13 = vpop.permute.xlu1 %1667  ;;  %v1364_v18 = vsel %vm314_vm0, %v1361_v62, %v1363_v45  ;;  %v1455_v62 = vadd.f32 %v1362_v59, %v1244_v58  ;;  %v1683_v14 = vpop.permute.xlu0 %1682 }
 0x16f   :  { %v7227_v57 = vpop.f32.mrf.mxu0  ;;  %v786_v25 = vpop.f32.mrf.mxu1  ;;  %v1456_v8 = vadd.f32 %v1364_v18, %v1245_v44 }
 0x170   :  { %v1155_v46 = vsel %vm1086_vm4, %v1152_v56, %v1154_v54  ;;  %v1365_v34 = vrot.slane %v786_v25, 6  ;;  %v944_v26 = vrot.slane %v7227_v57, 1  ;;  %v943_v25 = vsel %vm870_vm3, %v940_v41, %v942_v40 }
 0x171   :  { %v7235_v7 = vpop.f32.mrf.mxu0  ;;  %v790_v12 = vpop.f32.mrf.mxu1  ;;  %v1246_v5 = vadd.f32 %v1155_v46, %v1034_v9  ;;  %v7264_v18 = vmul.f32 %v1668_v13, %v1455_v62  ;;  %v7270_v9 = vmul.f32 %v1673_v11, %v1456_v8 }
 0x172   :  { %v1156_v55 = vrot.slane %v790_v12, 5  ;;  %v1366_v43 = vsel %vm314_vm0, %v1363_v45, %v1365_v34  ;;  %v1678_v59 = vpop.permute.xlu1 %1677  ;;  %v945_v47 = vsel %vm870_vm3, %v942_v40, %v944_v26  ;;  %v1890_v12 = vadd.f32 %v1889_v51, %v1848_v3  ;;  %v1693_v62 = vpop.permute.xlu0 %1692 }
 0x173   :  { %v7241_v20 = vpop.f32.mrf.mxu0  ;;  %v792_v48 = vpop.f32.mrf.mxu1  ;;  %v1036_v45 = vadd.f32 %v943_v25, %v7187_v4  ;;  %v1457_v40 = vadd.f32 %v1366_v43, %v1246_v5  ;;  %v1850_v5 = vmul.f32 %v7264_v18, %v7264_v18 }
 0x174   :  { %v1157_v49 = vsel %vm1086_vm4, %v1154_v54, %v1156_v55  ;;  %v1367_v2 = vrot.slane %v792_v48, 6  ;;  %v1798_v54 = vadd.f32 %v1797_v0, %v7231_v37  ;;  %v946_v21 = vrot.slane %v7241_v20, 1 }
 0x175   :  { %v7251_v56 = vpop.f32.mrf.mxu0  ;;  %v794_v39 = vpop.f32.mrf.mxu1  ;;  %v1247_v27 = vadd.f32 %v1157_v49, %v1035_v17  ;;  %v1849_v0 = vmul.f32 %v7248_v60, %v7248_v60  ;;  %v7282_v43 = vmul.f32 %v1678_v59, %v1457_v40 }
 0x176   :  { %v1158_v57 = vrot.slane %v794_v39, 5  ;;  %v1368_v58 = vsel %vm314_vm0, %v1365_v34, %v1367_v2  ;;  %v1799_v48 = vadd.f32 %v1798_v54, %v7248_v60  ;;  %v947_v51 = vsel %vm870_vm3, %v944_v26, %v946_v21 }
 0x177   :  { %v7257_v23 = vpop.f32.mrf.mxu0  ;;  %v796_v24 = vpop.f32.mrf.mxu1  ;;  %v1458_v49 = vadd.f32 %v1368_v58, %v1247_v27  ;;  %v1891_v8 = vadd.f32 %v1890_v12, %v1849_v0 }
 0x178   :  { %v1159_v41 = vsel %vm1086_vm4, %v1156_v55, %v1158_v57  ;;  %v1369_v44 = vrot.slane %v796_v24, 6  ;;  %v1037_v55 = vadd.f32 %v945_v47, %v7202_v36  ;;  %v948_v4 = vrot.slane %v7257_v23, 1  ;;  %v1688_v47 = vpop.permute.xlu1 %1687 }
 0x179   :  { %v7267_v46 = vpop.f32.mrf.mxu0  ;;  %v800_v20 = vpop.f32.mrf.mxu1  ;;  %v1248_v3 = vadd.f32 %v1159_v41, %v1036_v45  ;;  %v1800_v26 = vadd.f32 %v1799_v48, %v7264_v18  ;;  %v7290_v58 = vmul.f32 %v1683_v14, %v1458_v49 }
 0x17a   :  { %v1160_v34 = vrot.slane %v800_v20, 5  ;;  %v1370_v39 = vsel %vm314_vm0, %v1367_v2, %v1369_v44  ;;  %v1851_v2 = vmul.f32 %v7270_v9, %v7270_v9  ;;  %v949_v0 = vsel %vm870_vm3, %v946_v21, %v948_v4 }
 0x17b   :  { %v7274_v17 = vpop.f32.mrf.mxu0  ;;  %v802_v13 = vpop.f32.mrf.mxu1  ;;  %v1459_v41 = vadd.f32 %v1370_v39, %v1248_v3  ;;  %v1892_v20 = vadd.f32 %v1891_v8, %v1850_v5  ;;  %v1853_v3 = vmul.f32 %v7290_v58, %v7290_v58 }
 0x17c   :  { %v1161_v25 = vsel %vm1086_vm4, %v1158_v57, %v1160_v34  ;;  %v1371_v11 = vrot.slane %v802_v13, 6  ;;  %v1038_v57 = vadd.f32 %v947_v51, %v7219_v35  ;;  %v950_v59 = vrot.slane %v7274_v17, 1  ;;  %v1703_v13 = vpop.permute.xlu0 %1702 }
 0x17d   :  { %v1249_v36 = vadd.f32 %v1161_v25, %v1037_v55  ;;  %v804_v54 = vpop.f32.mrf.mxu1  ;;  %v7285_v24 = vpop.f32.mrf.mxu0  ;;  %v1801_v25 = vadd.f32 %v1800_v26, %v7270_v9  ;;  %v1852_v35 = vmul.f32 %v7282_v43, %v7282_v43  ;;  %v1893_v21 = vadd.f32 %v1892_v20, %v1851_v2 }
 0x17e   :  { %v1372_v27 = vsel %vm314_vm0, %v1369_v44, %v1371_v11  ;;  %v1162_v23 = vrot.slane %v804_v54, 5  ;;  %v7302_v17 = vmul.f32 %v1688_v47, %v1459_v41  ;;  %v951_v8 = vsel %vm870_vm3, %v948_v4, %v950_v59  ;;  %v1698_v26 = vpop.permute.xlu1 %1697 }
 0x17f   :  { %v806_v12 = vpop.f32.mrf.mxu1  ;;  %v1460_v48 = vadd.f32 %v1372_v27, %v1249_v36  ;;  %v567_v14 = vpop.f32.mrf.mxu0  ;;  %v1802_v27 = vadd.f32 %v1801_v25, %v7282_v43 }
 0x180   :  { %v1163_v45 = vsel %vm1086_vm4, %v1160_v34, %v1162_v23  ;;  %v1373_v44 = vrot.slane %v806_v12, 6  ;;  %v1039_v34 = vadd.f32 %v949_v0, %v7235_v7  ;;  %v952_v2 = vrot.slane %v567_v14, 1 }
 0x181   :  { %v1250_v40 = vadd.f32 %v1163_v45, %v1038_v57  ;;  %v810_v55 = vpop.f32.mrf.mxu1  ;;  %v1894_v45 = vadd.f32 %v1893_v21, %v1852_v35  ;;  %v1803_v41 = vadd.f32 %v1802_v27, %v7290_v58  ;;  %v1854_v4 = vmul.f32 %v7302_v17, %v7302_v17 }
 0x182   :  { %v1374_v51 = vsel %vm314_vm0, %v1371_v11, %v1373_v44  ;;  %v1164_v49 = vrot.slane %v810_v55, 5  ;;  %v7307_v11 = vmul.f32 %v1693_v62, %v1460_v48  ;;  %v953_v14 = vsel %vm870_vm3, %v950_v59, %v952_v2 }
 0x183   :  { %v812_v39 = vpop.f32.mrf.mxu1  ;;  %v1461_v5 = vadd.f32 %v1374_v51, %v1250_v40  ;;  %v1713_v40 = vpop.permute.xlu0 %1712  ;;  %v1895_v62 = vadd.f32 %v1894_v45, %v1853_v3  ;;  %v1041_v59 = vadd.f32 %v953_v14, %v7267_v46 }
 0x184   :  { %v1165_v36 = vsel %vm1086_vm4, %v1162_v23, %v1164_v49  ;;  %v1375_v54 = vrot.slane %v812_v39, 6  ;;  %v1040_v23 = vadd.f32 %v951_v8, %v7251_v56  ;;  %v1855_v35 = vmul.f32 %v7307_v11, %v7307_v11 }
 0x185   :  { %v1251_v57 = vadd.f32 %v1165_v36, %v1039_v34  ;;  %v814_v12 = vpop.f32.mrf.mxu1  ;;  %v7314_v48 = vmul.f32 %v1698_v26, %v1461_v5  ;;  %v8772_v56 = vrot.slane %v6690_v22, 1  ;;  %v1896_v5 = vadd.f32 %v1895_v62, %v1854_v4 }
 0x186   :  { %v1376_v7 = vsel %vm314_vm0, %v1373_v44, %v1375_v54  ;;  %v1166_v47 = vrot.slane %v814_v12, 5  ;;  %v1804_v44 = vadd.f32 %v1803_v41, %v7302_v17 }
 0x187   :  { %v1462_v0 = vadd.f32 %v1376_v7, %v1251_v57  ;;  %v816_v20 = vpop.f32.mrf.mxu1  ;;  %v955_v34 = vsel %vm870_vm3, %v952_v2, %v8772_v56  ;;  %v1856_v57 = vmul.f32 %v7314_v48, %v7314_v48  ;;  %v1723_v41 = vpop.permute.xlu0 %1722 }
 0x188   :  { %v1167_v55 = vsel %vm1086_vm4, %v1164_v49, %v1166_v47  ;;  %v1377_v25 = vrot.slane %v816_v20, 6  ;;  %v1708_v49 = vpop.permute.xlu1 %1707  ;;  %v1805_v36 = vadd.f32 %v1804_v44, %v7307_v11  ;;  %v1042_v12 = vadd.f32 %v955_v34, %v7285_v24 }
 0x189   :  { %v1252_v51 = vadd.f32 %v1167_v55, %v1040_v23  ;;  %v820_v21 = vpop.f32.mrf.mxu1  ;;  %v7324_v39 = vmul.f32 %v1703_v13, %v1462_v0  ;;  %v1897_v13 = vadd.f32 %v1896_v5, %v1855_v35  ;;  %v7345_v35 = vmul.f32 %v1723_v41, %v6696_v30 }
 0x18a   :  { %v1378_v3 = vsel %vm314_vm0, %v1375_v54, %v1377_v25  ;;  %v1168_v8 = vrot.slane %v820_v21, 5  ;;  %v1806_v4 = vadd.f32 %v1805_v36, %v7314_v48  ;;  %v8773_v34 = vmov 0.0  }
 0x18b   :  { %v1463_v26 = vadd.f32 %v1378_v3, %v1252_v51  ;;  %v822_v27 = vpop.f32.mrf.mxu1  ;;  %v1857_v46 = vmul.f32 %v7324_v39, %v7324_v39  ;;  %v1898_v62 = vadd.f32 %v1897_v13, %v1856_v57  ;;  %5746 = vmatprep.mubr.msk.bf16.mxu1 %vm6263_vm7, %v8773_v34  ;;  %v6071_v3 = vld [vmem:[%s8774_s25 + $0x4] ss:$12 sps:$4 sm:$0xff]   ;;  %v1861_v30 = vmul.f32 %v7345_v35, %v7345_v35 }
 0x18c   :  { %v1169_v22 = vsel %vm1086_vm4, %v1166_v47, %v1168_v8  ;;  %v1379_v2 = vrot.slane %v822_v27, 6  ;;  %v1807_v24 = vadd.f32 %v1806_v4, %v7324_v39  ;;  %v1718_v14 = vpop.permute.xlu1 %1717  ;;  %2749 = vmatprep.mubr.bf16.mxu0 %v6071_v3  ;;  %v1811_v27 = vsel %vm314_vm0, %v7345_v35, 0.0  ;;  %v1768_v3 = vld [vmem:[%s8775_s26] sm:$0x1] }
 0x18d   :  { %v7333_v54 = vmul.f32 %v1708_v49, %v1463_v26  ;;  %v1212_v45 = vsel %vm1211_vm5, %v1169_v22, 0.0  ;;  %v824_v7 = vpop.f32.mrf.mxu1  ;;  %v7347_v51 = vmul.f32 %v1718_v14, %v1042_v12  ;;  %v1899_v21 = vadd.f32 %v1898_v62, %v1857_v46 }
 0x18e   :  { %v1253_v23 = vadd.f32 %v1212_v45, %v1041_v59  ;;  %v1380_v0 = vsel %vm314_vm0, %v1377_v25, %v1379_v2  ;;  %v1903_v22 = vsel %vm314_vm0, %v1861_v30, 0.0  ;;  %v1769_v30 = vld [vmem:[%s8776_s27] sm:$0x1]  ;;  %s8801_s27 = sld [smem:[#allocation22_spill]] }
 0x18f   :  { %v1423_v47 = vsel %vm1422_vm6, %v1380_v0, 0.0  ;;  %v825_v20 = vpop.f32.mrf.mxu1  ;;  %v1858_v55 = vmul.f32 %v7333_v54, %v7333_v54  ;;  %v1808_v56 = vadd.f32 %v1807_v24, %v7333_v54  ;;  %v1860_v36 = vmul.f32 %v7347_v51, %v7347_v51 }
 0x190   :  { %v1464_v44 = vadd.f32 %v1423_v47, %v1253_v23 }
 0x191   :  { %v1900_v8 = vadd.f32 %v1899_v21, %v1858_v55 }
 0x192   :  { %v1765_v25 = vmul.f32 %v1713_v40, %v1464_v44 }
 0x194   :  { %v1809_v49 = vadd.f32 %v1808_v56, %v1765_v25  ;;  %v1859_v5 = vmul.f32 %v1765_v25, %v1765_v25 }
 0x196   :  { %v1810_v40 = vadd.f32 %v1809_v49, %v7347_v51  ;;  %v1901_v26 = vadd.f32 %v1900_v8, %v1859_v5  ;;  %v7367_v8 = vsub.s32 0, %v6397_v6 }
 0x198   :  { %v1812_v59 = vadd.f32 %v1811_v27, %v1810_v40  ;;  %v1902_v57 = vadd.f32 %v1901_v26, %v1860_v36 }
 0x19a   :  { %v1813_v2 = vrot.slane %v1812_v59, 4  ;;  %v1904_v13 = vadd.f32 %v1903_v22, %v1902_v57 }
 0x19c   :  { %v1814_v12 = vadd.f32 %v1813_v2, %v1812_v59  ;;  %v1905_v45 = vrot.slane %v1904_v13, 4 }
 0x19e   :  { %v1815_v7 = vrot.slane %v1814_v12, 2  ;;  %v1906_v41 = vadd.f32 %v1905_v45, %v1904_v13  ;;  %v8778_v45 = vld [vmem:[#allocation4_spill] sm:$0xff] }
 0x1a0   :  { %v1816_v4 = vadd.f32 %v1815_v7, %v1814_v12  ;;  %v1907_v46 = vrot.slane %v1906_v41, 2 }
 0x1a2   :  { %v1817_v23 = vrot.slane %v1816_v4, 1  ;;  %v1908_v0 = vadd.f32 %v1907_v46, %v1906_v41  ;;  %v8779_v41 = vld [vmem:[#allocation5_spill] sm:$0xff] }
 0x1a4   :  { %v1818_v47 = vadd.f32 %v1817_v23, %v1816_v4  ;;  %v1909_v20 = vrot.slane %v1908_v0, 1  ;;  %v8780_v23 = vld [vmem:[#allocation6_spill] sm:$0xff] }
 0x1a6   :  { %v1910_v62 = vadd.f32 %v1909_v20, %v1908_v0  ;;  %v1911_v24 = vmul.f32 0.0034722222, %v1818_v47  ;;  %v8781_v47 = vld [vmem:[#allocation7_spill] sm:$0xff]  ;;  %v8782_v20 = vld [vmem:[#allocation8_spill] sm:$0xff] }
 0x1a8   :  { %v1912_v55 = vmul.f32 0.0034722222, %v1910_v62  ;;  %v1913_v44 = vmul.f32 %v1911_v24, %v1911_v24 }
 0x1aa   :  { %v1914_v14 = vsub.f32 %v1912_v55, %v1913_v44 }
 0x1ac   :  { %v1915_v21 = vmax.f32 %v1914_v14, 0.0  ;;  %v8787_v14 = vld [vmem:[#allocation13_spill] sm:$0xff] }
 0x1ae   :  { %v1916_v56 = vadd.f32 1e-05, %v1915_v21 }
 0x1b0   :  { %6248 = vrsqrt.f32 %v1916_v56  ;;  %v8788_v56 = vld [vmem:[#allocation14_spill] sm:$0xff] }
 0x1bd   :  { %v6249_v49 = vpop.eup %6248 }
 0x1be   :  { %v1918_v5 = vmul.f32 %v6249_v49, %v1768_v3 }
 0x1c0   :  { %v1919_v36 = vmul.f32 %v1918_v5, %v1911_v24  ;;  %v1925_v40 = vrot.slane %v1918_v5, %v7367_v8 }
 0x1c2   :  { %v1920_v26 = vsub.f32 %v1769_v30, %v1919_v36  ;;  %v1967_v27 = vmul.f32 %v1925_v40, %v1765_v25  ;;  %v7374_v59 = vmul.f32 %v1925_v40, %v6788_v61  ;;  %v7377_v57 = vmul.f32 %v1925_v40, %v6779_v52 }
 0x1c3   :  { %v7380_v6 = vmul.f32 %v1925_v40, %v6791_v63  ;;  %v7383_v22 = vmul.f32 %v1925_v40, %v6807_v31  ;;  %v7386_v2 = vmul.f32 %v1925_v40, %v6821_v19  ;;  %v7389_v13 = vmul.f32 %v1925_v40, %v6834_v33  ;;  %v8777_v19 = vld [vmem:[#allocation3_spill] sm:$0xff] }
 0x1c4   :  { %v7392_v25 = vrot.slane %v1920_v26, %v7367_v8  ;;  %v7395_v61 = vmul.f32 %v1925_v40, %v6844_v16  ;;  %v7398_v52 = vmul.f32 %v1925_v40, %v6854_v50  ;;  %v7401_v63 = vmul.f32 %v1925_v40, %v6865_v53 }
 0x1c5   :  { %v7404_v31 = vmul.f32 %v1925_v40, %v6881_v29  ;;  %v1937_v12 = vmul.f32 %v1925_v40, %v8777_v19  ;;  %v1938_v33 = vmul.f32 %v1925_v40, %v8778_v45  ;;  %v1939_v7 = vmul.f32 %v1925_v40, %v6938_v10 }
 0x1c6   :  { %v1940_v4 = vmul.f32 %v1925_v40, %v8779_v41  ;;  %v1941_v16 = vmul.f32 %v1925_v40, %v6964_v42  ;;  %v1942_v46 = vmul.f32 %v1925_v40, %v6991_v28  ;;  %v7413_v50 = vmul.f32 %v1925_v40, %v7015_v1  ;;  %v8783_v42 = vld [vmem:[#allocation9_spill] sm:$0xff]  ;;  %v8784_v1 = vld [vmem:[#allocation10_spill] sm:$0xff] }
 0x1c7   :  { %v7416_v53 = vmul.f32 %v1925_v40, %v7027_v15  ;;  %v7419_v29 = vmul.f32 %v1925_v40, %v7039_v32  ;;  %v7422_v0 = vmul.f32 %v1925_v40, %v8780_v23  ;;  %v7425_v10 = vmul.f32 %v1925_v40, %v8781_v47  ;;  %v8785_v15 = vld [vmem:[#allocation11_spill] sm:$0xff]  ;;  %v8786_v32 = vld [vmem:[#allocation12_spill] sm:$0xff] }
 0x1c8   :  { %v7428_v62 = vmul.f32 %v1925_v40, %v8782_v20  ;;  %v7431_v28 = vmul.f32 %v1925_v40, %v8783_v42  ;;  %v7434_v24 = vmul.f32 %v1925_v40, %v8784_v1  ;;  %v7437_v55 = vmul.f32 %v1925_v40, %v8785_v15 }
 0x1c9   :  { %v7440_v44 = vmul.f32 %v1925_v40, %v8786_v32  ;;  %v7443_v21 = vmul.f32 %v1925_v40, %v8787_v14  ;;  %v7446_v3 = vmul.f32 %v1925_v40, %v8788_v56  ;;  %v7449_v49 = vmul.f32 %v1925_v40, %v7209_v38 }
 0x1ca   :  { %v7452_v5 = vmul.f32 %v1925_v40, %v7231_v37  ;;  %v7455_v30 = vmul.f32 %v1925_v40, %v7248_v60  ;;  %v7458_v36 = vmul.f32 %v1925_v40, %v7264_v18  ;;  %v7461_v26 = vmul.f32 %v1925_v40, %v7270_v9 }
 0x1cb   :  { %v7464_v19 = vmul.f32 %v1925_v40, %v7282_v43  ;;  %v7467_v45 = vmul.f32 %v1925_v40, %v7290_v58  ;;  %v7470_v38 = vmul.f32 %v1925_v40, %v7302_v17  ;;  %v1963_v37 = vmul.f32 %v1925_v40, %v7307_v11 }
 0x1cc   :  { %v7474_v60 = vmul.f32 %v1925_v40, %v7314_v48  ;;  %v1965_v18 = vmul.f32 %v1925_v40, %v7324_v39  ;;  %v1966_v41 = vmul.f32 %v1925_v40, %v7333_v54  ;;  %v1968_v9 = vmul.f32 %v1925_v40, %v7347_v51 }
 0x1cd   :  { %v1969_v43 = vmul.f32 %v1925_v40, %v7345_v35  ;;  %v1990_v23 = vadd.f32 %v7392_v25, %v1941_v16  ;;  %v1991_v58 = vadd.f32 %v7392_v25, %v1942_v46  ;;  %v1988_v17 = vadd.f32 %v7392_v25, %v1939_v7 }
 0x1ce   :  { %v1989_v47 = vadd.f32 %v7392_v25, %v1940_v4  ;;  %v2016_v11 = vadd.f32 %v7392_v25, %v1967_v27  ;;  %v2017_v48 = vadd.f32 %v7392_v25, %v1968_v9  ;;  %v1986_v39 = vadd.f32 %v7392_v25, %v1937_v12 }
 0x1cf   :  { %v2018_v54 = vadd.f32 %v7392_v25, %v1969_v43  ;;  %vm2033_vm8 = vcmp.ge.f32.partialorder %v1990_v23, 0.0  ;;  %vm2034_vm9 = vcmp.ge.f32.partialorder %v1991_v58, 0.0  ;;  %v2076_v51 = vmul.f32 0.2, %v1990_v23 }
 0x1d0   :  { %v2077_v35 = vmul.f32 0.2, %v1991_v58  ;;  %vm2031_vm10 = vcmp.ge.f32.partialorder %v1988_v17, 0.0  ;;  %vm2032_vm11 = vcmp.ge.f32.partialorder %v1989_v47, 0.0  ;;  %v2074_v40 = vmul.f32 0.2, %v1988_v17 }
 0x1d1   :  { %v2119_v16 = vsel %vm2033_vm8, %v1990_v23, %v2076_v51  ;;  %vm2061_vm12 = vcmp.ge.f32.partialorder %v2018_v54, 0.0  ;;  %v2104_v7 = vmul.f32 0.2, %v2018_v54  ;;  %v2075_v46 = vmul.f32 0.2, %v1989_v47 }
 0x1d2   :  { %v2120_v4 = vsel %vm2034_vm9, %v1991_v58, %v2077_v35  ;;  %v2117_v20 = vsel %vm2031_vm10, %v1988_v17, %v2074_v40  ;;  %vm2059_vm13 = vcmp.ge.f32.partialorder %v2016_v11, 0.0  ;;  %vm2060_vm14 = vcmp.ge.f32.partialorder %v2017_v48, 0.0 }
 0x1d3   :  { %v2253_v27 = vpack.c.bf16 %v2120_v4, %v2119_v16  ;;  %v2147_v42 = vsel %vm2061_vm12, %v2018_v54, %v2104_v7  ;;  %v2118_v12 = vsel %vm2032_vm11, %v1989_v47, %v2075_v46  ;;  %v2102_v1 = vmul.f32 0.2, %v2016_v11 }
 0x1d4   :  { %v2267_v15 = vpack.c.bf16 %v2147_v42, %v2147_v42  ;;  %v2252_v32 = vpack.c.bf16 %v2118_v12, %v2117_v20  ;;  %v2103_v14 = vmul.f32 0.2, %v2017_v48  ;;  %v1987_v56 = vadd.f32 %v7392_v25, %v1938_v33 }
 0x1d5   :  { %2718 = vmatpush1.bf16.msra.mxu0 %v2253_v27  ;;  %v2145_v9 = vsel %vm2059_vm13, %v2016_v11, %v2102_v1  ;;  %vm2029_vm15 = vcmp.ge.f32.partialorder %v1986_v39, 0.0  ;;  %v2072_v43 = vmul.f32 0.2, %v1986_v39  ;;  %v2014_v23 = vadd.f32 %v7392_v25, %v1965_v18 }
 0x1d6   :  { %v2715_v58 = vsel %vm999_vm2, %v2267_v15, 0  ;;  %v8789_v17 = vmov 0   ;;  %v2146_v51 = vsel %vm2060_vm14, %v2017_v48, %v2103_v14  ;;  %vm2030_vm1 = vcmp.ge.f32.partialorder %v1987_v56, 0.0 }
 0x1d7   :  { %2719 = vmatprep.subr.bf16.mxu0 %v8789_v17  ;;  %v2073_v47 = vmul.f32 0.2, %v1987_v56  ;;  %5735 = vmatpush3.bf16.msra.mxu1 %v2715_v58  ;;  %v2266_v54 = vpack.c.bf16 %v2146_v51, %v2145_v9  ;;  %v2115_v35 = vsel %vm2029_vm15, %v1986_v39, %v2072_v43  ;;  %v2015_v40 = vadd.f32 %v7392_v25, %v1966_v41 }
 0x1d8   :  { %vm2057_vm5 = vcmp.ge.f32.partialorder %v2014_v23, 0.0  ;;  %5736 = vmatprep.subr.bf16.mxu1 %v8773_v34  ;;  %v2100_v11 = vmul.f32 0.2, %v2014_v23  ;;  %v1984_v18 = vadd.f32 %v7392_v25, %v7401_v63  ;;  %v1985_v16 = vadd.f32 %v7392_v25, %v7404_v31 }
 0x1d9   :  { %v2116_v33 = vsel %vm2030_vm1, %v1987_v56, %v2073_v47  ;;  %2720 = vmatpush1.bf16.msra.mxu0 %v2252_v32  ;;  %vm2058_vm8 = vcmp.ge.f32.partialorder %v2015_v40, 0.0  ;;  %v2101_v7 = vmul.f32 0.2, %v2015_v40  ;;  %v2012_v46 = vadd.f32 %v7392_v25, %v1963_v37 }
 0x1da   :  { %v2251_v48 = vpack.c.bf16 %v2116_v33, %v2115_v35  ;;  %2721 = vmatprep.subr.bf16.mxu0 %v8789_v17  ;;  %v2143_v41 = vsel %vm2057_vm5, %v2014_v23, %v2100_v11  ;;  %vm2027_vm9 = vcmp.ge.f32.partialorder %v1984_v18, 0.0  ;;  %vm2028_vm10 = vcmp.ge.f32.partialorder %v1985_v16, 0.0 }
 0x1db   :  { %v2070_v39 = vmul.f32 0.2, %v1984_v18  ;;  %5737 = vmatpush3.bf16.msra.mxu1 %v2266_v54  ;;  %v2144_v4 = vsel %vm2058_vm8, %v2015_v40, %v2101_v7  ;;  %v2071_v20 = vmul.f32 0.2, %v1985_v16  ;;  %v2013_v63 = vadd.f32 %v7392_v25, %v7474_v60 }
 0x1dc   :  { %vm2055_vm11 = vcmp.ge.f32.partialorder %v2012_v46, 0.0  ;;  %5738 = vmatprep.subr.bf16.mxu1 %v8773_v34  ;;  %v2265_v31 = vpack.c.bf16 %v2144_v4, %v2143_v41  ;;  %v2098_v42 = vmul.f32 0.2, %v2012_v46  ;;  %v1982_v37 = vadd.f32 %v7392_v25, %v7395_v61 }
 0x1dd   :  { %v2113_v27 = vsel %vm2027_vm9, %v1984_v18, %v2070_v39  ;;  %2722 = vmatpush1.bf16.msra.mxu0 %v2251_v48  ;;  %v2114_v12 = vsel %vm2028_vm10, %v1985_v16, %v2071_v20  ;;  %vm2056_vm12 = vcmp.ge.f32.partialorder %v2013_v63, 0.0  ;;  %v2099_v1 = vmul.f32 0.2, %v2013_v63 }
 0x1de   :  { %v1983_v15 = vadd.f32 %v7392_v25, %v7398_v52  ;;  %2723 = vmatprep.subr.bf16.mxu0 %v8789_v17  ;;  %v2250_v32 = vpack.c.bf16 %v2114_v12, %v2113_v27  ;;  %v2141_v60 = vsel %vm2055_vm11, %v2012_v46, %v2098_v42  ;;  %vm2025_vm13 = vcmp.ge.f32.partialorder %v1982_v37, 0.0 }
 0x1df   :  { %v2068_v14 = vmul.f32 0.2, %v1982_v37  ;;  %5739 = vmatpush3.bf16.msra.mxu1 %v2265_v31  ;;  %v2142_v56 = vsel %vm2056_vm12, %v2013_v63, %v2099_v1  ;;  %v2010_v61 = vadd.f32 %v7392_v25, %v7467_v45  ;;  %v2011_v52 = vadd.f32 %v7392_v25, %v7470_v38 }
 0x1e0   :  { %vm2026_vm14 = vcmp.ge.f32.partialorder %v1983_v15, 0.0  ;;  %v2069_v9 = vmul.f32 0.2, %v1983_v15  ;;  %5740 = vmatprep.subr.bf16.mxu1 %v8773_v34  ;;  %v2264_v43 = vpack.c.bf16 %v2142_v56, %v2141_v60  ;;  %v1980_v58 = vadd.f32 %v7392_v25, %v7386_v2 }
 0x1e1   :  { %v2111_v23 = vsel %vm2025_vm13, %v1982_v37, %v2068_v14  ;;  %2724 = vmatpush1.bf16.msra.mxu0 %v2250_v32  ;;  %vm2053_vm15 = vcmp.ge.f32.partialorder %v2010_v61, 0.0  ;;  %v2096_v47 = vmul.f32 0.2, %v2010_v61  ;;  %v1981_v54 = vadd.f32 %v7392_v25, %v7389_v13 }
 0x1e2   :  { %v2112_v51 = vsel %vm2026_vm14, %v1983_v15, %v2069_v9  ;;  %2725 = vmatprep.subr.bf16.mxu0 %v8789_v17  ;;  %vm2054_vm1 = vcmp.ge.f32.partialorder %v2011_v52, 0.0  ;;  %v2097_v35 = vmul.f32 0.2, %v2011_v52  ;;  %vm2023_vm5 = vcmp.ge.f32.partialorder %v1980_v58, 0.0 }
 0x1e3   :  { %v2249_v45 = vpack.c.bf16 %v2112_v51, %v2111_v23  ;;  %5741 = vmatpush3.bf16.msra.mxu1 %v2264_v43  ;;  %v2139_v40 = vsel %vm2053_vm15, %v2010_v61, %v2096_v47  ;;  %vm2024_vm8 = vcmp.ge.f32.partialorder %v1981_v54, 0.0  ;;  %v2066_v38 = vmul.f32 0.2, %v1980_v58 }
 0x1e4   :  { %v2067_v33 = vmul.f32 0.2, %v1981_v54  ;;  %5742 = vmatprep.subr.bf16.mxu1 %v8773_v34  ;;  %v2140_v2 = vsel %vm2054_vm1, %v2011_v52, %v2097_v35  ;;  %v2008_v11 = vadd.f32 %v7392_v25, %v7461_v26  ;;  %v2009_v13 = vadd.f32 %v7392_v25, %v7464_v19 }
 0x1e5   :  { %v1978_v18 = vadd.f32 %v7392_v25, %v7380_v6  ;;  %vm2638_vm9 = vcmask 670720   ;;  %2726 = vmatpush1.bf16.msra.mxu0 %v2249_v45  ;;  %v2263_v16 = vpack.c.bf16 %v2140_v2, %v2139_v40  ;;  %v2109_v48 = vsel %vm2023_vm5, %v1980_v58, %v2066_v38 }
 0x1e6   :  { %v2110_v7 = vsel %vm2024_vm8, %v1981_v54, %v2067_v33  ;;  %v1979_v46 = vadd.f32 %v7392_v25, %v7383_v22  ;;  %2727 = vmatprep.subr.bf16.mxu0 %v8789_v17  ;;  %vm2051_vm10 = vcmp.ge.f32.partialorder %v2008_v11, 0.0  ;;  %vm2052_vm11 = vcmp.ge.f32.partialorder %v2009_v13, 0.0 }
 0x1e7   :  { %v2248_v41 = vpack.c.bf16 %v2110_v7, %v2109_v48  ;;  %v2094_v26 = vmul.f32 0.2, %v2008_v11  ;;  %5743 = vmatpush3.bf16.msra.mxu1 %v2263_v16  ;;  %v2095_v39 = vmul.f32 0.2, %v2009_v13  ;;  %vm2021_vm12 = vcmp.ge.f32.partialorder %v1978_v18, 0.0 }
 0x1e8   :  { %vm2022_vm13 = vcmp.ge.f32.partialorder %v1979_v46, 0.0  ;;  %v2064_v19 = vmul.f32 0.2, %v1978_v18  ;;  %5744 = vmatprep.subr.bf16.mxu1 %v8773_v34  ;;  %v2065_v4 = vmul.f32 0.2, %v1979_v46  ;;  %v1976_v20 = vadd.f32 %v7392_v25, %v7374_v59 }
 0x1e9   :  { %v2137_v6 = vsel %vm2051_vm10, %v2008_v11, %v2094_v26  ;;  %v1977_v22 = vadd.f32 %v7392_v25, %v7377_v57  ;;  %2728 = vmatpush1.bf16.msra.mxu0 %v2248_v41  ;;  %v2138_v63 = vsel %vm2052_vm11, %v2009_v13, %v2095_v39  ;;  %v2006_v27 = vadd.f32 %v7392_v25, %v7455_v30  ;;  %v6072_v59 = vld [vmem:[%s8774_s25 + $0x8] ss:$12 sps:$4 sm:$0xff]  }
 0x1ea   :  { %v2107_v31 = vsel %vm2021_vm12, %v1978_v18, %v2064_v19  ;;  %v2007_v42 = vadd.f32 %v7392_v25, %v7458_v36  ;;  %v2262_v37 = vpack.c.bf16 %v2138_v63, %v2137_v6  ;;  %2729 = vmatprep.subr.bf16.mxu0 %v8789_v17  ;;  %v2108_v12 = vsel %vm2022_vm13, %v1979_v46, %v2065_v4 }
 0x1eb   :  { %vm2019_vm14 = vcmp.ge.f32.partialorder %v1976_v20, 0.0  ;;  %vm2020_vm15 = vcmp.ge.f32.partialorder %v1977_v22, 0.0  ;;  %v2247_v57 = vpack.c.bf16 %v2108_v12, %v2107_v31  ;;  %v2062_v1 = vmul.f32 0.2, %v1976_v20 }
 0x1ec   :  { %v2063_v15 = vmul.f32 0.2, %v1977_v22  ;;  %vm2049_vm1 = vcmp.ge.f32.partialorder %v2006_v27, 0.0  ;;  %5745 = vmatpush3.bf16.msra.mxu1 %v2262_v37  ;;  %vm2050_vm5 = vcmp.ge.f32.partialorder %v2007_v42, 0.0  ;;  %v2092_v30 = vmul.f32 0.2, %v2006_v27 }
 0x1ed   :  { %v2093_v32 = vmul.f32 0.2, %v2007_v42  ;;  %v2004_v36 = vadd.f32 %v7392_v25, %v7449_v49  ;;  %2730 = vmatpush1.bf16.msra.mxu0 %v2247_v57  ;;  %v2105_v60 = vsel %vm2019_vm14, %v1976_v20, %v2062_v1  ;;  %v2005_v56 = vadd.f32 %v7392_v25, %v7452_v5  ;;  %v6084_v1 = vld [vmem:[%s8774_s25 + $0x50] ss:$12 sps:$4 sm:$0xff]  }
 0x1ee   :  { %v2106_v14 = vsel %vm2020_vm15, %v1977_v22, %v2063_v15  ;;  %v2002_v9 = vadd.f32 %v7392_v25, %v7443_v21  ;;  %2731 = vmatprep.subr.bf16.mxu0 %v8789_v17  ;;  %v2135_v43 = vsel %vm2049_vm1, %v2006_v27, %v2092_v30  ;;  %v2003_v49 = vadd.f32 %v7392_v25, %v7446_v3  ;;  %v6088_v15 = vld [vmem:[%s8774_s25 + $0x68] ss:$12 sps:$4 sm:$0xff]   ;;  %v6069_v30 = vld [vmem:[%s8774_s25] ss:$12 sps:$4 sm:$0xff]  }
 0x1ef   :  { %v2246_v61 = vpack.c.bf16 %v2106_v14, %v2105_v60  ;;  %v2136_v23 = vsel %vm2050_vm5, %v2007_v42, %v2093_v32  ;;  %vm2047_vm8 = vcmp.ge.f32.partialorder %v2004_v36, 0.0  ;;  %vm2048_vm10 = vcmp.ge.f32.partialorder %v2005_v56, 0.0  ;;  %5747 = vmatmul.mubr.msk.bf16.vlgmr.msra.gmra.mxu1 %vm2638_vm9, %v6072_v59  ;;  %v6073_v32 = vld [vmem:[%s8774_s25 + $0x1c] ss:$12 sps:$4 sm:$0xff]   ;;  %v6075_v60 = vld [vmem:[%s8774_s25 + $0x18] ss:$12 sps:$4 sm:$0xff]  }
 0x1f0   :  { %v2261_v52 = vpack.c.bf16 %v2136_v23, %v2135_v43  ;;  %v2090_v58 = vmul.f32 0.2, %v2004_v36  ;;  %v2091_v51 = vmul.f32 0.2, %v2005_v56  ;;  %vm2045_vm11 = vcmp.ge.f32.partialorder %v2002_v9, 0.0  ;;  %5750 = vmatprep.mubr.msk.bf16.mxu1 %vm6263_vm7, %v8773_v34 }
 0x1f1   :  { %v2088_v5 = vmul.f32 0.2, %v2002_v9  ;;  %v2000_v21 = vadd.f32 %v7392_v25, %v7437_v55  ;;  %2732 = vmatpush1.bf16.msra.mxu0 %v2246_v61  ;;  %v2001_v45 = vadd.f32 %v7392_v25, %v7440_v44  ;;  %v1998_v35 = vadd.f32 %v7392_v25, %v7431_v28  ;;  %v6076_v55 = vld [vmem:[%s8774_s25 + $0x20] ss:$12 sps:$4 sm:$0xff]   ;;  %v6100_v43 = vld [vmem:[%s8774_s25 + $0xb0] ss:$12 sps:$4 sm:$0xff]  }
 0x1f2   :  { %v2133_v47 = vsel %vm2047_vm8, %v2004_v36, %v2090_v58  ;;  %v2134_v54 = vsel %vm2048_vm10, %v2005_v56, %v2091_v51  ;;  %2733 = vmatprep.subr.bf16.mxu0 %v8789_v17  ;;  %vm2046_vm12 = vcmp.ge.f32.partialorder %v2003_v49, 0.0  ;;  %v2089_v40 = vmul.f32 0.2, %v2003_v49  ;;  %v6092_v36 = vld [vmem:[%s8774_s25 + $0x80] ss:$12 sps:$4 sm:$0xff]  }
 0x1f3   :  { %v2260_v3 = vpack.c.bf16 %v2134_v54, %v2133_v47  ;;  %v2131_v38 = vsel %vm2045_vm11, %v2002_v9, %v2088_v5  ;;  %vm2043_vm13 = vcmp.ge.f32.partialorder %v2000_v21, 0.0  ;;  %vm2044_vm14 = vcmp.ge.f32.partialorder %v2001_v45, 0.0  ;;  %v6077_v14 = vld [vmem:[%s8774_s25 + $0x34] ss:$12 sps:$4 sm:$0xff]   ;;  %v6096_v56 = vld [vmem:[%s8774_s25 + $0x98] ss:$12 sps:$4 sm:$0xff]  }
 0x1f4   :  { %v2086_v33 = vmul.f32 0.2, %v2000_v21  ;;  %v2087_v2 = vmul.f32 0.2, %v2001_v45  ;;  %v2132_v11 = vsel %vm2046_vm12, %v2003_v49, %v2089_v40  ;;  %v1999_v44 = vadd.f32 %v7392_v25, %v7434_v24  ;;  %v6079_v9 = vld [vmem:[%s8774_s25 + $0x30] ss:$12 sps:$4 sm:$0xff]  }
 0x1f5   :  { %vm2041_vm15 = vcmp.ge.f32.partialorder %v1998_v35, 0.0  ;;  %v2084_v28 = vmul.f32 0.2, %v1998_v35  ;;  %2734 = vmatpush2.bf16.msra.mxu0 %v2261_v52  ;;  %v2259_v13 = vpack.c.bf16 %v2132_v11, %v2131_v38  ;;  %v1996_v48 = vadd.f32 %v7392_v25, %v7425_v10  ;;  %v6081_v61 = vld [vmem:[%s8774_s25 + $0x4c] ss:$12 sps:$4 sm:$0xff]  }
 0x1f6   :  { %v2129_v18 = vsel %vm2043_vm13, %v2000_v21, %v2086_v33  ;;  %v2130_v16 = vsel %vm2044_vm14, %v2001_v45, %v2087_v2  ;;  %2735 = vmatprep.subr.bf16.mxu0 %v8789_v17  ;;  %vm2042_vm1 = vcmp.ge.f32.partialorder %v1999_v44, 0.0  ;;  %v2085_v46 = vmul.f32 0.2, %v1999_v44  ;;  %v6083_v23 = vld [vmem:[%s8774_s25 + $0x48] ss:$12 sps:$4 sm:$0xff]  }
 0x1f7   :  { %v2258_v7 = vpack.c.bf16 %v2130_v16, %v2129_v18  ;;  %v2127_v41 = vsel %vm2041_vm15, %v1998_v35, %v2084_v28  ;;  %v1997_v26 = vadd.f32 %v7392_v25, %v7428_v62  ;;  %vm2039_vm5 = vcmp.ge.f32.partialorder %v1996_v48, 0.0  ;;  %5751 = vmatmul.mubr.msk.bf16.gmra.mxu1 %vm2638_vm9, %v6076_v55  ;;  %v6085_v52 = vld [vmem:[%s8774_s25 + $0x64] ss:$12 sps:$4 sm:$0xff]   ;;  %v6104_v58 = vld [vmem:[%s8774_s25 + $0xc8] ss:$12 sps:$4 sm:$0xff]  }
 0x1f8   :  { %v2082_v24 = vmul.f32 0.2, %v1996_v48  ;;  %v1994_v39 = vadd.f32 %v7392_v25, %v7419_v29  ;;  %v2128_v19 = vsel %vm2042_vm1, %v1999_v44, %v2085_v46  ;;  %v1995_v10 = vadd.f32 %v7392_v25, %v7422_v0  ;;  %5754 = vmatprep.mubr.msk.bf16.mxu1 %vm6263_vm7, %v8773_v34  ;;  %v6087_v51 = vld [vmem:[%s8774_s25 + $0x60] ss:$12 sps:$4 sm:$0xff]   ;;  %v6089_v49 = vld [vmem:[%s8774_s25 + $0x7c] ss:$12 sps:$4 sm:$0xff]  }
 0x1f9   :  { %v1992_v6 = vadd.f32 %v7392_v25, %v7413_v50  ;;  %v1993_v4 = vadd.f32 %v7392_v25, %v7416_v53  ;;  %2736 = vmatpush2.bf16.msra.mxu0 %v2260_v3  ;;  %v2257_v62 = vpack.c.bf16 %v2128_v19, %v2127_v41  ;;  %vm2040_vm8 = vcmp.ge.f32.partialorder %v1997_v26, 0.0  ;;  %v6080_v25 = vld [vmem:[%s8774_s25 + $0x38] ss:$12 sps:$4 sm:$0xff]   ;;  %v6108_v5 = vld [vmem:[%s8774_s25 + $0xe0] ss:$12 sps:$4 sm:$0xff]  }
 0x1fa   :  { %v2083_v20 = vmul.f32 0.2, %v1997_v26  ;;  %v2125_v29 = vsel %vm2039_vm5, %v1996_v48, %v2082_v24  ;;  %2737 = vmatprep.subr.bf16.mxu0 %v8789_v17  ;;  %vm2037_vm10 = vcmp.ge.f32.partialorder %v1994_v39, 0.0  ;;  %vm2038_vm11 = vcmp.ge.f32.partialorder %v1995_v10, 0.0  ;;  %v6091_v21 = vld [vmem:[%s8774_s25 + $0x78] ss:$12 sps:$4 sm:$0xff]  }
 0x1fb   :  { %v2080_v22 = vmul.f32 0.2, %v1994_v39  ;;  %v2081_v0 = vmul.f32 0.2, %v1995_v10  ;;  %vm2035_vm12 = vcmp.ge.f32.partialorder %v1992_v6, 0.0  ;;  %vm2036_vm13 = vcmp.ge.f32.partialorder %v1993_v4, 0.0 }
 0x1fc   :  { %v2126_v63 = vsel %vm2040_vm8, %v1997_v26, %v2083_v20  ;;  %v2078_v50 = vmul.f32 0.2, %v1992_v6  ;;  %v2079_v42 = vmul.f32 0.2, %v1993_v4  ;;  %v6093_v47 = vld [vmem:[%s8774_s25 + $0x94] ss:$12 sps:$4 sm:$0xff]  }
 0x1fd   :  { %v2256_v53 = vpack.c.bf16 %v2126_v63, %v2125_v29  ;;  %v2123_v31 = vsel %vm2037_vm10, %v1994_v39, %v2080_v22  ;;  %v2124_v27 = vsel %vm2038_vm11, %v1995_v10, %v2081_v0  ;;  %2738 = vmatpush2.bf16.msra.mxu0 %v2259_v13  ;;  %v6112_v54 = vld [vmem:[%s8774_s25 + $0xf8] ss:$12 sps:$4 sm:$0xff]   ;;  %v6095_v45 = vld [vmem:[%s8774_s25 + $0x90] ss:$12 sps:$4 sm:$0xff]   ;;  %v6097_v40 = vld [vmem:[%s8774_s25 + $0xa8] ss:$12 sps:$4 sm:$0xff]  }
 0x1fe   :  { %v2255_v37 = vpack.c.bf16 %v2124_v27, %v2123_v31  ;;  %v2121_v12 = vsel %vm2035_vm12, %v1992_v6, %v2078_v50  ;;  %2739 = vmatprep.subr.bf16.mxu0 %v8789_v17  ;;  %v2122_v59 = vsel %vm2036_vm13, %v1993_v4, %v2079_v42  ;;  %v6099_v35 = vld [vmem:[%s8774_s25 + $0xac] ss:$12 sps:$4 sm:$0xff]   ;;  %v6116_v3 = vld [vmem:[%s8774_s25 + $0x110] ss:$12 sps:$4 sm:$0xff]   ;;  %v6120_v55 = vld [vmem:[%s8774_s25 + $0x128] ss:$12 sps:$4 sm:$0xff]  }
 0x1ff   :  { %v2254_v57 = vpack.c.bf16 %v2122_v59, %v2121_v12  ;;  %5755 = vmatmul.mubr.msk.bf16.gmra.mxu1 %vm2638_vm9, %v6080_v25  ;;  %v6103_v38 = vld [vmem:[%s8774_s25 + $0xc4] ss:$12 sps:$4 sm:$0xff]   ;;  %v6101_v33 = vld [vmem:[%s8774_s25 + $0xc0] ss:$12 sps:$4 sm:$0xff]   ;;  %v6107_v2 = vld [vmem:[%s8774_s25 + $0xdc] ss:$12 sps:$4 sm:$0xff]  }
 0x200   :  { %5758 = vmatprep.mubr.msk.bf16.mxu1 %vm6263_vm7, %v8773_v34  ;;  %v6124_v11 = vld [vmem:[%s8774_s25 + $0x140] ss:$12 sps:$4 sm:$0xff]   ;;  %v6105_v44 = vld [vmem:[%s8774_s25 + $0xd8] ss:$12 sps:$4 sm:$0xff]   ;;  %v6109_v18 = vld [vmem:[%s8774_s25 + $0xf0] ss:$12 sps:$4 sm:$0xff]  }
 0x201   :  { %2740 = vmatpush2.bf16.msra.mxu0 %v2258_v7  ;;  %v6111_v28 = vld [vmem:[%s8774_s25 + $0xf4] ss:$12 sps:$4 sm:$0xff]   ;;  %v6128_v13 = vld [vmem:[%s8774_s25 + $0x158] ss:$12 sps:$4 sm:$0xff]   ;;  %v6132_v48 = vld [vmem:[%s8774_s25 + $0x170] ss:$12 sps:$4 sm:$0xff]  }
 0x202   :  { %2741 = vmatprep.subr.bf16.mxu0 %v8789_v17  ;;  %v6115_v16 = vld [vmem:[%s8774_s25 + $0x10c] ss:$12 sps:$4 sm:$0xff]   ;;  %v6113_v7 = vld [vmem:[%s8774_s25 + $0x108] ss:$12 sps:$4 sm:$0xff]   ;;  %v6119_v46 = vld [vmem:[%s8774_s25 + $0x124] ss:$12 sps:$4 sm:$0xff]  }
 0x203   :  { %v6136_v41 = vld [vmem:[%s8774_s25 + $0x188] ss:$12 sps:$4 sm:$0xff]   ;;  %v6117_v26 = vld [vmem:[%s8774_s25 + $0x120] ss:$12 sps:$4 sm:$0xff]   ;;  %v6121_v19 = vld [vmem:[%s8774_s25 + $0x138] ss:$12 sps:$4 sm:$0xff]  }
 0x204   :  { %v6123_v24 = vld [vmem:[%s8774_s25 + $0x13c] ss:$12 sps:$4 sm:$0xff]   ;;  %v6140_v39 = vld [vmem:[%s8774_s25 + $0x1a0] ss:$12 sps:$4 sm:$0xff]   ;;  %v6144_v6 = vld [vmem:[%s8774_s25 + $0x1b8] ss:$12 sps:$4 sm:$0xff]  }
 0x205   :  { %2742 = vmatpush2.bf16.msra.mxu0 %v2257_v62  ;;  %v6127_v10 = vld [vmem:[%s8774_s25 + $0x154] ss:$12 sps:$4 sm:$0xff]   ;;  %v6125_v4 = vld [vmem:[%s8774_s25 + $0x150] ss:$12 sps:$4 sm:$0xff]   ;;  %v6131_v62 = vld [vmem:[%s8774_s25 + $0x16c] ss:$12 sps:$4 sm:$0xff]  }
 0x206   :  { %2743 = vmatprep.subr.bf16.mxu0 %v8789_v17  ;;  %v6148_v20 = vld [vmem:[%s8774_s25 + $0x1d0] ss:$12 sps:$4 sm:$0xff]   ;;  %v6129_v29 = vld [vmem:[%s8774_s25 + $0x168] ss:$12 sps:$4 sm:$0xff]   ;;  %v6133_v63 = vld [vmem:[%s8774_s25 + $0x180] ss:$12 sps:$4 sm:$0xff]  }
 0x207   :  { %5759 = vmatmul.mubr.msk.bf16.gmra.mxu1 %vm2638_vm9, %v6084_v1  ;;  %v6135_v22 = vld [vmem:[%s8774_s25 + $0x184] ss:$12 sps:$4 sm:$0xff]   ;;  %v6152_v0 = vld [vmem:[%s8774_s25 + $0x1e8] ss:$12 sps:$4 sm:$0xff]   ;;  %v6156_v25 = vld [vmem:[%s8774_s25 + $0x200] ss:$12 sps:$4 sm:$0xff]  }
 0x208   :  { %5762 = vmatprep.mubr.msk.bf16.mxu1 %vm6263_vm7, %v8773_v34  ;;  %v6139_v50 = vld [vmem:[%s8774_s25 + $0x19c] ss:$12 sps:$4 sm:$0xff]   ;;  %v6143_v31 = vld [vmem:[%s8774_s25 + $0x1b4] ss:$12 sps:$4 sm:$0xff]   ;;  %v6160_v27 = vld [vmem:[%s8774_s25 + $0x218] ss:$12 sps:$4 sm:$0xff]  }
 0x209   :  { %2744 = vmatpush2.bf16.msra.mxu0 %v2256_v53  ;;  %v6137_v53 = vld [vmem:[%s8774_s25 + $0x198] ss:$12 sps:$4 sm:$0xff]   ;;  %v6141_v42 = vld [vmem:[%s8774_s25 + $0x1b0] ss:$12 sps:$4 sm:$0xff]   ;;  %v6145_v59 = vld [vmem:[%s8774_s25 + $0x1c8] ss:$12 sps:$4 sm:$0xff]  }
 0x20a   :  { %2745 = vmatprep.subr.bf16.mxu0 %v8789_v17  ;;  %v6164_v12 = vld [vmem:[%s8774_s25 + $0x230] ss:$12 sps:$4 sm:$0xff]   ;;  %v6167_v1 = vld [vmem:[%s8774_s25 + $0x248] ss:$0 sps:$4 sm:$0xff]   ;;  %vm3411_vm14 = vcmask 64512   ;;  %vm3425_vm15 = vcmask 130048  }
 0x20b   :  { %vm3439_vm1 = vcmask 195584   ;;  %vm3508_vm5 = vcmask 261120   ;;  %vm4168_vm8 = vcmask 801792  }
 0x20d   :  { %2746 = vmatpush2.bf16.msra.mxu0 %v2255_v37  ;;  %v6147_v37 = vld [vmem:[%s8774_s25 + $0x1cc] ss:$12 sps:$4 sm:$0xff]  }
 0x20e   :  { %2747 = vmatprep.subr.bf16.mxu0 %v8789_v17 }
 0x20f   :  { %5763 = vmatmul.mubr.msk.bf16.gmra.mxu1 %vm2638_vm9, %v6088_v15 }
 0x210   :  { %5766 = vmatprep.mubr.msk.bf16.mxu1 %vm6263_vm7, %v8773_v34 }
 0x211   :  { %2748 = vmatpush2.bf16.msra.mxu0 %v2254_v57  ;;  %v6151_v57 = vld [vmem:[%s8774_s25 + $0x1e4] ss:$12 sps:$4 sm:$0xff]  }
 0x214   :  { %2750 = vmatmul.mubr.bf16.vlgmr.msra.gmra.mxu0 %v6069_v30  ;;  %v6149_v30 = vld [vmem:[%s8774_s25 + $0x1e0] ss:$12 sps:$4 sm:$0xff]  }
 0x215   :  { %2757 = vmatprep.mubr.bf16.mxu0 %v6073_v32  ;;  %v6155_v32 = vld [vmem:[%s8774_s25 + $0x1fc] ss:$12 sps:$4 sm:$0xff]  }
 0x217   :  { %5767 = vmatmul.mubr.msk.bf16.gmra.mxu1 %vm2638_vm9, %v6092_v36 }
 0x218   :  { %5770 = vmatprep.mubr.msk.bf16.mxu1 %vm6263_vm7, %v8773_v34 }
 0x21c   :  { %2758 = vmatmul.mubr.bf16.gmra.mxu0 %v6075_v60 }
 0x21d   :  { %2765 = vmatprep.mubr.bf16.mxu0 %v6077_v14 }
 0x21f   :  { %5771 = vmatmul.mubr.msk.bf16.gmra.mxu1 %vm2638_vm9, %v6096_v56 }
 0x220   :  { %5774 = vmatprep.mubr.msk.bf16.mxu1 %vm6263_vm7, %v8773_v34 }
 0x224   :  { %2766 = vmatmul.mubr.bf16.gmra.mxu0 %v6079_v9  ;;  %v6153_v9 = vld [vmem:[%s8774_s25 + $0x1f8] ss:$12 sps:$4 sm:$0xff]  }
 0x225   :  { %2773 = vmatprep.mubr.bf16.mxu0 %v6081_v61  ;;  %v6159_v61 = vld [vmem:[%s8774_s25 + $0x214] ss:$12 sps:$4 sm:$0xff]  }
 0x227   :  { %5775 = vmatmul.mubr.msk.bf16.gmra.mxu1 %vm2638_vm9, %v6100_v43 }
 0x228   :  { %5778 = vmatprep.mubr.msk.bf16.mxu1 %vm6263_vm7, %v8773_v34 }
 0x22c   :  { %2774 = vmatmul.mubr.bf16.gmra.mxu0 %v6083_v23 }
 0x22d   :  { %2781 = vmatprep.mubr.bf16.mxu0 %v6085_v52 }
 0x22f   :  { %5779 = vmatmul.mubr.msk.bf16.gmra.mxu1 %vm2638_vm9, %v6104_v58 }
 0x230   :  { %5782 = vmatprep.mubr.msk.bf16.mxu1 %vm6263_vm7, %v8773_v34 }
 0x234   :  { %2782 = vmatmul.mubr.bf16.gmra.mxu0 %v6087_v51  ;;  %v6157_v51 = vld [vmem:[%s8774_s25 + $0x210] ss:$12 sps:$4 sm:$0xff]  }
 0x235   :  { %2789 = vmatprep.mubr.bf16.mxu0 %v6089_v49  ;;  %v6163_v49 = vld [vmem:[%s8774_s25 + $0x22c] ss:$12 sps:$4 sm:$0xff]  }
 0x237   :  { %5783 = vmatmul.mubr.msk.bf16.gmra.mxu1 %vm2638_vm9, %v6108_v5 }
 0x238   :  { %5786 = vmatprep.mubr.msk.bf16.mxu1 %vm6263_vm7, %v8773_v34 }
 0x23c   :  { %2790 = vmatmul.mubr.bf16.gmra.mxu0 %v6091_v21 }
 0x23d   :  { %2797 = vmatprep.mubr.bf16.mxu0 %v6093_v47 }
 0x23f   :  { %5787 = vmatmul.mubr.msk.bf16.gmra.mxu1 %vm2638_vm9, %v6112_v54  ;;  %v2244_v54 = vld [vmem:[%s8774_s25 + $0x240] sm:$0xff] }
 0x240   :  { %5790 = vmatprep.mubr.msk.bf16.mxu1 %vm6263_vm7, %v8773_v34 }
 0x244   :  { %2798 = vmatmul.mubr.bf16.gmra.mxu0 %v6095_v45 }
 0x245   :  { %2805 = vmatprep.mubr.bf16.mxu0 %v6099_v35  ;;  %v6161_v35 = vld [vmem:[%s8774_s25 + $0x228] ss:$12 sps:$4 sm:$0xff]   ;;  %s6264_s25 = smov 8  }
 0x247   :  { %5791 = vmatmul.mubr.msk.bf16.gmra.mxu1 %vm2638_vm9, %v6116_v3  ;;  %v5543_v3 = vcombine.high %v2244_v54, %v2244_v54 }
 0x248   :  { %5794 = vmatprep.mubr.msk.bf16.mxu1 %vm6263_vm7, %v8773_v34 }
 0x24c   :  { %2806 = vmatmul.mubr.bf16.gmra.mxu0 %v6097_v40 }
 0x24d   :  { %2813 = vmatprep.mubr.bf16.mxu0 %v6103_v38 }
 0x24f   :  { %5795 = vmatmul.mubr.msk.bf16.gmra.mxu1 %vm2638_vm9, %v6120_v55 }
 0x250   :  { %5798 = vmatprep.mubr.msk.bf16.mxu1 %vm6263_vm7, %v8773_v34 }
 0x254   :  { %2814 = vmatmul.mubr.bf16.gmra.mxu0 %v6101_v33 }
 0x255   :  { %2821 = vmatprep.mubr.bf16.mxu0 %v6107_v2  ;;  %v5542_v2 = vcombine.low %v2244_v54, %v2244_v54 }
 0x257   :  { %5799 = vmatmul.mubr.msk.bf16.gmra.mxu1 %vm2638_vm9, %v6124_v11 }
 0x258   :  { %5802 = vmatprep.mubr.msk.bf16.mxu1 %vm6263_vm7, %v8773_v34 }
 0x25c   :  { %2822 = vmatmul.mubr.bf16.gmra.mxu0 %v6105_v44 }
 0x25d   :  { %2829 = vmatprep.mubr.bf16.mxu0 %v6111_v28 }
 0x25f   :  { %5803 = vmatmul.mubr.msk.bf16.gmra.mxu1 %vm2638_vm9, %v6128_v13 }
 0x260   :  { %5806 = vmatprep.mubr.msk.bf16.mxu1 %vm6263_vm7, %v8773_v34 }
 0x264   :  { %2830 = vmatmul.mubr.bf16.gmra.mxu0 %v6109_v18 }
 0x265   :  { %2837 = vmatprep.mubr.bf16.mxu0 %v6115_v16 }
 0x267   :  { %5807 = vmatmul.mubr.msk.bf16.gmra.mxu1 %vm2638_vm9, %v6132_v48 }
 0x268   :  { %5810 = vmatprep.mubr.msk.bf16.mxu1 %vm6263_vm7, %v8773_v34 }
 0x26c   :  { %2838 = vmatmul.mubr.bf16.gmra.mxu0 %v6113_v7 }
 0x26d   :  { %2845 = vmatprep.mubr.bf16.mxu0 %v6119_v46 }
 0x26f   :  { %5811 = vmatmul.mubr.msk.bf16.gmra.mxu1 %vm2638_vm9, %v6136_v41 }
 0x270   :  { %5814 = vmatprep.mubr.msk.bf16.mxu1 %vm6263_vm7, %v8773_v34 }
 0x274   :  { %2846 = vmatmul.mubr.bf16.gmra.mxu0 %v6117_v26 }
 0x275   :  { %2853 = vmatprep.mubr.bf16.mxu0 %v6123_v24 }
 0x277   :  { %5815 = vmatmul.mubr.msk.bf16.gmra.mxu1 %vm2638_vm9, %v6140_v39 }
 0x278   :  { %5818 = vmatprep.mubr.msk.bf16.mxu1 %vm6263_vm7, %v8773_v34 }
 0x27c   :  { %2854 = vmatmul.mubr.bf16.gmra.mxu0 %v6121_v19 }
 0x27d   :  { %2861 = vmatprep.mubr.bf16.mxu0 %v6127_v10 }
 0x27f   :  { %5819 = vmatmul.mubr.msk.bf16.gmra.mxu1 %vm2638_vm9, %v6144_v6 }
 0x280   :  { %5822 = vmatprep.mubr.msk.bf16.mxu1 %vm6263_vm7, %v8773_v34 }
 0x284   :  { %2862 = vmatmul.mubr.bf16.gmra.mxu0 %v6125_v4 }
 0x285   :  { %2869 = vmatprep.mubr.bf16.mxu0 %v6131_v62 }
 0x287   :  { %5823 = vmatmul.mubr.msk.bf16.gmra.mxu1 %vm2638_vm9, %v6148_v20 }
 0x288   :  { %5826 = vmatprep.mubr.msk.bf16.mxu1 %vm6263_vm7, %v8773_v34 }
 0x28c   :  { %2870 = vmatmul.mubr.bf16.gmra.mxu0 %v6129_v29 }
 0x28d   :  { %2877 = vmatprep.mubr.bf16.mxu0 %v6135_v22 }
 0x28f   :  { %5827 = vmatmul.mubr.msk.bf16.gmra.mxu1 %vm2638_vm9, %v6152_v0 }
 0x290   :  { %5830 = vmatprep.mubr.msk.bf16.mxu1 %vm6263_vm7, %v8773_v34 }
 0x294   :  { %2878 = vmatmul.mubr.bf16.gmra.mxu0 %v6133_v63 }
 0x295   :  { %2885 = vmatprep.mubr.bf16.mxu0 %v6139_v50 }
 0x297   :  { %5831 = vmatmul.mubr.msk.bf16.gmra.mxu1 %vm2638_vm9, %v6156_v25 }
 0x298   :  { %5834 = vmatprep.mubr.msk.bf16.mxu1 %vm6263_vm7, %v8773_v34 }
 0x29c   :  { %2886 = vmatmul.mubr.bf16.gmra.mxu0 %v6137_v53 }
 0x29d   :  { %2893 = vmatprep.mubr.bf16.mxu0 %v6143_v31 }
 0x29f   :  { %5835 = vmatmul.mubr.msk.bf16.gmra.mxu1 %vm2638_vm9, %v6160_v27 }
 0x2a0   :  { %5838 = vmatprep.mubr.msk.bf16.mxu1 %vm6263_vm7, %v8773_v34 }
 0x2a4   :  { %2894 = vmatmul.mubr.bf16.gmra.mxu0 %v6141_v42 }
 0x2a5   :  { %2901 = vmatprep.mubr.bf16.mxu0 %v6147_v37 }
 0x2a7   :  { %5839 = vmatmul.mubr.msk.bf16.gmra.mxu1 %vm2638_vm9, %v6164_v12 }
 0x2a8   :  { %5842 = vmatprep.mubr.msk.bf16.mxu1 %vm6263_vm7, %v8773_v34 }
 0x2ac   :  { %2902 = vmatmul.mubr.bf16.gmra.mxu0 %v6145_v59 }
 0x2ad   :  { %2909 = vmatprep.mubr.bf16.mxu0 %v6151_v57 }
 0x2af   :  { %v2983_v15 = vpop.f32.mrf.mxu1  ;;  %5843 = vmatmul.mubr.msk.bf16.gmra.mxu1 %vm2638_vm9, %v6167_v1  ;;  %vm3194_vm9 = vcmask 1045504  }
 0x2b0   :  { %3663 = vmatprep.mubr.bf16.mxu1 %v8789_v17 }
 0x2b1   :  { %v5748_v36 = vpop.f32.mrf.mxu1 }
 0x2b3   :  { %v2986_v60 = vpop.f32.mrf.mxu1 }
 0x2b4   :  { %2910 = vmatmul.mubr.bf16.gmra.mxu0 %v6149_v30 }
 0x2b5   :  { %2917 = vmatprep.mubr.bf16.mxu0 %v6155_v32  ;;  %v5749_v14 = vpop.f32.mrf.mxu1 }
 0x2b7   :  { %v2991_v56 = vpop.f32.mrf.mxu1 }
 0x2b9   :  { %v5752_v43 = vpop.f32.mrf.mxu1 }
 0x2bb   :  { %v2994_v23 = vpop.f32.mrf.mxu1 }
 0x2bc   :  { %2918 = vmatmul.mubr.bf16.gmra.mxu0 %v6153_v9 }
 0x2bd   :  { %2925 = vmatprep.mubr.bf16.mxu0 %v6159_v61  ;;  %v5753_v52 = vpop.f32.mrf.mxu1 }
 0x2bf   :  { %v2999_v58 = vpop.f32.mrf.mxu1 }
 0x2c1   :  { %v5756_v5 = vpop.f32.mrf.mxu1 }
 0x2c3   :  { %v3002_v21 = vpop.f32.mrf.mxu1 }
 0x2c4   :  { %2926 = vmatmul.mubr.bf16.gmra.mxu0 %v6157_v51 }
 0x2c5   :  { %2933 = vmatprep.mubr.bf16.mxu0 %v6163_v49  ;;  %v5757_v47 = vpop.f32.mrf.mxu1 }
 0x2c7   :  { %v3007_v45 = vpop.f32.mrf.mxu1 }
 0x2c9   :  { %v5760_v40 = vpop.f32.mrf.mxu1 }
 0x2cb   :  { %v3010_v38 = vpop.f32.mrf.mxu1 }
 0x2cc   :  { %2934 = vmatmul.mubr.bf16.gmra.mxu0 %v6161_v35 }
 0x2cd   :  { %2941 = vmatprep.mubr.bf16.mxu0 %v5543_v3  ;;  %v5761_v55 = vpop.f32.mrf.mxu1 }
 0x2cf   :  { %v3015_v33 = vpop.f32.mrf.mxu1 }
 0x2d1   :  { %v5764_v11 = vpop.f32.mrf.mxu1 }
 0x2d3   :  { %v3018_v44 = vpop.f32.mrf.mxu1 }
 0x2d4   :  { %v2751_v28 = vpop.f32.mrf.mxu0  ;;  %2942 = vmatmul.mubr.bf16.gmra.mxu0 %v5542_v2 }
 0x2d5   :  { %v7869_v13 = vadd.f32 %v2983_v15, %v2751_v28  ;;  %v5765_v18 = vpop.f32.mrf.mxu1  ;;  %3562 = vmatprep.mubr.bf16.mxu0 %v8789_v17 }
 0x2d6   :  { %v2753_v16 = vpop.f32.mrf.mxu0 }
 0x2d7   :  { %v3023_v48 = vpop.f32.mrf.mxu1 }
 0x2d8   :  { %v2754_v7 = vpop.f32.mrf.mxu0 }
 0x2d9   :  { %v7872_v46 = vadd.f32 %v2986_v60, %v2754_v7  ;;  %v5768_v41 = vpop.f32.mrf.mxu1 }
 0x2da   :  { %v2756_v26 = vpop.f32.mrf.mxu0 }
 0x2db   :  { %v3026_v24 = vpop.f32.mrf.mxu1 }
 0x2dc   :  { %v2759_v39 = vpop.f32.mrf.mxu0 }
 0x2dd   :  { %v7874_v19 = vadd.f32 %v2991_v56, %v2759_v39  ;;  %v5769_v10 = vpop.f32.mrf.mxu1 }
 0x2de   :  { %v2761_v6 = vpop.f32.mrf.mxu0 }
 0x2df   :  { %v3031_v4 = vpop.f32.mrf.mxu1 }
 0x2e0   :  { %v2762_v62 = vpop.f32.mrf.mxu0 }
 0x2e1   :  { %v7876_v20 = vadd.f32 %v2994_v23, %v2762_v62  ;;  %v5772_v29 = vpop.f32.mrf.mxu1 }
 0x2e2   :  { %v2764_v22 = vpop.f32.mrf.mxu0 }
 0x2e3   :  { %v3034_v0 = vpop.f32.mrf.mxu1 }
 0x2e4   :  { %v2767_v63 = vpop.f32.mrf.mxu0 }
 0x2e5   :  { %v7878_v50 = vadd.f32 %v2999_v58, %v2767_v63  ;;  %v5773_v25 = vpop.f32.mrf.mxu1 }
 0x2e6   :  { %v2769_v53 = vpop.f32.mrf.mxu0 }
 0x2e7   :  { %v3039_v31 = vpop.f32.mrf.mxu1 }
 0x2e8   :  { %v2770_v27 = vpop.f32.mrf.mxu0 }
 0x2e9   :  { %v7880_v42 = vadd.f32 %v3002_v21, %v2770_v27  ;;  %v5776_v37 = vpop.f32.mrf.mxu1 }
 0x2ea   :  { %v2772_v12 = vpop.f32.mrf.mxu0 }
 0x2eb   :  { %v3042_v59 = vpop.f32.mrf.mxu1 }
 0x2ec   :  { %v2775_v57 = vpop.f32.mrf.mxu0 }
 0x2ed   :  { %v7882_v1 = vadd.f32 %v3007_v45, %v2775_v57  ;;  %v5777_v15 = vpop.f32.mrf.mxu1 }
 0x2ee   :  { %v2777_v30 = vpop.f32.mrf.mxu0 }
 0x2ef   :  { %v3047_v32 = vpop.f32.mrf.mxu1 }
 0x2f0   :  { %v2778_v36 = vpop.f32.mrf.mxu0 }
 0x2f1   :  { %v7884_v60 = vadd.f32 %v3010_v38, %v2778_v36  ;;  %v5780_v14 = vpop.f32.mrf.mxu1 }
 0x2f2   :  { %v2780_v56 = vpop.f32.mrf.mxu0 }
 0x2f3   :  { %v3050_v9 = vpop.f32.mrf.mxu1 }
 0x2f4   :  { %v2783_v61 = vpop.f32.mrf.mxu0 }
 0x2f5   :  { %v7886_v43 = vadd.f32 %v3015_v33, %v2783_v61  ;;  %v5781_v23 = vpop.f32.mrf.mxu1 }
 0x2f6   :  { %v2785_v52 = vpop.f32.mrf.mxu0 }
 0x2f7   :  { %v7888_v58 = vpop.f32.mrf.mxu1 }
 0x2f8   :  { %v2786_v51 = vpop.f32.mrf.mxu0 }
 0x2f9   :  { %v7890_v49 = vadd.f32 %v3018_v44, %v2786_v51  ;;  %v5784_v5 = vpop.f32.mrf.mxu1  ;;  %v6168_v51 = vld [vmem:[%s8790_s3 + $0x20] ss:$16 sps:$4 sm:$0xff]  }
 0x2fa   :  { %v2788_v21 = vpop.f32.mrf.mxu0 }
 0x2fb   :  { %v7892_v47 = vpop.f32.mrf.mxu1 }
 0x2fc   :  { %v2791_v54 = vpop.f32.mrf.mxu0 }
 0x2fd   :  { %v7894_v45 = vadd.f32 %v3023_v48, %v2791_v54  ;;  %v5785_v35 = vpop.f32.mrf.mxu1 }
 0x2fe   :  { %v2793_v3 = vpop.f32.mrf.mxu0 }
 0x2ff   :  { %v7896_v40 = vpop.f32.mrf.mxu1 }
 0x300   :  { %v2794_v38 = vpop.f32.mrf.mxu0 }
 0x301   :  { %v7898_v55 = vadd.f32 %v3026_v24, %v2794_v38  ;;  %v5788_v33 = vpop.f32.mrf.mxu1 }
 0x302   :  { %v2796_v2 = vpop.f32.mrf.mxu0  ;;  %v6171_v33 = vld [vmem:[%s8790_s3 + $0x28] ss:$16 sps:$4 sm:$0xff]  }
 0x303   :  { %v7900_v11 = vpop.f32.mrf.mxu1 }
 0x304   :  { %v2799_v44 = vpop.f32.mrf.mxu0 }
 0x305   :  { %v5789_v28 = vpop.f32.mrf.mxu1  ;;  %v7904_v39 = vadd.f32 %v3031_v4, %v2799_v44 }
 0x306   :  { %v2801_v18 = vpop.f32.mrf.mxu0 }
 0x307   :  { %v7902_v16 = vpop.f32.mrf.mxu1  ;;  %v3195_v63 = vrot.slane %v7904_v39, 2 }
 0x308   :  { %v2802_v7 = vpop.f32.mrf.mxu0 }
 0x309   :  { %v3035_v41 = vadd.f32 %v3034_v0, %v2802_v7  ;;  %v5792_v48 = vpop.f32.mrf.mxu1 }
 0x30a   :  { %v2804_v26 = vpop.f32.mrf.mxu0 }
 0x30b   :  { %v7906_v10 = vpop.f32.mrf.mxu1  ;;  %v3196_v24 = vrot.slane %v3035_v41, 2 }
 0x30c   :  { %v2807_v6 = vpop.f32.mrf.mxu0 }
 0x30d   :  { %v3040_v62 = vadd.f32 %v3039_v31, %v2807_v6  ;;  %v5793_v29 = vpop.f32.mrf.mxu1  ;;  %v3197_v0 = vsel %vm3194_vm9, %v3195_v63, %v3196_v24 }
 0x30e   :  { %v2809_v22 = vpop.f32.mrf.mxu0 }
 0x30f   :  { %v3198_v25 = vrot.slane %v3040_v62, 2  ;;  %v7909_v53 = vpop.f32.mrf.mxu1 }
 0x310   :  { %v2810_v27 = vpop.f32.mrf.mxu0 }
 0x311   :  { %v3043_v37 = vadd.f32 %v3042_v59, %v2810_v27  ;;  %v3199_v4 = vsel %vm3194_vm9, %v3196_v24, %v3198_v25  ;;  %v5796_v12 = vpop.f32.mrf.mxu1 }
 0x312   :  { %v2812_v57 = vpop.f32.mrf.mxu0  ;;  %v5926_v15 = vpack.i.bf16 %v3199_v4, %v3197_v0 }
 0x313   :  { %v7913_v30 = vpop.f32.mrf.mxu1  ;;  %v3200_v36 = vrot.slane %v3043_v37, 2 }
 0x314   :  { %5927 = vrot.lane.b32.xlu1 %v5926_v15, %s6264_s25  ;;  %v2815_v31 = vpop.f32.mrf.mxu0 }
 0x315   :  { %v3048_v14 = vadd.f32 %v3047_v32, %v2815_v31  ;;  %v5797_v56 = vpop.f32.mrf.mxu1  ;;  %v7922_v54 = vsel %vm3194_vm9, %v3198_v25, %v3200_v36  ;;  %v6170_v32 = vld [vmem:[%s8790_s3 + $0x24] ss:$16 sps:$4 sm:$0xff]  }
 0x316   :  { %v2817_v61 = vpop.f32.mrf.mxu0  ;;  %3542 = vmatprep.subr.bf16.mxu0 %v6170_v32 }
 0x317   :  { %v3202_v23 = vrot.slane %v3048_v14, 2  ;;  %v7916_v52 = vpop.f32.mrf.mxu1  ;;  %3543 = vmatpush1.bf16.msra.mxu0 %v6168_v51 }
 0x318   :  { %v2818_v59 = vpop.f32.mrf.mxu0 }
 0x319   :  { %v3051_v5 = vadd.f32 %v3050_v9, %v2818_v59  ;;  %v5800_v21 = vpop.f32.mrf.mxu1  ;;  %v7925_v35 = vsel %vm3194_vm9, %v3200_v36, %v3202_v23  ;;  %v6173_v9 = vld [vmem:[%s8790_s3 + $0x2c] ss:$16 sps:$4 sm:$0xff]  }
 0x31a   :  { %v2820_v3 = vpop.f32.mrf.mxu0  ;;  %v5941_v38 = vpack.i.bf16 %v7925_v35, %v7922_v54  ;;  %3643 = vmatprep.subr.bf16.mxu1 %v6173_v9 }
 0x31b   :  { %v3204_v2 = vrot.slane %v3051_v5, 2  ;;  %v7938_v44 = vpop.f32.mrf.mxu1  ;;  %3644 = vmatpush1.bf16.msra.mxu1 %v6171_v33 }
 0x31c   :  { %v2823_v28 = vpop.f32.mrf.mxu0 }
 0x31d   :  { %v3056_v18 = vadd.f32 %v7888_v58, %v2823_v28  ;;  %v5801_v7 = vpop.f32.mrf.mxu1  ;;  %v7942_v41 = vsel %vm3194_vm9, %v3202_v23, %v3204_v2 }
 0x31e   :  { %v2825_v48 = vpop.f32.mrf.mxu0 }
 0x31f   :  { %v3206_v26 = vrot.slane %v3056_v18, 2  ;;  %v7944_v6 = vpop.f32.mrf.mxu1 }
 0x320   :  { %v2826_v24 = vpop.f32.mrf.mxu0 }
 0x321   :  { %v3059_v62 = vadd.f32 %v7892_v47, %v2826_v24  ;;  %v5804_v29 = vpop.f32.mrf.mxu1  ;;  %v7948_v22 = vsel %vm3194_vm9, %v3204_v2, %v3206_v26 }
 0x322   :  { %v2828_v63 = vpop.f32.mrf.mxu0 }
 0x323   :  { %v3208_v25 = vrot.slane %v3059_v62, 2  ;;  %v7952_v27 = vpop.f32.mrf.mxu1 }
 0x324   :  { %v2831_v37 = vpop.f32.mrf.mxu0 }
 0x325   :  { %v3064_v0 = vadd.f32 %v7896_v40, %v2831_v37  ;;  %v5805_v4 = vpop.f32.mrf.mxu1  ;;  %v7956_v12 = vsel %vm3194_vm9, %v3206_v26, %v3208_v25 }
 0x326   :  { %v2833_v57 = vpop.f32.mrf.mxu0 }
 0x327   :  { %v3210_v47 = vrot.slane %v3064_v0, 2  ;;  %v7958_v15 = vpop.f32.mrf.mxu1 }
 0x328   :  { %v2834_v31 = vpop.f32.mrf.mxu0 }
 0x329   :  { %v3067_v36 = vadd.f32 %v7900_v11, %v2834_v31  ;;  %v5808_v14 = vpop.f32.mrf.mxu1  ;;  %v7962_v56 = vsel %vm3194_vm9, %v3208_v25, %v3210_v47 }
 0x32a   :  { %v2836_v61 = vpop.f32.mrf.mxu0 }
 0x32b   :  { %v3212_v40 = vrot.slane %v3067_v36, 2  ;;  %v7966_v59 = vpop.f32.mrf.mxu1 }
 0x32c   :  { %v2839_v51 = vpop.f32.mrf.mxu0 }
 0x32d   :  { %v3072_v5 = vadd.f32 %v7902_v16, %v2839_v51  ;;  %v5809_v21 = vpop.f32.mrf.mxu1  ;;  %v7970_v32 = vsel %vm3194_vm9, %v3210_v47, %v3212_v40 }
 0x32e   :  { %v2841_v3 = vpop.f32.mrf.mxu0 }
 0x32f   :  { %v3214_v11 = vrot.slane %v3072_v5, 2  ;;  %v7972_v33 = vpop.f32.mrf.mxu1 }
 0x330   :  { %v2842_v9 = vpop.f32.mrf.mxu0 }
 0x331   :  { %v3075_v2 = vadd.f32 %v7906_v10, %v2842_v9  ;;  %v5812_v28 = vpop.f32.mrf.mxu1  ;;  %v7976_v18 = vsel %vm3194_vm9, %v3212_v40, %v3214_v11 }
 0x332   :  { %v2844_v7 = vpop.f32.mrf.mxu0 }
 0x333   :  { %v3216_v16 = vrot.slane %v3075_v2, 2  ;;  %v7980_v26 = vpop.f32.mrf.mxu1 }
 0x334   :  { %v2847_v24 = vpop.f32.mrf.mxu0 }
 0x335   :  { %v7983_v62 = vadd.f32 %v7909_v53, %v2847_v24  ;;  %v5813_v29 = vpop.f32.mrf.mxu1  ;;  %v7986_v63 = vsel %vm3194_vm9, %v3214_v11, %v3216_v16 }
 0x336   :  { %v2849_v10 = vpop.f32.mrf.mxu0 }
 0x337   :  { %v8747_v25 = vrot.slane %v7983_v62, 2  ;;  %v7989_v37 = vpop.f32.mrf.mxu1 }
 0x338   :  { %v2850_v0 = vpop.f32.mrf.mxu0 }
 0x339   :  { %v3083_v4 = vadd.f32 %v7913_v30, %v2850_v0  ;;  %v5816_v57 = vpop.f32.mrf.mxu1  ;;  %v7995_v47 = vsel %vm3194_vm9, %v3216_v16, %v8747_v25  ;;  %v3271_v30 = vrot.slane %v7983_v62, 4 }
 0x33a   :  { %v2852_v53 = vpop.f32.mrf.mxu0 }
 0x33b   :  { %v7999_v36 = vpop.f32.mrf.mxu1  ;;  %v3272_v61 = vrot.slane %v3083_v4, 4 }
 0x33c   :  { %v2855_v14 = vpop.f32.mrf.mxu0 }
 0x33d   :  { %v3088_v40 = vadd.f32 %v7916_v52, %v2855_v14  ;;  %v5817_v51 = vpop.f32.mrf.mxu1  ;;  %v3273_v2 = vsel %vm1422_vm6, %v3271_v30, %v3272_v61 }
 0x33e   :  { %v2857_v5 = vpop.f32.mrf.mxu0 }
 0x33f   :  { %v3274_v21 = vrot.slane %v3088_v40, 4  ;;  %v8003_v3 = vpop.f32.mrf.mxu1 }
 0x340   :  { %v2858_v11 = vpop.f32.mrf.mxu0 }
 0x341   :  { %v3091_v9 = vadd.f32 %v7938_v44, %v2858_v11  ;;  %v3275_v28 = vsel %vm1422_vm6, %v3272_v61, %v3274_v21  ;;  %v5820_v7 = vpop.f32.mrf.mxu1 }
 0x342   :  { %v2860_v16 = vpop.f32.mrf.mxu0  ;;  %v5931_v24 = vpack.i.bf16 %v3275_v28, %v3273_v2 }
 0x343   :  { %v8008_v29 = vpop.f32.mrf.mxu1  ;;  %v3276_v10 = vrot.slane %v3091_v9, 4 }
 0x344   :  { %5932 = vrot.lane.b32.xlu0 %v5931_v24, %s6265_s28  ;;  %v2863_v52 = vpop.f32.mrf.mxu0 }
 0x345   :  { %v3096_v0 = vadd.f32 %v7944_v6, %v2863_v52  ;;  %v5821_v4 = vpop.f32.mrf.mxu1  ;;  %v8020_v51 = vsel %vm1422_vm6, %v3274_v21, %v3276_v10 }
 0x346   :  { %v2865_v57 = vpop.f32.mrf.mxu0 }
 0x347   :  { %v3278_v53 = vrot.slane %v3096_v0, 4  ;;  %v8012_v44 = vpop.f32.mrf.mxu1 }
 0x348   :  { %5942 = vrot.lane.b32.xlu0 %v5941_v38, %s6264_s25  ;;  %v2866_v14 = vpop.f32.mrf.mxu0 }
 0x349   :  { %v3099_v61 = vadd.f32 %v7952_v27, %v2866_v14  ;;  %v5824_v40 = vpop.f32.mrf.mxu1  ;;  %v8023_v5 = vsel %vm1422_vm6, %v3276_v10, %v3278_v53 }
 0x34a   :  { %v2868_v6 = vpop.f32.mrf.mxu0  ;;  %v5946_v30 = vpack.i.bf16 %v8023_v5, %v8020_v51 }
 0x34b   :  { %v3280_v11 = vrot.slane %v3099_v61, 4  ;;  %v8027_v9 = vpop.f32.mrf.mxu1 }
 0x34c   :  { %v2871_v2 = vpop.f32.mrf.mxu0 }
 0x34d   :  { %v3104_v54 = vadd.f32 %v7958_v15, %v2871_v2  ;;  %v5825_v35 = vpop.f32.mrf.mxu1  ;;  %v8031_v38 = vsel %vm1422_vm6, %v3278_v53, %v3280_v11 }
 0x34e   :  { %v2873_v27 = vpop.f32.mrf.mxu0 }
 0x34f   :  { %v3282_v21 = vrot.slane %v3104_v54, 4  ;;  %v8033_v28 = vpop.f32.mrf.mxu1 }
 0x350   :  { %v2874_v7 = vpop.f32.mrf.mxu0 }
 0x351   :  { %v3107_v16 = vadd.f32 %v7966_v59, %v2874_v7  ;;  %v5828_v24 = vpop.f32.mrf.mxu1  ;;  %v8037_v52 = vsel %vm1422_vm6, %v3280_v11, %v3282_v21 }
 0x352   :  { %v2876_v10 = vpop.f32.mrf.mxu0 }
 0x353   :  { %v3284_v15 = vrot.slane %v3107_v16, 4  ;;  %v8041_v4 = vpop.f32.mrf.mxu1 }
 0x354   :  { %v2879_v57 = vpop.f32.mrf.mxu0 }
 0x355   :  { %v3112_v53 = vadd.f32 %v7972_v33, %v2879_v57  ;;  %v5829_v14 = vpop.f32.mrf.mxu1  ;;  %v8045_v61 = vsel %vm1422_vm6, %v3282_v21, %v3284_v15 }
 0x356   :  { %v2881_v40 = vpop.f32.mrf.mxu0 }
 0x357   :  { %v3286_v59 = vrot.slane %v3112_v53, 4  ;;  %v8047_v6 = vpop.f32.mrf.mxu1 }
 0x358   :  { %v2882_v11 = vpop.f32.mrf.mxu0 }
 0x359   :  { %v3115_v2 = vadd.f32 %v7980_v26, %v2882_v11  ;;  %v5832_v54 = vpop.f32.mrf.mxu1  ;;  %v8051_v35 = vsel %vm1422_vm6, %v3284_v15, %v3286_v59 }
 0x35a   :  { %v2884_v27 = vpop.f32.mrf.mxu0 }
 0x35b   :  { %v3288_v33 = vrot.slane %v3115_v2, 4  ;;  %v8055_v16 = vpop.f32.mrf.mxu1 }
 0x35c   :  { %v2887_v21 = vpop.f32.mrf.mxu0 }
 0x35d   :  { %v3120_v24 = vadd.f32 %v7989_v37, %v2887_v21  ;;  %v5833_v10 = vpop.f32.mrf.mxu1  ;;  %v8059_v57 = vsel %vm1422_vm6, %v3286_v59, %v3288_v33 }
 0x35e   :  { %v2889_v53 = vpop.f32.mrf.mxu0 }
 0x35f   :  { %v3290_v26 = vrot.slane %v3120_v24, 4  ;;  %v8061_v14 = vpop.f32.mrf.mxu1 }
 0x360   :  { %v2890_v15 = vpop.f32.mrf.mxu0 }
 0x361   :  { %v3123_v40 = vadd.f32 %v7999_v36, %v2890_v15  ;;  %v5836_v11 = vpop.f32.mrf.mxu1  ;;  %v8065_v54 = vsel %vm1422_vm6, %v3288_v33, %v3290_v26 }
 0x362   :  { %v2892_v2 = vpop.f32.mrf.mxu0 }
 0x363   :  { %v3292_v37 = vrot.slane %v3123_v40, 4  ;;  %v8069_v21 = vpop.f32.mrf.mxu1 }
 0x364   :  { %v2895_v59 = vpop.f32.mrf.mxu0 }
 0x365   :  { %v8072_v10 = vadd.f32 %v8003_v3, %v2895_v59  ;;  %v5837_v24 = vpop.f32.mrf.mxu1  ;;  %v8075_v53 = vsel %vm1422_vm6, %v3290_v26, %v3292_v37  ;;  %v6174_v26 = vld [vmem:[%s8790_s3] ss:$16 sps:$4 sm:$0xff]  }
 0x366   :  { %v2897_v36 = vpop.f32.mrf.mxu0  ;;  %v6176_v24 = vld [vmem:[%s8790_s3 + $0x4] ss:$16 sps:$4 sm:$0xff]  }
 0x367   :  { %v8748_v15 = vrot.slane %v8072_v10, 4  ;;  %v8078_v33 = vpop.f32.mrf.mxu1  ;;  %3544 = vmatprep.subr.bf16.mxu0 %v6176_v24  ;;  %v3347_v31 = vrot.slane %v8072_v10, 6 }
 0x368   :  { %v2898_v11 = vpop.f32.mrf.mxu0  ;;  %3545 = vmatpush1.bf16.msra.mxu0 %v6174_v26 }
 0x369   :  { %v3131_v2 = vadd.f32 %v8008_v29, %v2898_v11  ;;  %v5840_v25 = vpop.f32.mrf.mxu1  ;;  %v8084_v40 = vsel %vm1422_vm6, %v3292_v37, %v8748_v15  ;;  %v6179_v37 = vld [vmem:[%s8790_s3 + $0xc] ss:$16 sps:$4 sm:$0xff]  }
 0x36a   :  { %v2900_v3 = vpop.f32.mrf.mxu0  ;;  %v6177_v25 = vld [vmem:[%s8790_s3 + $0x8] ss:$16 sps:$4 sm:$0xff]   ;;  %3645 = vmatprep.subr.bf16.mxu1 %v6179_v37  ;;  %s6266_s3 = smov 24  }
 0x36b   :  { %v8097_v29 = vpop.f32.mrf.mxu1  ;;  %v3348_v11 = vrot.slane %v3131_v2, 6  ;;  %3646 = vmatpush1.bf16.msra.mxu1 %v6177_v25 }
 0x36c   :  { %v2903_v36 = vpop.f32.mrf.mxu0 }
 0x36d   :  { %v3136_v3 = vadd.f32 %v8012_v44, %v2903_v36  ;;  %v5841_v15 = vpop.f32.mrf.mxu1  ;;  %v3349_v0 = vsel %vm314_vm0, %v3347_v31, %v3348_v11 }
 0x36e   :  { %v2905_v59 = vpop.f32.mrf.mxu0 }
 0x36f   :  { %v3350_v27 = vrot.slane %v3136_v3, 6  ;;  %v8104_v48 = vpop.f32.mrf.mxu1 }
 0x370   :  { %v2906_v7 = vpop.f32.mrf.mxu0 }
 0x371   :  { %v3139_v23 = vadd.f32 %v8027_v9, %v2906_v7  ;;  %v3351_v24 = vsel %vm314_vm0, %v3348_v11, %v3350_v27  ;;  %v5844_v2 = vpop.f32.mrf.mxu1 }
 0x372   :  { %v2908_v58 = vpop.f32.mrf.mxu0  ;;  %v5936_v44 = vpack.i.bf16 %v3351_v24, %v3349_v0 }
 0x373   :  { %v3178_v15 = vpop.f32.mrf.mxu1  ;;  %v3352_v26 = vrot.slane %v3139_v23, 6  ;;  %v8791_v23 = vpack.i.bf16 %v7948_v22, %v7942_v41 }
 0x374   :  { %5937 = vrot.lane.b32.xlu1 %v5936_v44, %s6266_s3  ;;  %v2911_v59 = vpop.f32.mrf.mxu0 }
 0x375   :  { %v3144_v25 = vadd.f32 %v8033_v28, %v2911_v59  ;;  %v5845_v37 = vpop.f32.mrf.mxu1  ;;  %v3353_v9 = vsel %vm314_vm0, %v3350_v27, %v3352_v26 }
 0x376   :  { %v2913_v36 = vpop.f32.mrf.mxu0 }
 0x377   :  { %v3354_v3 = vrot.slane %v3144_v25, 6 }
 0x378   :  { %5947 = vrot.lane.b32.xlu1 %v5946_v30, %s6265_s28  ;;  %v2914_v31 = vpop.f32.mrf.mxu0 }
 0x379   :  { %v3147_v58 = vadd.f32 %v8041_v4, %v2914_v31  ;;  %v3355_v0 = vsel %vm314_vm0, %v3352_v26, %v3354_v3  ;;  %v8792_v4 = vpack.i.bf16 %v8037_v52, %v8031_v38 }
 0x37a   :  { %v2916_v7 = vpop.f32.mrf.mxu0  ;;  %v5951_v11 = vpack.i.bf16 %v3355_v0, %v3353_v9 }
 0x37b   :  { %v3356_v24 = vrot.slane %v3147_v58, 6 }
 0x37c   :  { %5957 = vrot.lane.b32.xlu1 %v8791_v23, %s6264_s25  ;;  %5952 = vrot.lane.b32.xlu0 %v5951_v11, %s6266_s3  ;;  %v2919_v28 = vpop.f32.mrf.mxu0 }
 0x37d   :  { %v3152_v51 = vadd.f32 %v8047_v6, %v2919_v28  ;;  %v3357_v44 = vsel %vm314_vm0, %v3354_v3, %v3356_v24  ;;  %v8793_v6 = vpack.i.bf16 %v7962_v56, %v7956_v12 }
 0x37e   :  { %v2921_v5 = vpop.f32.mrf.mxu0 }
 0x37f   :  { %v3358_v30 = vrot.slane %v3152_v51, 6 }
 0x380   :  { %5962 = vrot.lane.b32.xlu0 %v8792_v4, %s6265_s28  ;;  %v2922_v27 = vpop.f32.mrf.mxu0 }
 0x381   :  { %v3155_v2 = vadd.f32 %v8055_v16, %v2922_v27  ;;  %v3359_v41 = vsel %vm314_vm0, %v3356_v24, %v3358_v30  ;;  %v8794_v16 = vpack.i.bf16 %v8051_v35, %v8045_v61 }
 0x382   :  { %v2924_v22 = vpop.f32.mrf.mxu0  ;;  %v5966_v15 = vpack.i.bf16 %v3359_v41, %v3357_v44  ;;  %v3876_v44 = vld [vmem:[%s8801_s27 + $0x10] sm:$0xff]  ;;  %v3878_v41 = vld [vmem:[%s8801_s27 + $0x20] sm:$0xff] }
 0x383   :  { %v3360_v26 = vrot.slane %v3155_v2, 6  ;;  %v8799_v2 = vrot.slane %v7983_v62, 2  ;;  %v3877_v62 = vld [vmem:[%s8801_s27 + $0x18] sm:$0xff] }
 0x384   :  { %5972 = vrot.lane.b32.xlu0 %v8793_v6, %s6264_s25  ;;  %5967 = vrot.lane.b32.xlu1 %v5966_v15, %s6266_s3  ;;  %v2927_v59 = vpop.f32.mrf.mxu0  ;;  %v3881_v22 = vld [vmem:[%s8801_s27 + $0x38] sm:$0xff]  ;;  %v3880_v15 = vld [vmem:[%s8801_s27 + $0x30] sm:$0xff] }
 0x385   :  { %v3160_v38 = vadd.f32 %v8061_v14, %v2927_v59  ;;  %v3361_v3 = vsel %vm314_vm0, %v3358_v30, %v3360_v26  ;;  %v8795_v14 = vpack.i.bf16 %v7976_v18, %v7970_v32  ;;  %v3883_v6 = vld [vmem:[%s8801_s27 + $0x48] sm:$0xff]  ;;  %v3882_v59 = vld [vmem:[%s8801_s27 + $0x40] sm:$0xff] }
 0x386   :  { %v2929_v52 = vpop.f32.mrf.mxu0 }
 0x387   :  { %v3362_v25 = vrot.slane %v3160_v38, 6  ;;  %v3884_v38 = vld [vmem:[%s8801_s27 + $0x50] sm:$0xff]  ;;  %v3886_v52 = vld [vmem:[%s8801_s27 + $0x60] sm:$0x3] }
 0x388   :  { %5977 = vrot.lane.b32.xlu1 %v8794_v16, %s6265_s28  ;;  %v2930_v37 = vpop.f32.mrf.mxu0 }
 0x389   :  { %v3163_v36 = vadd.f32 %v8069_v21, %v2930_v37  ;;  %v3363_v12 = vsel %vm314_vm0, %v3360_v26, %v3362_v25  ;;  %v8796_v21 = vpack.i.bf16 %v8065_v54, %v8059_v57  ;;  %v3885_v26 = vld [vmem:[%s8801_s27 + $0x58] sm:$0xff] }
 0x38a   :  { %v2932_v56 = vpop.f32.mrf.mxu0  ;;  %v5981_v31 = vpack.i.bf16 %v3363_v12, %v3361_v3 }
 0x38b   :  { %v3364_v9 = vrot.slane %v3163_v36, 6 }
 0x38c   :  { %5987 = vrot.lane.b32.xlu1 %v8795_v14, %s6264_s25  ;;  %5982 = vrot.lane.b32.xlu0 %v5981_v31, %s6266_s3  ;;  %v2935_v58 = vpop.f32.mrf.mxu0 }
 0x38d   :  { %v3168_v61 = vadd.f32 %v8078_v33, %v2935_v58  ;;  %v3365_v23 = vsel %vm314_vm0, %v3362_v25, %v3364_v9  ;;  %v8797_v33 = vpack.i.bf16 %v7995_v47, %v7986_v63  ;;  %v5928_v25 = vpop.permute.xlu1 %5927 }
 0x38e   :  { %v2937_v35 = vpop.f32.mrf.mxu0  ;;  %v5930_v37 = vunpack.i.h.bf16 %v5928_v25  ;;  %v5929_v36 = vunpack.i.l.bf16 %v5928_v25 }
 0x38f   :  { %v3366_v0 = vrot.slane %v3168_v61, 6 }
 0x390   :  { %5992 = vrot.lane.b32.xlu0 %v8796_v21, %s6265_s28  ;;  %v2938_v7 = vpop.f32.mrf.mxu0  ;;  %v3413_v31 = vsel %vm3411_vm14, %v7872_v46, %v5930_v37  ;;  %v3412_v14 = vsel %vm3411_vm14, %v7869_v13, %v5929_v36 }
 0x391   :  { %v3171_v11 = vadd.f32 %v8097_v29, %v2938_v7  ;;  %v3367_v32 = vsel %vm314_vm0, %v3364_v9, %v3366_v0  ;;  %v8798_v29 = vpack.i.bf16 %v8084_v40, %v8075_v53  ;;  %v3875_v53 = vld [vmem:[%s8801_s27 + $0x8] sm:$0xff]  ;;  %v3874_v40 = vld [vmem:[%s8801_s27] sm:$0xff] }
 0x392   :  { %v2940_v18 = vpop.f32.mrf.mxu0  ;;  %v5996_v28 = vpack.i.bf16 %v3367_v32, %v3365_v23 }
 0x393   :  { %v3368_v51 = vrot.slane %v3171_v11, 6 }
 0x394   :  { %6002 = vrot.lane.b32.xlu0 %v8797_v33, %s6264_s25  ;;  %5997 = vrot.lane.b32.xlu1 %v5996_v28, %s6266_s3  ;;  %v2943_v24 = vpop.f32.mrf.mxu0 }
 0x395   :  { %v3176_v57 = vadd.f32 %v8104_v48, %v2943_v24  ;;  %v3369_v4 = vsel %vm314_vm0, %v3366_v0, %v3368_v51  ;;  %v8800_v48 = vrot.slane %v8072_v10, 4  ;;  %v3879_v10 = vld [vmem:[%s8801_s27 + $0x28] sm:$0xff] }
 0x396   :  { %v2945_v54 = vpop.f32.mrf.mxu0 }
 0x397   :  { %v3370_v5 = vrot.slane %v3176_v57, 6 }
 0x398   :  { %6007 = vrot.lane.b32.xlu1 %v8798_v29, %s6265_s28  ;;  %v2946_v30 = vpop.f32.mrf.mxu0 }
 0x399   :  { %v3371_v27 = vsel %vm314_vm0, %v3368_v51, %v3370_v5 }
 0x39a   :  { %v6011_v63 = vpack.i.bf16 %v3371_v27, %v3369_v4  ;;  %v2947_v47 = vpop.f32.mrf.mxu0 }
 0x39c   :  { %3244 = vrot.lane.b32.xlu1 %v8799_v2, %s6264_s25  ;;  %6012 = vrot.lane.b32.xlu0 %v6011_v63, %s6266_s3 }
 0x3a0   :  { %3396 = vrot.lane.b32.xlu1 %v3370_v5, %s6266_s3  ;;  %3320 = vrot.lane.b32.xlu0 %v8800_v48, %s6265_s28 }
 0x3a4   :  { %3894 = vperm.xlu1 %5925, %v3875_v53   ;;  %3889 = vperm.xlu0 %5924, %v3874_v40  }
 0x3a8   :  { %3904 = vperm.xlu1 %5925, %v3877_v62   ;;  %3899 = vperm.xlu0 %5924, %v3876_v44  }
 0x3ac   :  { %3914 = vperm.xlu1 %5925, %v3879_v10   ;;  %3909 = vperm.xlu0 %5924, %v3878_v41  }
 0x3b0   :  { %3924 = vperm.xlu1 %5925, %v3881_v22   ;;  %3919 = vperm.xlu0 %5924, %v3880_v15  }
 0x3b4   :  { %3934 = vperm.xlu1 %5925, %v3883_v6   ;;  %3929 = vperm.xlu0 %5924, %v3882_v59  }
 0x3b6   :  { %v5933_v16 = vpop.permute.xlu0 %5932 }
 0x3b7   :  { %v5935_v3 = vunpack.i.h.bf16 %v5933_v16  ;;  %v5934_v12 = vunpack.i.l.bf16 %v5933_v16 }
 0x3b8   :  { %3944 = vperm.xlu1 %5925, %v3885_v26   ;;  %3939 = vperm.xlu0 %5924, %v3884_v38  }
 0x3b9   :  { %v3427_v61 = vsel %vm3425_vm15, %v3413_v31, %v5935_v3  ;;  %v3426_v35 = vsel %vm3425_vm15, %v3412_v14, %v5934_v12 }
 0x3ba   :  { %v5943_v0 = vpop.permute.xlu0 %5942 }
 0x3bb   :  { %v5945_v32 = vunpack.i.h.bf16 %v5943_v0  ;;  %v5944_v18 = vunpack.i.l.bf16 %v5943_v0 }
 0x3bc   :  { %3949 = vperm.xlu0 %5924, %v3886_v52  }
 0x3bd   :  { %v3415_v33 = vsel %vm3411_vm14, %v7876_v20, %v5945_v32  ;;  %v3414_v24 = vsel %vm3411_vm14, %v7874_v19, %v5944_v18 }
 0x3e6   :  { %v5938_v56 = vpop.permute.xlu1 %5937 }
 0x3e7   :  { %v5940_v58 = vunpack.i.h.bf16 %v5938_v56  ;;  %v5939_v9 = vunpack.i.l.bf16 %v5938_v56 }
 0x3e9   :  { %v3441_v21 = vsel %vm3439_vm1, %v3427_v61, %v5940_v58  ;;  %v3440_v7 = vsel %vm3439_vm1, %v3426_v35, %v5939_v9 }
 0x3ea   :  { %v3453_v11 = vpack.c.bf16 %v3441_v21, %v3440_v7  ;;  %v5948_v23 = vpop.permute.xlu1 %5947 }
 0x3eb   :  { %v5950_v46 = vunpack.i.h.bf16 %v5948_v23  ;;  %v5949_v28 = vunpack.i.l.bf16 %v5948_v23 }
 0x3ec   :  { %5578 = vmatmul.mubr.msk.bf16.vlgmr.msra.gmra.mxu0 %vm3508_vm5, %v3453_v11  ;;  %5585 = vmatmul.mubr.msk.bf16.vlgmr.msra.gmra.mxu1 %vm3508_vm5, %v3453_v11 }
 0x3ed   :  { %3572 = vmatprep.mubr.bf16.mxu0 %v8789_v17  ;;  %3672 = vmatprep.mubr.bf16.mxu1 %v8789_v17  ;;  %v3429_v54 = vsel %vm3425_vm15, %v3415_v33, %v5950_v46  ;;  %v3428_v5 = vsel %vm3425_vm15, %v3414_v24, %v5949_v28 }
 0x3ee   :  { %v5953_v13 = vpop.permute.xlu0 %5952  ;;  %v5958_v29 = vpop.permute.xlu1 %5957 }
 0x3ef   :  { %v5955_v51 = vunpack.i.h.bf16 %v5953_v13  ;;  %v5954_v57 = vunpack.i.l.bf16 %v5953_v13  ;;  %v5960_v47 = vunpack.i.h.bf16 %v5958_v29  ;;  %v5959_v2 = vunpack.i.l.bf16 %v5958_v29 }
 0x3f1   :  { %v3443_v30 = vsel %vm3439_vm1, %v3429_v54, %v5955_v51  ;;  %v3442_v4 = vsel %vm3439_vm1, %v3428_v5, %v5954_v57  ;;  %v3417_v53 = vsel %vm3411_vm14, %v7880_v42, %v5960_v47  ;;  %v3416_v40 = vsel %vm3411_vm14, %v7878_v50, %v5959_v2 }
 0x3f2   :  { %v3454_v27 = vpack.c.bf16 %v3443_v30, %v3442_v4  ;;  %v5963_v63 = vpop.permute.xlu0 %5962 }
 0x3f3   :  { %v5965_v48 = vunpack.i.h.bf16 %v5963_v63  ;;  %v5964_v20 = vunpack.i.l.bf16 %v5963_v63 }
 0x3f4   :  { %5579 = vmatmul.mubr.msk.bf16.gmra.mxu0 %vm3508_vm5, %v3454_v27  ;;  %5586 = vmatmul.mubr.msk.bf16.gmra.mxu1 %vm3508_vm5, %v3454_v27 }
 0x3f5   :  { %3582 = vmatprep.mubr.bf16.mxu0 %v8789_v17  ;;  %3682 = vmatprep.mubr.bf16.mxu1 %v8789_v17  ;;  %v3431_v10 = vsel %vm3425_vm15, %v3417_v53, %v5965_v48  ;;  %v3430_v41 = vsel %vm3425_vm15, %v3416_v40, %v5964_v20 }
 0x3f6   :  { %v5968_v19 = vpop.permute.xlu1 %5967  ;;  %v5973_v22 = vpop.permute.xlu0 %5972 }
 0x3f7   :  { %v5970_v62 = vunpack.i.h.bf16 %v5968_v19  ;;  %v5969_v44 = vunpack.i.l.bf16 %v5968_v19  ;;  %v5975_v38 = vunpack.i.h.bf16 %v5973_v22  ;;  %v5974_v52 = vunpack.i.l.bf16 %v5973_v22 }
 0x3f9   :  { %v3445_v15 = vsel %vm3439_vm1, %v3431_v10, %v5970_v62  ;;  %v3444_v6 = vsel %vm3439_vm1, %v3430_v41, %v5969_v44  ;;  %v3419_v16 = vsel %vm3411_vm14, %v7884_v60, %v5975_v38  ;;  %v3418_v37 = vsel %vm3411_vm14, %v7882_v1, %v5974_v52 }
 0x3fa   :  { %v3455_v59 = vpack.c.bf16 %v3445_v15, %v3444_v6  ;;  %v5978_v26 = vpop.permute.xlu1 %5977 }
 0x3fb   :  { %v5980_v25 = vunpack.i.h.bf16 %v5978_v26  ;;  %v5979_v42 = vunpack.i.l.bf16 %v5978_v26 }
 0x3fc   :  { %5580 = vmatmul.mubr.msk.bf16.gmra.mxu0 %vm3508_vm5, %v3455_v59  ;;  %5587 = vmatmul.mubr.msk.bf16.gmra.mxu1 %vm3508_vm5, %v3455_v59 }
 0x3fd   :  { %3592 = vmatprep.mubr.bf16.mxu0 %v8789_v17  ;;  %3692 = vmatprep.mubr.bf16.mxu1 %v8789_v17  ;;  %v3433_v12 = vsel %vm3425_vm15, %v3419_v16, %v5980_v25  ;;  %v3432_v56 = vsel %vm3425_vm15, %v3418_v37, %v5979_v42 }
 0x3fe   :  { %v5983_v50 = vpop.permute.xlu0 %5982  ;;  %v5988_v31 = vpop.permute.xlu1 %5987 }
 0x3ff   :  { %v5985_v36 = vunpack.i.h.bf16 %v5983_v50  ;;  %v5984_v3 = vunpack.i.l.bf16 %v5983_v50  ;;  %v5990_v35 = vunpack.i.h.bf16 %v5988_v31  ;;  %v5989_v0 = vunpack.i.l.bf16 %v5988_v31 }
 0x401   :  { %v3447_v14 = vsel %vm3439_vm1, %v3433_v12, %v5985_v36  ;;  %v3446_v58 = vsel %vm3439_vm1, %v3432_v56, %v5984_v3  ;;  %v3421_v7 = vsel %vm3411_vm14, %v7890_v49, %v5990_v35  ;;  %v3420_v11 = vsel %vm3411_vm14, %v7886_v43, %v5989_v0 }
 0x402   :  { %v3456_v9 = vpack.c.bf16 %v3447_v14, %v3446_v58  ;;  %v5993_v61 = vpop.permute.xlu0 %5992  ;;  %v6180_v14 = vld [vmem:[%s8709_s10] sm:$0xff]  }
 0x403   :  { %v5995_v21 = vunpack.i.h.bf16 %v5993_v61  ;;  %v5994_v60 = vunpack.i.l.bf16 %v5993_v61 }
 0x404   :  { %5581 = vmatmul.mubr.msk.bf16.gmra.mxu0 %vm3508_vm5, %v3456_v9  ;;  %5588 = vmatmul.mubr.msk.bf16.gmra.mxu1 %vm3508_vm5, %v3456_v9 }
 0x405   :  { %3602 = vmatprep.mubr.bf16.mxu0 %v8789_v17  ;;  %3702 = vmatprep.mubr.bf16.mxu1 %v8789_v17  ;;  %v3435_v18 = vsel %vm3425_vm15, %v3421_v7, %v5995_v21  ;;  %v3434_v46 = vsel %vm3425_vm15, %v3420_v11, %v5994_v60 }
 0x406   :  { %v5998_v1 = vpop.permute.xlu1 %5997  ;;  %v6003_v28 = vpop.permute.xlu0 %6002 }
 0x407   :  { %v6000_v23 = vunpack.i.h.bf16 %v5998_v1  ;;  %v5999_v32 = vunpack.i.l.bf16 %v5998_v1  ;;  %v6005_v57 = vunpack.i.h.bf16 %v6003_v28  ;;  %v6004_v54 = vunpack.i.l.bf16 %v6003_v28 }
 0x409   :  { %v3449_v13 = vsel %vm3439_vm1, %v3435_v18, %v6000_v23  ;;  %v3448_v33 = vsel %vm3439_vm1, %v3434_v46, %v5999_v32  ;;  %v3423_v30 = vsel %vm3411_vm14, %v7898_v55, %v6005_v57  ;;  %v3422_v4 = vsel %vm3411_vm14, %v7894_v45, %v6004_v54 }
 0x40a   :  { %v3457_v24 = vpack.c.bf16 %v3449_v13, %v3448_v33  ;;  %v6008_v51 = vpop.permute.xlu1 %6007 }
 0x40b   :  { %v6010_v5 = vunpack.i.h.bf16 %v6008_v51  ;;  %v6009_v49 = vunpack.i.l.bf16 %v6008_v51 }
 0x40c   :  { %5582 = vmatmul.mubr.msk.bf16.gmra.mxu0 %vm3508_vm5, %v3457_v24  ;;  %5589 = vmatmul.mubr.msk.bf16.gmra.mxu1 %vm3508_vm5, %v3457_v24 }
 0x40d   :  { %3612 = vmatprep.mubr.bf16.mxu0 %v8789_v17  ;;  %3712 = vmatprep.mubr.bf16.mxu1 %v8789_v17  ;;  %v3437_v47 = vsel %vm3425_vm15, %v3423_v30, %v6010_v5  ;;  %v3436_v2 = vsel %vm3425_vm15, %v3422_v4, %v6009_v49 }
 0x40e   :  { %v3245_v43 = vpop.permute.xlu1 %3244  ;;  %v6013_v29 = vpop.permute.xlu0 %6012 }
 0x40f   :  { %v6015_v27 = vunpack.i.h.bf16 %v6013_v29  ;;  %v6014_v63 = vunpack.i.l.bf16 %v6013_v29  ;;  %v3424_v40 = vsel %vm3411_vm14, %v7904_v39, %v3245_v43 }
 0x411   :  { %v3451_v48 = vsel %vm3439_vm1, %v3437_v47, %v6015_v27  ;;  %v3450_v20 = vsel %vm3439_vm1, %v3436_v2, %v6014_v63 }
 0x412   :  { %v3458_v19 = vpack.c.bf16 %v3451_v48, %v3450_v20  ;;  %v3321_v53 = vpop.permute.xlu0 %3320  ;;  %v3397_v62 = vpop.permute.xlu1 %3396 }
 0x413   :  { %v3438_v55 = vsel %vm3425_vm15, %v3424_v40, %v3321_v53 }
 0x414   :  { %5583 = vmatmul.mubr.msk.bf16.gmra.mxu0 %vm3508_vm5, %v3458_v19  ;;  %5590 = vmatmul.mubr.msk.bf16.gmra.mxu1 %vm3508_vm5, %v3458_v19  ;;  %v3452_v45 = vsel %vm3439_vm1, %v3438_v55, %v3397_v62 }
 0x415   :  { %3622 = vmatprep.mubr.bf16.mxu0 %v8789_v17  ;;  %3722 = vmatprep.mubr.bf16.mxu1 %v8789_v17  ;;  %v3459_v44 = vpack.c.bf16 %v3452_v45, %v3452_v45 }
 0x41c   :  { %5584 = vmatmul.mubr.msk.bf16.gmra.mxu0 %vm3508_vm5, %v3459_v44  ;;  %5591 = vmatmul.mubr.msk.bf16.gmra.mxu1 %vm3508_vm5, %v3459_v44 }
 0x41d   :  { %4491 = vmatprep.mubr.bf16.mxu1 %v8789_v17  ;;  %5860 = vmatprep.mubr.msk.bf16.mxu0 %vm4168_vm8, %v6180_v14 }
 0x41f   :  { %v3890_v23 = vpop.permute.xlu0 %3889  ;;  %v3895_v48 = vpop.permute.xlu1 %3894 }
 0x423   :  { %v3900_v20 = vpop.permute.xlu0 %3899 }
 0x427   :  { %v3910_v14 = vpop.permute.xlu0 %3909 }
 0x4ac   :  { %v3564_v39 = vpop.f32.mrf.mxu0  ;;  %v3665_v10 = vpop.f32.mrf.mxu1 }
 0x4ad   :  { %v3809_v54 = vrot.slane %v3665_v10, 7 }
 0x4ae   :  { %v3566_v41 = vpop.f32.mrf.mxu0  ;;  %v3667_v22 = vpop.f32.mrf.mxu1 }
 0x4af   :  { %v3744_v9 = vrot.slane %v3566_v41, 1 }
 0x4b0   :  { %v3568_v15 = vpop.f32.mrf.mxu0  ;;  %v3668_v6 = vpop.f32.mrf.mxu1 }
 0x4b1   :  { %v3810_v32 = vrot.slane %v3668_v6, 7 }
 0x4b2   :  { %v3570_v59 = vpop.f32.mrf.mxu0  ;;  %v8295_v26 = vpop.f32.mrf.mxu1 }
 0x4b3   :  { %v3745_v12 = vrot.slane %v3570_v59, 1  ;;  %v3811_v27 = vsel %vm999_vm2, %v3809_v54, %v3810_v32 }
 0x4b4   :  { %v3574_v38 = vpop.f32.mrf.mxu0  ;;  %v3674_v52 = vpop.f32.mrf.mxu1 }
 0x4b5   :  { %v3812_v21 = vrot.slane %v3674_v52, 7  ;;  %v3746_v1 = vsel %vm870_vm3, %v3744_v9, %v3745_v12 }
 0x4b6   :  { %v3576_v25 = vpop.f32.mrf.mxu0  ;;  %v3676_v42 = vpop.f32.mrf.mxu1  ;;  %v3783_v33 = vadd.f32 %v3746_v1, %v3564_v39 }
 0x4b7   :  { %v3747_v37 = vrot.slane %v3576_v25, 1  ;;  %v3813_v5 = vsel %vm999_vm2, %v3810_v32, %v3812_v21 }
 0x4b8   :  { %v3578_v50 = vpop.f32.mrf.mxu0  ;;  %v3678_v16 = vpop.f32.mrf.mxu1  ;;  %v3847_v19 = vadd.f32 %v3811_v27, %v3783_v33 }
 0x4b9   :  { %v3748_v61 = vsel %vm870_vm3, %v3745_v12, %v3747_v37  ;;  %v3814_v24 = vrot.slane %v3678_v16, 7 }
 0x4ba   :  { %v3580_v36 = vpop.f32.mrf.mxu0  ;;  %v3680_v3 = vpop.f32.mrf.mxu1  ;;  %v3784_v18 = vadd.f32 %v3748_v61, %v3568_v15  ;;  %v3861_v52 = vadd.f32 %v3847_v19, %v8295_v26 }
 0x4bb   :  { %v3749_v58 = vrot.slane %v3580_v36, 1  ;;  %v3815_v53 = vsel %vm999_vm2, %v3812_v21, %v3814_v24 }
 0x4bc   :  { %v3584_v56 = vpop.f32.mrf.mxu0  ;;  %v8297_v31 = vpop.f32.mrf.mxu1  ;;  %v3848_v30 = vadd.f32 %v3813_v5, %v3784_v18  ;;  %v8321_v1 = vmul.f32 %v3890_v23, %v3861_v52 }
 0x4bd   :  { %v3750_v46 = vsel %vm870_vm3, %v3747_v37, %v3749_v58  ;;  %v3816_v4 = vrot.slane %v8297_v31, 7  ;;  %v3905_v31 = vpop.permute.xlu1 %3904 }
 0x4be   :  { %v3586_v35 = vpop.f32.mrf.mxu0  ;;  %v3686_v0 = vpop.f32.mrf.mxu1  ;;  %v3785_v49 = vadd.f32 %v3750_v46, %v3574_v38  ;;  %v3862_v39 = vadd.f32 %v3848_v30, %v3676_v42  ;;  %v3986_v30 = vmul.f32 %v8321_v1, %v8321_v1 }
 0x4bf   :  { %v3751_v60 = vrot.slane %v3586_v35, 1  ;;  %v3817_v10 = vsel %vm999_vm2, %v3814_v24, %v3816_v4 }
 0x4c0   :  { %v3588_v7 = vpop.f32.mrf.mxu0  ;;  %v3688_v11 = vpop.f32.mrf.mxu1  ;;  %v3849_v62 = vadd.f32 %v3815_v53, %v3785_v49  ;;  %v8317_v42 = vmul.f32 %v3895_v48, %v3862_v39 }
 0x4c1   :  { %v3752_v51 = vsel %vm870_vm3, %v3749_v58, %v3751_v60  ;;  %v3818_v41 = vrot.slane %v3688_v11, 7 }
 0x4c2   :  { %v3590_v28 = vpop.f32.mrf.mxu0  ;;  %v8306_v13 = vpop.f32.mrf.mxu1  ;;  %v3786_v63 = vadd.f32 %v3752_v51, %v3578_v50  ;;  %v3863_v16 = vadd.f32 %v3849_v62, %v3680_v3  ;;  %v3987_v33 = vmul.f32 %v8317_v42, %v8317_v42  ;;  %v3967_v53 = vadd.f32 %v8317_v42, %v8321_v1 }
 0x4c3   :  { %v3753_v57 = vrot.slane %v3590_v28, 1  ;;  %v3819_v58 = vsel %vm999_vm2, %v3816_v4, %v3818_v41 }
 0x4c4   :  { %v3594_v43 = vpop.f32.mrf.mxu0  ;;  %v3694_v29 = vpop.f32.mrf.mxu1  ;;  %v3850_v15 = vadd.f32 %v3817_v10, %v3786_v63  ;;  %v8324_v32 = vmul.f32 %v3900_v20, %v3863_v16 }
 0x4c5   :  { %v3754_v40 = vsel %vm870_vm3, %v3751_v60, %v3753_v57  ;;  %v3820_v25 = vrot.slane %v3694_v29, 7  ;;  %v3920_v29 = vpop.permute.xlu0 %3919 }
 0x4c6   :  { %v3596_v47 = vpop.f32.mrf.mxu0  ;;  %v3696_v2 = vpop.f32.mrf.mxu1  ;;  %v3787_v6 = vadd.f32 %v3754_v40, %v3584_v56  ;;  %v3864_v56 = vadd.f32 %v3850_v15, %v3686_v0  ;;  %v3999_v40 = vadd.f32 %v3987_v33, %v3986_v30 }
 0x4c7   :  { %v3755_v55 = vrot.slane %v3596_v47, 1  ;;  %v3821_v3 = vsel %vm999_vm2, %v3818_v41, %v3820_v25  ;;  %v3988_v47 = vmul.f32 %v8324_v32, %v8324_v32 }
 0x4c8   :  { %v3598_v45 = vpop.f32.mrf.mxu0  ;;  %v3698_v44 = vpop.f32.mrf.mxu1  ;;  %v3851_v35 = vadd.f32 %v3819_v58, %v3787_v6  ;;  %v8330_v51 = vmul.f32 %v3905_v31, %v3864_v56 }
 0x4c9   :  { %v3756_v22 = vsel %vm870_vm3, %v3753_v57, %v3755_v55  ;;  %v3822_v9 = vrot.slane %v3698_v44, 7  ;;  %v3930_v31 = vpop.permute.xlu0 %3929 }
 0x4ca   :  { %v3600_v59 = vpop.f32.mrf.mxu0  ;;  %v3700_v38 = vpop.f32.mrf.mxu1  ;;  %v3788_v37 = vadd.f32 %v3756_v22, %v3588_v7  ;;  %v3865_v23 = vadd.f32 %v3851_v35, %v8306_v13  ;;  %v3989_v62 = vmul.f32 %v8330_v51, %v8330_v51 }
 0x4cb   :  { %v3757_v50 = vrot.slane %v3600_v59, 1  ;;  %v3823_v0 = vsel %vm999_vm2, %v3820_v25, %v3822_v9  ;;  %v4000_v59 = vadd.f32 %v3999_v40, %v3988_v47 }
 0x4cc   :  { %v3604_v36 = vpop.f32.mrf.mxu0  ;;  %v3704_v12 = vpop.f32.mrf.mxu1  ;;  %v3852_v18 = vadd.f32 %v3821_v3, %v3788_v37 }
 0x4cd   :  { %v3758_v61 = vsel %vm870_vm3, %v3755_v55, %v3757_v50  ;;  %v3824_v7 = vrot.slane %v3704_v12, 7  ;;  %v3940_v30 = vpop.permute.xlu0 %3939 }
 0x4ce   :  { %v3789_v21 = vadd.f32 %v3758_v61, %v3594_v43  ;;  %v3606_v60 = vpop.f32.mrf.mxu0  ;;  %v3706_v26 = vpop.f32.mrf.mxu1  ;;  %v3866_v48 = vadd.f32 %v3852_v18, %v3696_v2  ;;  %v3968_v2 = vadd.f32 %v3967_v53, %v8324_v32 }
 0x4cf   :  { %v3759_v11 = vrot.slane %v3606_v60, 1  ;;  %v3915_v43 = vpop.permute.xlu1 %3914  ;;  %v3825_v4 = vsel %vm999_vm2, %v3822_v9, %v3824_v7 }
 0x4d0   :  { %v3608_v46 = vpop.f32.mrf.mxu0  ;;  %v3708_v28 = vpop.f32.mrf.mxu1  ;;  %v3853_v57 = vadd.f32 %v3823_v0, %v3789_v21  ;;  %v8347_v52 = vmul.f32 %v3915_v43, %v3866_v48 }
 0x4d1   :  { %v3760_v24 = vsel %vm870_vm3, %v3757_v50, %v3759_v11  ;;  %v3826_v27 = vrot.slane %v3708_v28, 7 }
 0x4d2   :  { %v3790_v54 = vadd.f32 %v3760_v24, %v3598_v45  ;;  %v3610_v5 = vpop.f32.mrf.mxu0  ;;  %v3710_v49 = vpop.f32.mrf.mxu1  ;;  %v8343_v45 = vmul.f32 %v3910_v14, %v3865_v23  ;;  %v3867_v44 = vadd.f32 %v3853_v57, %v3700_v38  ;;  %v3969_v38 = vadd.f32 %v3968_v2, %v8330_v51 }
 0x4d3   :  { %v3761_v63 = vrot.slane %v3610_v5, 1  ;;  %v3827_v22 = vsel %vm999_vm2, %v3824_v7, %v3826_v27  ;;  %v3925_v12 = vpop.permute.xlu1 %3924  ;;  %v4001_v14 = vadd.f32 %v4000_v59, %v3989_v62 }
 0x4d4   :  { %v3854_v20 = vadd.f32 %v3825_v4, %v3790_v54  ;;  %v3614_v19 = vpop.f32.mrf.mxu0  ;;  %v3714_v13 = vpop.f32.mrf.mxu1  ;;  %v3990_v58 = vmul.f32 %v8343_v45, %v8343_v45  ;;  %v8353_v9 = vmul.f32 %v3920_v29, %v3867_v44  ;;  %v3970_v7 = vadd.f32 %v3969_v38, %v8343_v45 }
 0x4d5   :  { %v3762_v55 = vsel %vm870_vm3, %v3759_v11, %v3761_v63  ;;  %v3828_v15 = vrot.slane %v3714_v13, 7  ;;  %v3991_v11 = vmul.f32 %v8347_v52, %v8347_v52 }
 0x4d6   :  { %v3791_v39 = vadd.f32 %v3762_v55, %v3604_v36  ;;  %v3616_v10 = vpop.f32.mrf.mxu0  ;;  %v3716_v41 = vpop.f32.mrf.mxu1  ;;  %v3868_v25 = vadd.f32 %v3854_v20, %v3706_v26  ;;  %v4002_v23 = vadd.f32 %v4001_v14, %v3990_v58  ;;  %v3971_v57 = vadd.f32 %v3970_v7, %v8347_v52 }
 0x4d7   :  { %v3763_v6 = vrot.slane %v3616_v10, 1  ;;  %v3829_v60 = vsel %vm999_vm2, %v3826_v27, %v3828_v15  ;;  %v3935_v29 = vpop.permute.xlu1 %3934  ;;  %v3992_v4 = vmul.f32 %v8353_v9, %v8353_v9 }
 0x4d8   :  { %v3855_v50 = vadd.f32 %v3827_v22, %v3791_v39  ;;  %v3618_v16 = vpop.f32.mrf.mxu0  ;;  %v3718_v37 = vpop.f32.mrf.mxu1  ;;  %v8359_v18 = vmul.f32 %v3925_v12, %v3868_v25  ;;  %v4003_v48 = vadd.f32 %v4002_v23, %v3991_v11  ;;  %v3972_v20 = vadd.f32 %v3971_v57, %v8353_v9 }
 0x4d9   :  { %v3764_v36 = vsel %vm870_vm3, %v3761_v63, %v3763_v6  ;;  %v3830_v26 = vrot.slane %v3718_v37, 7  ;;  %v3950_v12 = vpop.permute.xlu0 %3949 }
 0x4da   :  { %v3792_v61 = vadd.f32 %v3764_v36, %v3608_v46  ;;  %v3620_v56 = vpop.f32.mrf.mxu0  ;;  %v3720_v35 = vpop.f32.mrf.mxu1  ;;  %v3869_v21 = vadd.f32 %v3855_v50, %v3710_v49  ;;  %v3993_v13 = vmul.f32 %v8359_v18, %v8359_v18 }
 0x4db   :  { %v3765_v3 = vrot.slane %v3620_v56, 1  ;;  %v3831_v63 = vsel %vm999_vm2, %v3828_v15, %v3830_v26  ;;  %v4004_v15 = vadd.f32 %v4003_v48, %v3992_v4 }
 0x4dc   :  { %v3856_v28 = vadd.f32 %v3829_v60, %v3792_v61  ;;  %v3624_v33 = vpop.f32.mrf.mxu0  ;;  %v3724_v0 = vpop.f32.mrf.mxu1  ;;  %v8365_v27 = vmul.f32 %v3930_v31, %v3869_v21 }
 0x4dd   :  { %v3766_v24 = vsel %vm870_vm3, %v3763_v6, %v3765_v3  ;;  %v3832_v46 = vrot.slane %v3724_v0, 7  ;;  %v3973_v6 = vadd.f32 %v3972_v20, %v8359_v18  ;;  %v4005_v31 = vadd.f32 %v4004_v15, %v3993_v13  ;;  %v3966_v15 = vld [vmem:[%s8711_s8] sm:$0x1] }
 0x4de   :  { %v3870_v54 = vadd.f32 %v3856_v28, %v3716_v41  ;;  %v3793_v5 = vadd.f32 %v3766_v24, %v3614_v19  ;;  %v3626_v49 = vpop.f32.mrf.mxu0  ;;  %v3726_v43 = vpop.f32.mrf.mxu1  ;;  %v3994_v59 = vmul.f32 %v8365_v27, %v8365_v27 }
 0x4df   :  { %v3767_v47 = vrot.slane %v3626_v49, 1  ;;  %v3833_v62 = vsel %vm999_vm2, %v3830_v26, %v3832_v46  ;;  %v3974_v38 = vadd.f32 %v3973_v6, %v8365_v27  ;;  %v3860_v61 = vsel %vm314_vm0, %v3726_v43, 0.0 }
 0x4e0   :  { %v3857_v53 = vadd.f32 %v3831_v63, %v3793_v5  ;;  %v3628_v19 = vpop.f32.mrf.mxu0  ;;  %v3728_v40 = vpop.f32.mrf.mxu1  ;;  %v8371_v55 = vmul.f32 %v3935_v29, %v3870_v54  ;;  %v3846_v37 = vsel %vm1086_vm4, %v3833_v62, 0.0  ;;  %v4006_v56 = vadd.f32 %v4005_v31, %v3994_v59 }
 0x4e1   :  { %v3768_v44 = vsel %vm870_vm3, %v3765_v3, %v3767_v47  ;;  %v3782_v39 = vsel %vm999_vm2, %v3767_v47, 0.0 }
 0x4e2   :  { %v3871_v10 = vadd.f32 %v3857_v53, %v3720_v35  ;;  %v3795_v41 = vadd.f32 %v3782_v39, %v3624_v33  ;;  %v3629_v2 = vpop.f32.mrf.mxu0  ;;  %v3729_v22 = vpop.f32.mrf.mxu1  ;;  %v3794_v25 = vadd.f32 %v3768_v44, %v3618_v16  ;;  %v3995_v36 = vmul.f32 %v8371_v55, %v8371_v55 }
 0x4e3   :  { %v3975_v35 = vadd.f32 %v3974_v38, %v8371_v55  ;;  %v3945_v16 = vpop.permute.xlu1 %3944 }
 0x4e4   :  { %v3962_v50 = vmul.f32 %v3940_v30, %v3871_v10  ;;  %v3858_v14 = vadd.f32 %v3846_v37, %v3794_v25  ;;  %v3964_v58 = vmul.f32 %v3950_v12, %v3795_v41  ;;  %v4007_v26 = vadd.f32 %v4006_v56, %v3995_v36  ;;  %v3965_v41 = vld [vmem:[%s8710_s7] sm:$0x1]  ;;  %s6268_s7 = smov 48  }
 0x4e6   :  { %v3996_v21 = vmul.f32 %v3962_v50, %v3962_v50  ;;  %v3872_v60 = vadd.f32 %v3860_v61, %v3858_v14  ;;  %v3976_v3 = vadd.f32 %v3975_v35, %v3962_v50  ;;  %v3998_v11 = vmul.f32 %v3964_v58, %v3964_v58 }
 0x4e7   :  { %v3978_v24 = vsel %vm314_vm0, %v3964_v58, 0.0 }
 0x4e8   :  { %v3963_v7 = vmul.f32 %v3945_v16, %v3872_v60  ;;  %v4008_v28 = vadd.f32 %v4007_v26, %v3996_v21  ;;  %v4010_v57 = vsel %vm314_vm0, %v3998_v11, 0.0 }
 0x4ea   :  { %v3977_v33 = vadd.f32 %v3976_v3, %v3963_v7  ;;  %v3997_v0 = vmul.f32 %v3963_v7, %v3963_v7 }
 0x4ec   :  { %v3979_v46 = vadd.f32 %v3978_v24, %v3977_v33  ;;  %v4009_v23 = vadd.f32 %v4008_v28, %v3997_v0 }
 0x4ee   :  { %v3980_v54 = vrot.slane %v3979_v46, 4  ;;  %v4011_v5 = vadd.f32 %v4010_v57, %v4009_v23 }
 0x4f0   :  { %v3981_v49 = vadd.f32 %v3980_v54, %v3979_v46  ;;  %v4012_v43 = vrot.slane %v4011_v5, 4 }
 0x4f2   :  { %v3982_v29 = vrot.slane %v3981_v49, 2  ;;  %v4013_v30 = vadd.f32 %v4012_v43, %v4011_v5 }
 0x4f4   :  { %v3983_v4 = vadd.f32 %v3982_v29, %v3981_v49  ;;  %v4014_v63 = vrot.slane %v4013_v30, 2 }
 0x4f6   :  { %v3984_v47 = vrot.slane %v3983_v4, 1  ;;  %v4015_v48 = vadd.f32 %v4014_v63, %v4013_v30 }
 0x4f8   :  { %v3985_v20 = vadd.f32 %v3984_v47, %v3983_v4  ;;  %v4016_v13 = vrot.slane %v4015_v48, 1 }
 0x4fa   :  { %v4017_v53 = vadd.f32 %v4016_v13, %v4015_v48  ;;  %v4018_v19 = vmul.f32 0.013888889, %v3985_v20 }
 0x4fc   :  { %v4019_v40 = vmul.f32 0.013888889, %v4017_v53  ;;  %v4020_v62 = vmul.f32 %v4018_v19, %v4018_v19 }
 0x4fe   :  { %v4021_v44 = vsub.f32 %v4019_v40, %v4020_v62 }
 0x500   :  { %v4022_v39 = vmax.f32 %v4021_v44, 0.0 }
 0x502   :  { %v4023_v10 = vadd.f32 1e-05, %v4022_v39 }
 0x504   :  { %6250 = vrsqrt.f32 %v4023_v10 }
 0x511   :  { %v6251_v2 = vpop.eup %6250 }
 0x512   :  { %v4025_v22 = vmul.f32 %v6251_v2, %v3965_v41 }
 0x514   :  { %v4026_v6 = vmul.f32 %v4025_v22, %v4018_v19  ;;  %v4032_v59 = vrot.slane %v4025_v22, %v7367_v8 }
 0x516   :  { %v4027_v25 = vsub.f32 %v3966_v15, %v4026_v6  ;;  %v4045_v37 = vmul.f32 %v4032_v59, %v3963_v7  ;;  %v4046_v31 = vmul.f32 %v4032_v59, %v3964_v58  ;;  %v4044_v38 = vmul.f32 %v4032_v59, %v3962_v50 }
 0x517   :  { %v4042_v36 = vmul.f32 %v4032_v59, %v8365_v27  ;;  %v4043_v14 = vmul.f32 %v4032_v59, %v8371_v55  ;;  %v4040_v16 = vmul.f32 %v4032_v59, %v8353_v9  ;;  %v4041_v26 = vmul.f32 %v4032_v59, %v8359_v18 }
 0x518   :  { %v8395_v12 = vrot.slane %v4027_v25, %v7367_v8  ;;  %v4038_v50 = vmul.f32 %v4032_v59, %v8343_v45  ;;  %v4039_v45 = vmul.f32 %v4032_v59, %v8347_v52  ;;  %v4036_v29 = vmul.f32 %v4032_v59, %v8324_v32 }
 0x519   :  { %v4037_v52 = vmul.f32 %v4032_v59, %v8330_v51  ;;  %v4034_v53 = vmul.f32 %v4032_v59, %v8321_v1  ;;  %v4035_v19 = vmul.f32 %v4032_v59, %v8317_v42 }
 0x51a   :  { %v4065_v61 = vadd.f32 %v8395_v12, %v4046_v31  ;;  %v4063_v56 = vadd.f32 %v8395_v12, %v4044_v38  ;;  %v4064_v35 = vadd.f32 %v8395_v12, %v4045_v37  ;;  %v4061_v21 = vadd.f32 %v8395_v12, %v4042_v36  ;;  %v6181_v37 = vld [vmem:[%s8709_s10 + $0x8] sm:$0xff]   ;;  %v6183_v31 = vld [vmem:[%s8709_s10 + $0x18] sm:$0xff]   ;;  %v6184_v38 = vld [vmem:[%s8709_s10 + $0x20] sm:$0xff]  }
 0x51b   :  { %v4062_v60 = vadd.f32 %v8395_v12, %v4043_v14  ;;  %v4059_v3 = vadd.f32 %v8395_v12, %v4040_v16  ;;  %v4060_v7 = vadd.f32 %v8395_v12, %v4041_v26  ;;  %v4057_v18 = vadd.f32 %v8395_v12, %v4038_v50  ;;  %v6185_v36 = vld [vmem:[%s8709_s10 + $0x28] sm:$0xff]   ;;  %v6186_v14 = vld [vmem:[%s8709_s10 + $0x30] sm:$0xff]  }
 0x51c   :  { %vm4078_vm10 = vcmp.ge.f32.partialorder %v4065_v61, 0.0  ;;  %v4091_v27 = vmul.f32 0.2, %v4065_v61  ;;  %vm4076_vm11 = vcmp.ge.f32.partialorder %v4063_v56, 0.0  ;;  %vm4077_vm12 = vcmp.ge.f32.partialorder %v4064_v35, 0.0 }
 0x51d   :  { %v4089_v55 = vmul.f32 0.2, %v4063_v56  ;;  %v4090_v58 = vmul.f32 0.2, %v4064_v35  ;;  %vm4074_vm13 = vcmp.ge.f32.partialorder %v4061_v21, 0.0  ;;  %vm4075_vm9 = vcmp.ge.f32.partialorder %v4062_v60, 0.0 }
 0x51e   :  { %v4104_v11 = vsel %vm4078_vm10, %v4065_v61, %v4091_v27  ;;  %v4087_v28 = vmul.f32 0.2, %v4061_v21  ;;  %v4088_v33 = vmul.f32 0.2, %v4062_v60  ;;  %vm4072_vm14 = vcmp.ge.f32.partialorder %v4059_v3, 0.0  ;;  %v6187_v61 = vld [vmem:[%s8709_s10 + $0x38] sm:$0xff]  }
 0x51f   :  { %v4127_v0 = vpack.c.bf16 %v4104_v11, %v4104_v11  ;;  %v4102_v9 = vsel %vm4076_vm11, %v4063_v56, %v4089_v55  ;;  %v4103_v24 = vsel %vm4077_vm12, %v4064_v35, %v4090_v58  ;;  %v4085_v57 = vmul.f32 0.2, %v4059_v3  ;;  %v6188_v16 = vld [vmem:[%s8712_s11 + $0x60] ss:$16 sps:$4 sm:$0xff]   ;;  %v6190_v50 = vld [vmem:[%s8712_s11 + $0x64] ss:$16 sps:$4 sm:$0xff]  }
 0x520   :  { %v4126_v23 = vpack.c.bf16 %v4103_v24, %v4102_v9  ;;  %v4100_v54 = vsel %vm4074_vm13, %v4061_v21, %v4087_v28  ;;  %v4101_v5 = vsel %vm4075_vm9, %v4062_v60, %v4088_v33  ;;  %v4086_v49 = vmul.f32 0.2, %v4060_v7  ;;  %4467 = vmatprep.subr.bf16.mxu1 %v6190_v50  ;;  %v6196_v9 = vld [vmem:[%s8712_s11 + $0x24] ss:$16 sps:$4 sm:$0xff]  }
 0x521   :  { %5914 = vmatprep.subr.msk.bf16.mxu0 %vm999_vm2, %v4127_v0  ;;  %v4194_v46 = vsel %vm999_vm2, %v4127_v0, 0  ;;  %v4058_v43 = vadd.f32 %v8395_v12, %v4039_v45  ;;  %vm4073_vm1 = vcmp.ge.f32.partialorder %v4060_v7, 0.0  ;;  %v4125_v30 = vpack.c.bf16 %v4101_v5, %v4100_v54  ;;  %4468 = vmatpush1.bf16.msra.mxu1 %v6188_v16  ;;  %v6194_v0 = vld [vmem:[%s8712_s11 + $0x20] ss:$16 sps:$4 sm:$0xff]  }
 0x522   :  { %5847 = vmatpush3.bf16.msra.mxu0 %v4194_v46  ;;  %v4098_v4 = vsel %vm4072_vm14, %v4059_v3, %v4085_v57  ;;  %v4083_v63 = vmul.f32 0.2, %v4057_v18  ;;  %v4055_v47 = vadd.f32 %v8395_v12, %v4036_v29  ;;  %v4099_v48 = vsel %vm4073_vm1, %v4060_v7, %v4086_v49  ;;  %v6191_v3 = vld [vmem:[%s8712_s11 + $0x40] ss:$16 sps:$4 sm:$0xff]   ;;  %v6193_v7 = vld [vmem:[%s8712_s11 + $0x44] ss:$16 sps:$4 sm:$0xff]  }
 0x523   :  { %5848 = vmatprep.subr.bf16.mxu0 %v4126_v23  ;;  %vm4070_vm10 = vcmp.ge.f32.partialorder %v4057_v18, 0.0  ;;  %v4084_v20 = vmul.f32 0.2, %v4058_v43  ;;  %v4056_v13 = vadd.f32 %v8395_v12, %v4037_v52  ;;  %vm4071_vm11 = vcmp.ge.f32.partialorder %v4058_v43, 0.0  ;;  %4469 = vmatprep.subr.bf16.mxu1 %v6193_v7  ;;  %v6197_v46 = vld [vmem:[%s8712_s11] ss:$16 sps:$4 sm:$0xff]  }
 0x524   :  { %v4124_v32 = vpack.c.bf16 %v4099_v48, %v4098_v4  ;;  %v4096_v40 = vsel %vm4070_vm10, %v4057_v18, %v4083_v63  ;;  %v4081_v51 = vmul.f32 0.2, %v4055_v47  ;;  %v4053_v39 = vadd.f32 %v8395_v12, %v4034_v53  ;;  %v4626_v4 = vld [vmem:[%s8713_s14 + $0x8] sm:$0xff]  ;;  %v4625_v48 = vld [vmem:[%s8713_s14] sm:$0xff] }
 0x525   :  { %v4097_v62 = vsel %vm4071_vm11, %v4058_v43, %v4084_v20  ;;  %v4082_v44 = vmul.f32 0.2, %v4056_v13  ;;  %v4054_v10 = vadd.f32 %v8395_v12, %v4035_v19  ;;  %vm4068_vm12 = vcmp.ge.f32.partialorder %v4055_v47, 0.0  ;;  %v6182_v12 = vld [vmem:[%s8709_s10 + $0x10] sm:$0xff]   ;;  %4470 = vmatpush1.bf16.msra.mxu1 %v6191_v3  ;;  %v6202_v43 = vld [vmem:[%s8712_s11 + $0x6c] ss:$16 sps:$4 sm:$0xff]  }
 0x526   :  { %5849 = vmatpush3.bf16.msra.mxu0 %v4126_v23  ;;  %vm4069_vm13 = vcmp.ge.f32.partialorder %v4056_v13, 0.0  ;;  %v4123_v41 = vpack.c.bf16 %v4097_v62, %v4096_v40  ;;  %v4094_v2 = vsel %vm4068_vm12, %v4055_v47, %v4081_v51  ;;  %v4079_v1 = vmul.f32 0.2, %v4053_v39  ;;  %4471 = vmatprep.subr.bf16.mxu1 %v6196_v9  ;;  %v6199_v23 = vld [vmem:[%s8712_s11 + $0x4] ss:$16 sps:$4 sm:$0xff]   ;;  %v4628_v47 = vld [vmem:[%s8713_s14 + $0x18] sm:$0xff] }
 0x527   :  { %5850 = vmatprep.subr.bf16.mxu0 %v4125_v30  ;;  %v4095_v22 = vsel %vm4069_vm13, %v4056_v13, %v4082_v44  ;;  %v4080_v15 = vmul.f32 0.2, %v4054_v10  ;;  %vm4066_vm9 = vcmp.ge.f32.partialorder %v4053_v39, 0.0  ;;  %vm4067_vm14 = vcmp.ge.f32.partialorder %v4054_v10, 0.0  ;;  %v4627_v20 = vld [vmem:[%s8713_s14 + $0x10] sm:$0xff] }
 0x528   :  { %v4122_v42 = vpack.c.bf16 %v4095_v22, %v4094_v2  ;;  %v4092_v6 = vsel %vm4066_vm9, %v4053_v39, %v4079_v1  ;;  %vm4452_vm1 = vcmask 523264   ;;  %v6211_v7 = vld [vmem:[%s8712_s11 + $0xc] ss:$16 sps:$4 sm:$0xff]  }
 0x529   :  { %v4093_v59 = vsel %vm4067_vm14, %v4054_v10, %v4080_v15  ;;  %4472 = vmatpush1.bf16.msra.mxu1 %v6194_v0 }
 0x52a   :  { %5851 = vmatpush3.bf16.msra.mxu0 %v4125_v30  ;;  %v4121_v25 = vpack.c.bf16 %v4093_v59, %v4092_v6  ;;  %4473 = vmatprep.subr.bf16.mxu1 %v6199_v23 }
 0x52b   :  { %5852 = vmatprep.subr.bf16.mxu0 %v4124_v32 }
 0x52d   :  { %4474 = vmatpush1.bf16.msra.mxu1 %v6197_v46 }
 0x52e   :  { %5853 = vmatpush3.bf16.msra.mxu0 %v4124_v32  ;;  %4520 = vmatprep.subr.bf16.mxu1 %v6202_v43 }
 0x52f   :  { %5854 = vmatprep.subr.bf16.mxu0 %v4123_v41 }
 0x532   :  { %5855 = vmatpush3.bf16.msra.mxu0 %v4123_v41 }
 0x533   :  { %5856 = vmatprep.subr.bf16.mxu0 %v4122_v42 }
 0x536   :  { %5857 = vmatpush3.bf16.msra.mxu0 %v4122_v42 }
 0x537   :  { %5858 = vmatprep.subr.bf16.mxu0 %v4121_v25 }
 0x53a   :  { %5859 = vmatpush3.bf16.msra.mxu0 %v4121_v25  ;;  %v6200_v25 = vld [vmem:[%s8712_s11 + $0x68] ss:$16 sps:$4 sm:$0xff]  }
 0x53d   :  { %5861 = vmatmul.mubr.msk.bf16.vlgmr.msra.gmra.mxu0 %vm4168_vm8, %v6181_v37 }
 0x53e   :  { %5864 = vmatprep.mubr.msk.bf16.mxu0 %vm4168_vm8, %v6182_v12 }
 0x545   :  { %5865 = vmatmul.mubr.msk.bf16.gmra.mxu0 %vm4168_vm8, %v6183_v31 }
 0x546   :  { %5868 = vmatprep.mubr.msk.bf16.mxu0 %vm4168_vm8, %v6184_v38  ;;  %v6205_v38 = vld [vmem:[%s8712_s11 + $0x4c] ss:$16 sps:$4 sm:$0xff]  }
 0x54d   :  { %5869 = vmatmul.mubr.msk.bf16.gmra.mxu0 %vm4168_vm8, %v6185_v36 }
 0x54e   :  { %5872 = vmatprep.mubr.msk.bf16.mxu0 %vm4168_vm8, %v6186_v14 }
 0x555   :  { %5873 = vmatmul.mubr.msk.bf16.gmra.mxu0 %vm4168_vm8, %v6187_v61  ;;  %vm4349_vm8 = vcmask 392192  }
 0x5fd   :  { %v8450_v56 = vpop.f32.mrf.mxu0 }
 0x5ff   :  { %v8452_v35 = vpop.f32.mrf.mxu0 }
 0x601   :  { %v8454_v21 = vpop.f32.mrf.mxu0 }
 0x603   :  { %v8456_v60 = vpop.f32.mrf.mxu0 }
 0x605   :  { %v5866_v26 = vpop.f32.mrf.mxu0 }
 0x607   :  { %v4246_v27 = vpop.f32.mrf.mxu0 }
 0x609   :  { %v5867_v55 = vpop.f32.mrf.mxu0 }
 0x60a   :  { %v6031_v5 = vpack.i.bf16 %v5867_v55, %v5866_v26 }
 0x60b   :  { %v4249_v58 = vpop.f32.mrf.mxu0 }
 0x60c   :  { %v6016_v11 = vpack.i.bf16 %v4249_v58, %v4246_v27  ;;  %v6203_v27 = vld [vmem:[%s8712_s11 + $0x48] ss:$16 sps:$4 sm:$0xff]  }
 0x60d   :  { %v5870_v28 = vpop.f32.mrf.mxu0  ;;  %v6206_v58 = vld [vmem:[%s8712_s11 + $0x28] ss:$16 sps:$4 sm:$0xff]  }
 0x60e   :  { %6017 = vrot.lane.b32.xlu1 %v6016_v11, %s6265_s28  ;;  %v6209_v11 = vld [vmem:[%s8712_s11 + $0x8] ss:$16 sps:$4 sm:$0xff]  }
 0x60f   :  { %v4262_v33 = vpop.f32.mrf.mxu0 }
 0x611   :  { %v5871_v24 = vpop.f32.mrf.mxu0 }
 0x612   :  { %v6036_v63 = vpack.i.bf16 %v5871_v24, %v5870_v28  ;;  %v6212_v28 = vld [vmem:[%s8714_s15] sm:$0xff]  }
 0x613   :  { %v4265_v45 = vpop.f32.mrf.mxu0  ;;  %5880 = vmatprep.mubr.msk.bf16.mxu0 %vm3508_vm5, %v6212_v28 }
 0x614   :  { %v6021_v18 = vpack.i.bf16 %v4265_v45, %v4262_v33 }
 0x615   :  { %v5874_v57 = vpop.f32.mrf.mxu0 }
 0x616   :  { %6022 = vrot.lane.b32.xlu0 %v6021_v18, %s6267_s9 }
 0x617   :  { %v4278_v54 = vpop.f32.mrf.mxu0 }
 0x619   :  { %v5875_v49 = vpop.f32.mrf.mxu0 }
 0x61a   :  { %6032 = vrot.lane.b32.xlu0 %v6031_v5, %s6265_s28  ;;  %v6041_v52 = vpack.i.bf16 %v5875_v49, %v5874_v57 }
 0x61b   :  { %v4281_v29 = vpop.f32.mrf.mxu0 }
 0x61c   :  { %v6026_v30 = vpack.i.bf16 %v4281_v29, %v4278_v54 }
 0x61e   :  { %6042 = vrot.lane.b32.xlu0 %v6041_v52, %s6268_s7  ;;  %6027 = vrot.lane.b32.xlu1 %v6026_v30, %s6268_s7 }
 0x622   :  { %4636 = vperm.xlu0 %5924, %v4626_v4   ;;  %6037 = vrot.lane.b32.xlu1 %v6036_v63, %s6267_s9 }
 0x626   :  { %4646 = vperm.xlu0 %5924, %v4628_v47   ;;  %4631 = vperm.xlu1 %5925, %v4625_v48  }
 0x62a   :  { %4641 = vperm.xlu1 %5925, %v4627_v20  }
 0x680   :  { %v6018_v53 = vpop.permute.xlu1 %6017 }
 0x681   :  { %v6020_v19 = vunpack.i.h.bf16 %v6018_v53  ;;  %v6019_v32 = vunpack.i.l.bf16 %v6018_v53 }
 0x683   :  { %v4342_v39 = vsel %vm3425_vm15, %v8456_v60, %v6020_v19  ;;  %v4341_v10 = vsel %vm3425_vm15, %v8452_v35, %v6019_v32 }
 0x688   :  { %v6023_v13 = vpop.permute.xlu0 %6022 }
 0x689   :  { %v6025_v40 = vunpack.i.h.bf16 %v6023_v13  ;;  %v6024_v51 = vunpack.i.l.bf16 %v6023_v13 }
 0x68b   :  { %v4346_v22 = vsel %vm3508_vm5, %v4342_v39, %v6025_v40  ;;  %v4345_v1 = vsel %vm3508_vm5, %v4341_v10, %v6024_v51 }
 0x68c   :  { %v6033_v62 = vpop.permute.xlu0 %6032 }
 0x68d   :  { %v6035_v15 = vunpack.i.h.bf16 %v6033_v62  ;;  %v6034_v42 = vunpack.i.l.bf16 %v6033_v62 }
 0x68f   :  { %v4344_v61 = vsel %vm3425_vm15, %v8454_v21, %v6035_v15  ;;  %v4343_v35 = vsel %vm3425_vm15, %v8450_v56, %v6034_v42  ;;  %v6208_v56 = vld [vmem:[%s8712_s11 + $0x2c] ss:$16 sps:$4 sm:$0xff]  }
 0x690   :  { %v6028_v44 = vpop.permute.xlu1 %6027  ;;  %v6043_v31 = vpop.permute.xlu0 %6042 }
 0x691   :  { %v6030_v41 = vunpack.i.h.bf16 %v6028_v44  ;;  %v6029_v2 = vunpack.i.l.bf16 %v6028_v44  ;;  %v6045_v26 = vunpack.i.h.bf16 %v6043_v31  ;;  %v6044_v50 = vunpack.i.l.bf16 %v6043_v31 }
 0x693   :  { %v4351_v6 = vsel %vm4349_vm8, %v4346_v22, %v6030_v41  ;;  %v4350_v59 = vsel %vm4349_vm8, %v4345_v1, %v6029_v2 }
 0x694   :  { %v4354_v37 = vpack.c.bf16 %v4351_v6, %v4350_v59  ;;  %v6038_v12 = vpop.permute.xlu1 %6037 }
 0x695   :  { %v6040_v36 = vunpack.i.h.bf16 %v6038_v12  ;;  %v6039_v14 = vunpack.i.l.bf16 %v6038_v12 }
 0x696   :  { %5624 = vmatmul.mubr.msk.bf16.vlgmr.msra.gmra.mxu1 %vm4452_vm1, %v4354_v37 }
 0x697   :  { %v4348_v60 = vsel %vm3508_vm5, %v4344_v61, %v6040_v36  ;;  %v4347_v16 = vsel %vm3508_vm5, %v4343_v35, %v6039_v14  ;;  %4521 = vmatpush1.bf16.msra.mxu1 %v6200_v25  ;;  %4501 = vmatprep.mubr.bf16.mxu1 %v8789_v17 }
 0x698   :  { %4522 = vmatprep.subr.bf16.mxu1 %v6205_v38  ;;  %v4352_v21 = vsel %vm4349_vm8, %v4347_v16, %v6044_v50  ;;  %v4353_v55 = vsel %vm4349_vm8, %v4348_v60, %v6045_v26 }
 0x699   :  { %v4355_v3 = vpack.c.bf16 %v4353_v55, %v4352_v21 }
 0x69b   :  { %4523 = vmatpush1.bf16.msra.mxu1 %v6203_v27 }
 0x69c   :  { %4524 = vmatprep.subr.bf16.mxu1 %v6208_v56 }
 0x69d   :  { %v4637_v6 = vpop.permute.xlu0 %4636 }
 0x69e   :  { %5625 = vmatmul.mubr.msk.bf16.gmra.mxu1 %vm4452_vm1, %v4355_v3 }
 0x69f   :  { %4525 = vmatpush1.bf16.msra.mxu1 %v6206_v58  ;;  %4544 = vmatprep.mubr.bf16.mxu1 %v8789_v17 }
 0x6a0   :  { %4526 = vmatprep.subr.bf16.mxu1 %v6211_v7 }
 0x6a1   :  { %v4632_v59 = vpop.permute.xlu1 %4631 }
 0x6a3   :  { %4527 = vmatpush1.bf16.msra.mxu1 %v6209_v11 }
 0x6a5   :  { %v4642_v7 = vpop.permute.xlu1 %4641 }
 0x6a6   :  { %5626 = vmatmul.mubr.msk.bf16.vlgmr.msra.gmra.mxu1 %vm4452_vm1, %v4354_v37 }
 0x6a7   :  { %4554 = vmatprep.mubr.bf16.mxu1 %v8789_v17 }
 0x6ae   :  { %5627 = vmatmul.mubr.msk.bf16.gmra.mxu1 %vm4452_vm1, %v4355_v3  ;;  %v4647_v3 = vpop.permute.xlu0 %4646 }
 0x6af   :  { %4938 = vmatprep.mubr.bf16.mxu1 %v8789_v17 }
 0x756   :  { %v4493_v33 = vpop.f32.mrf.mxu1 }
 0x758   :  { %v4495_v0 = vpop.f32.mrf.mxu1 }
 0x759   :  { %v4569_v5 = vrot.slane %v4495_v0, 1 }
 0x75a   :  { %v4497_v9 = vpop.f32.mrf.mxu1 }
 0x75c   :  { %v4499_v24 = vpop.f32.mrf.mxu1 }
 0x75d   :  { %v4570_v57 = vrot.slane %v4499_v24, 1 }
 0x75e   :  { %v4503_v45 = vpop.f32.mrf.mxu1 }
 0x75f   :  { %v4571_v29 = vsel %vm870_vm3, %v4569_v5, %v4570_v57 }
 0x760   :  { %v4505_v18 = vpop.f32.mrf.mxu1  ;;  %v4581_v63 = vadd.f32 %v4571_v29, %v4493_v33 }
 0x761   :  { %v4572_v49 = vrot.slane %v4505_v18, 1 }
 0x762   :  { %v4507_v46 = vpop.f32.mrf.mxu1 }
 0x763   :  { %v4573_v47 = vsel %vm870_vm3, %v4570_v57, %v4572_v49 }
 0x764   :  { %v4509_v23 = vpop.f32.mrf.mxu1  ;;  %v4582_v44 = vadd.f32 %v4573_v47, %v4497_v9 }
 0x765   :  { %v4574_v20 = vrot.slane %v4509_v23, 1 }
 0x766   :  { %v4546_v54 = vpop.f32.mrf.mxu1 }
 0x767   :  { %v4589_v30 = vrot.slane %v4546_v54, 4  ;;  %v4575_v10 = vsel %vm870_vm3, %v4572_v49, %v4574_v20  ;;  %v4580_v41 = vsel %vm870_vm3, %v4574_v20, 0.0 }
 0x768   :  { %v4548_v43 = vpop.f32.mrf.mxu1  ;;  %v4583_v12 = vadd.f32 %v4575_v10, %v4503_v45  ;;  %v4584_v31 = vadd.f32 %v4580_v41, %v4507_v46  ;;  %v4654_v10 = vld [vmem:[%s8716_s13] sm:$0x1] }
 0x769   :  { %v4609_v13 = vrot.slane %v4548_v43, 5 }
 0x76a   :  { %v4550_v52 = vpop.f32.mrf.mxu1 }
 0x76b   :  { %v4590_v4 = vrot.slane %v4550_v52, 4 }
 0x76c   :  { %v4552_v48 = vpop.f32.mrf.mxu1 }
 0x76d   :  { %v4591_v53 = vsel %vm1422_vm6, %v4589_v30, %v4590_v4  ;;  %v4610_v19 = vrot.slane %v4552_v48, 5 }
 0x76e   :  { %v4601_v32 = vadd.f32 %v4591_v53, %v4581_v63  ;;  %v4556_v40 = vpop.f32.mrf.mxu1 }
 0x76f   :  { %v4611_v51 = vsel %vm1086_vm4, %v4609_v13, %v4610_v19  ;;  %v4592_v62 = vrot.slane %v4556_v40, 4 }
 0x770   :  { %v4558_v39 = vpop.f32.mrf.mxu1  ;;  %v4621_v1 = vadd.f32 %v4611_v51, %v4601_v32 }
 0x771   :  { %v4593_v2 = vsel %vm1422_vm6, %v4590_v4, %v4592_v62  ;;  %v4612_v22 = vrot.slane %v4558_v39, 5 }
 0x772   :  { %v4602_v15 = vadd.f32 %v4593_v2, %v4582_v44  ;;  %v4560_v42 = vpop.f32.mrf.mxu1  ;;  %v4649_v60 = vmul.f32 %v4632_v59, %v4621_v1 }
 0x773   :  { %v4613_v25 = vsel %vm1086_vm4, %v4610_v19, %v4612_v22  ;;  %v4594_v37 = vrot.slane %v4560_v42, 4 }
 0x774   :  { %v4622_v38 = vadd.f32 %v4613_v25, %v4602_v15  ;;  %v4562_v36 = vpop.f32.mrf.mxu1  ;;  %v4664_v11 = vmul.f32 %v4649_v60, %v4649_v60 }
 0x775   :  { %v4595_v14 = vsel %vm1422_vm6, %v4592_v62, %v4594_v37  ;;  %v4600_v61 = vsel %vm1422_vm6, %v4594_v37, 0.0  ;;  %v4614_v35 = vrot.slane %v4562_v36, 5  ;;  %v4653_v62 = vld [vmem:[%s8715_s12] sm:$0x1] }
 0x776   :  { %v4650_v16 = vmul.f32 %v4637_v6, %v4622_v38  ;;  %v4603_v26 = vadd.f32 %v4595_v14, %v4583_v12  ;;  %v4604_v50 = vadd.f32 %v4600_v61, %v4584_v31 }
 0x777   :  { %v4615_v27 = vsel %vm1086_vm4, %v4612_v22, %v4614_v35  ;;  %v4620_v56 = vsel %vm1086_vm4, %v4614_v35, 0.0 }
 0x778   :  { %v4665_v21 = vmul.f32 %v4650_v16, %v4650_v16  ;;  %v4623_v55 = vadd.f32 %v4615_v27, %v4603_v26  ;;  %v4624_v58 = vadd.f32 %v4620_v56, %v4604_v50  ;;  %v4655_v28 = vadd.f32 %v4650_v16, %v4649_v60 }
 0x77a   :  { %v4651_v33 = vmul.f32 %v4642_v7, %v4623_v55  ;;  %v4652_v0 = vmul.f32 %v4647_v3, %v4624_v58  ;;  %v4668_v9 = vadd.f32 %v4665_v21, %v4664_v11  ;;  %v6214_v21 = vld [vmem:[%s8717_s16 + $0x48] ss:$36 sps:$4 sm:$0xff]   ;;  %v6217_v58 = vld [vmem:[%s8717_s16] ss:$36 sps:$4 sm:$0xff]   ;;  %v6220_v7 = vld [vmem:[%s8717_s16 + $0x50] ss:$36 sps:$4 sm:$0xff]  }
 0x77b   :  { %v6216_v55 = vld [vmem:[%s8717_s16 + $0x4c] ss:$36 sps:$4 sm:$0xff]   ;;  %v6219_v3 = vld [vmem:[%s8717_s16 + $0x4] ss:$36 sps:$4 sm:$0xff]   ;;  %v6222_v11 = vld [vmem:[%s8717_s16 + $0x54] ss:$36 sps:$4 sm:$0xff]  }
 0x77c   :  { %v4656_v24 = vadd.f32 %v4655_v28, %v4651_v33  ;;  %v4666_v45 = vmul.f32 %v4651_v33, %v4651_v33  ;;  %v4667_v46 = vmul.f32 %v4652_v0, %v4652_v0  ;;  %4918 = vmatprep.subr.bf16.mxu1 %v6216_v55  ;;  %v6225_v28 = vld [vmem:[%s8717_s16 + $0xc] ss:$36 sps:$4 sm:$0xff]  }
 0x77d   :  { %4919 = vmatpush1.bf16.msra.mxu1 %v6214_v21 }
 0x77e   :  { %v4657_v18 = vadd.f32 %v4656_v24, %v4652_v0  ;;  %v4669_v23 = vadd.f32 %v4668_v9, %v4666_v45  ;;  %4920 = vmatprep.subr.bf16.mxu1 %v6219_v3  ;;  %v6234_v9 = vld [vmem:[%s8717_s16 + $0x64] ss:$36 sps:$4 sm:$0xff]  }
 0x780   :  { %v4658_v57 = vrot.slane %v4657_v18, 4  ;;  %v4670_v54 = vadd.f32 %v4669_v23, %v4667_v46  ;;  %v6226_v23 = vld [vmem:[%s8717_s16 + $0x58] ss:$36 sps:$4 sm:$0xff]  }
 0x781   :  { %4921 = vmatpush1.bf16.msra.mxu1 %v6217_v58 }
 0x782   :  { %v4659_v5 = vadd.f32 %v4658_v57, %v4657_v18  ;;  %v4671_v49 = vrot.slane %v4670_v54, 4 }
 0x784   :  { %v4660_v43 = vrot.slane %v4659_v5, 2  ;;  %v4672_v29 = vadd.f32 %v4671_v49, %v4670_v54  ;;  %v6231_v54 = vld [vmem:[%s8717_s16 + $0x14] ss:$36 sps:$4 sm:$0xff]   ;;  %v6237_v49 = vld [vmem:[%s8717_s16 + $0x1c] ss:$36 sps:$4 sm:$0xff]  }
 0x786   :  { %v4661_v52 = vadd.f32 %v4660_v43, %v4659_v5  ;;  %v4673_v30 = vrot.slane %v4672_v29, 2  ;;  %v6232_v5 = vld [vmem:[%s8717_s16 + $0x60] ss:$36 sps:$4 sm:$0xff]   ;;  %v6229_v43 = vld [vmem:[%s8717_s16 + $0x10] ss:$36 sps:$4 sm:$0xff]  }
 0x788   :  { %v4662_v4 = vrot.slane %v4661_v52, 1  ;;  %v4674_v63 = vadd.f32 %v4673_v30, %v4672_v29  ;;  %v6238_v29 = vld [vmem:[%s8717_s16 + $0x68] ss:$36 sps:$4 sm:$0xff]  }
 0x78a   :  { %v4663_v47 = vadd.f32 %v4662_v4, %v4661_v52  ;;  %v4675_v48 = vrot.slane %v4674_v63, 1  ;;  %v6235_v52 = vld [vmem:[%s8717_s16 + $0x18] ss:$36 sps:$4 sm:$0xff]   ;;  %v6239_v4 = vld [vmem:[%s8717_s16 + $0x20] ss:$36 sps:$4 sm:$0xff]  }
 0x78c   :  { %v4676_v20 = vadd.f32 %v4675_v48, %v4674_v63  ;;  %v4677_v13 = vmul.f32 0.055555556, %v4663_v47  ;;  %v6240_v63 = vld [vmem:[%s8718_s19 + $0x38] sm:$0xff]   ;;  %v6242_v47 = vld [vmem:[%s8718_s19 + $0x28] sm:$0xff]   ;;  %v6243_v48 = vld [vmem:[%s8718_s19 + $0x20] sm:$0xff]  }
 0x78e   :  { %v4678_v53 = vmul.f32 0.055555556, %v4676_v20  ;;  %v4679_v19 = vmul.f32 %v4677_v13, %v4677_v13  ;;  %v6244_v20 = vld [vmem:[%s8718_s19 + $0x18] sm:$0xff]  }
 0x790   :  { %v4680_v32 = vsub.f32 %v4678_v53, %v4679_v19  ;;  %v6246_v53 = vld [vmem:[%s8718_s19 + $0x8] sm:$0xff]   ;;  %v6247_v19 = vld [vmem:[%s8718_s19] sm:$0xff]  }
 0x792   :  { %v4681_v40 = vmax.f32 %v4680_v32, 0.0 }
 0x794   :  { %v4682_v51 = vadd.f32 1e-05, %v4681_v40 }
 0x796   :  { %6252 = vrsqrt.f32 %v4682_v51 }
 0x7a3   :  { %v6253_v44 = vpop.eup %6252 }
 0x7a4   :  { %v4684_v39 = vmul.f32 %v6253_v44, %v4653_v62 }
 0x7a6   :  { %v4685_v41 = vmul.f32 %v4684_v39, %v4677_v13  ;;  %v4691_v2 = vrot.slane %v4684_v39, %v7367_v8  ;;  %v6245_v13 = vld [vmem:[%s8718_s19 + $0x10] sm:$0xff]  }
 0x7a8   :  { %v4686_v22 = vsub.f32 %v4654_v10, %v4685_v41  ;;  %v4696_v1 = vmul.f32 %v4691_v2, %v4652_v0  ;;  %v4695_v15 = vmul.f32 %v4691_v2, %v4651_v33  ;;  %v4693_v6 = vmul.f32 %v4691_v2, %v4649_v60  ;;  %v6223_v33 = vld [vmem:[%s8717_s16 + $0x8] ss:$36 sps:$4 sm:$0xff]   ;;  %v6228_v0 = vld [vmem:[%s8717_s16 + $0x5c] ss:$36 sps:$4 sm:$0xff]  }
 0x7a9   :  { %v4694_v59 = vmul.f32 %v4691_v2, %v4650_v16  ;;  %v6213_v16 = vld [vmem:[%s8714_s15 + $0x8] ss:$0 sps:$4 sm:$0x11]   ;;  %5016 = vmatprep.subr.bf16.mxu1 %v6228_v0 }
 0x7aa   :  { %v4701_v42 = vrot.slane %v4686_v22, %v7367_v8 }
 0x7ac   :  { %v4705_v25 = vadd.f32 %v4701_v42, %v4695_v15  ;;  %v4706_v37 = vadd.f32 %v4701_v42, %v4696_v1  ;;  %v4703_v12 = vadd.f32 %v4701_v42, %v4693_v6  ;;  %v4704_v31 = vadd.f32 %v4701_v42, %v4694_v59 }
 0x7ae   :  { %vm4709_vm3 = vcmp.ge.f32.partialorder %v4705_v25, 0.0  ;;  %vm4710_vm4 = vcmp.ge.f32.partialorder %v4706_v37, 0.0  ;;  %v4713_v38 = vmul.f32 0.2, %v4705_v25  ;;  %v4714_v36 = vmul.f32 0.2, %v4706_v37 }
 0x7af   :  { %vm4707_vm6 = vcmp.ge.f32.partialorder %v4703_v12, 0.0  ;;  %vm4708_vm15 = vcmp.ge.f32.partialorder %v4704_v31, 0.0  ;;  %v4711_v14 = vmul.f32 0.2, %v4703_v12  ;;  %v4712_v61 = vmul.f32 0.2, %v4704_v31 }
 0x7b0   :  { %v4717_v35 = vsel %vm4709_vm3, %v4705_v25, %v4713_v38  ;;  %v4718_v26 = vsel %vm4710_vm4, %v4706_v37, %v4714_v36 }
 0x7b1   :  { %v4723_v50 = vpack.c.bf16 %v4718_v26, %v4717_v35  ;;  %v4715_v27 = vsel %vm4707_vm6, %v4703_v12, %v4711_v14  ;;  %v4716_v56 = vsel %vm4708_vm15, %v4704_v31, %v4712_v61 }
 0x7b2   :  { %v4722_v60 = vpack.c.bf16 %v4716_v56, %v4715_v27 }
 0x7b3   :  { %5876 = vmatprep.subr.bf16.mxu0 %v4723_v50 }
 0x7b4   :  { %5877 = vmatpush3.bf16.msra.mxu0 %v4723_v50 }
 0x7b5   :  { %5878 = vmatprep.subr.bf16.mxu0 %v4722_v60 }
 0x7b8   :  { %5879 = vmatpush3.bf16.msra.mxu0 %v4722_v60 }
 0x7b9   :  { %4967 = vmatprep.subr.bf16.mxu0 %v6222_v11 }
 0x7bb   :  { %5881 = vmatmul.mubr.msk.bf16.vlgmr.msra.gmra.mxu0 %vm3508_vm5, %v6213_v16 }
 0x7bc   :  { %4987 = vmatprep.mubr.bf16.mxu0 %v8789_v17  ;;  %4968 = vmatpush1.bf16.msra.mxu0 %v6220_v7 }
 0x7bd   :  { %4969 = vmatprep.subr.bf16.mxu0 %v6225_v28 }
 0x7c0   :  { %4970 = vmatpush1.bf16.msra.mxu0 %v6223_v33 }
 0x7c1   :  { %5065 = vmatprep.subr.bf16.mxu0 %v6234_v9 }
 0x87b   :  { %v5882_v24 = vpop.f32.mrf.mxu0 }
 0x87c   :  { %v4787_v30 = vpack.c.bf16 %v5882_v24, %v5882_v24 }
 0x87d   :  { %v4772_v45 = vpop.f32.mrf.mxu0 }
 0x87f   :  { %v5883_v18 = vpop.f32.mrf.mxu0 }
 0x881   :  { %v4775_v46 = vpop.f32.mrf.mxu0 }
 0x882   :  { %v4786_v57 = vpack.c.bf16 %v4775_v46, %v4772_v45 }
 0x884   :  { %5650 = vmatmul.mubr.msk.bf16.vlgmr.msra.gmra.mxu1 %vm3508_vm5, %v4786_v57  ;;  %5652 = vmatmul.mubr.msk.bf16.vlgmr.msra.gmra.mxu0 %vm3508_vm5, %v4786_v57 }
 0x885   :  { %4948 = vmatprep.mubr.bf16.mxu1 %v8789_v17  ;;  %5017 = vmatpush1.bf16.msra.mxu1 %v6226_v23 }
 0x886   :  { %5018 = vmatprep.subr.bf16.mxu1 %v6231_v54  ;;  %4997 = vmatprep.mubr.bf16.mxu0 %v8789_v17 }
 0x887   :  { %5066 = vmatpush1.bf16.msra.mxu0 %v6232_v5 }
 0x888   :  { %5067 = vmatprep.subr.bf16.mxu0 %v6237_v49 }
 0x889   :  { %5019 = vmatpush1.bf16.msra.mxu1 %v6229_v43 }
 0x88a   :  { %5884 = vmatprep.subr.bf16.mxu1 %v6238_v29 }
 0x88b   :  { %5068 = vmatpush1.bf16.msra.mxu0 %v6235_v52 }
 0x88c   :  { %5651 = vmatmul.mubr.msk.bf16.gmra.mxu1 %vm3508_vm5, %v4787_v30  ;;  %5653 = vmatmul.mubr.msk.bf16.gmra.mxu0 %vm3508_vm5, %v4787_v30 }
 0x88d   :  { %5036 = vmatprep.mubr.bf16.mxu1 %v8789_v17  ;;  %5085 = vmatprep.mubr.bf16.mxu0 %v8789_v17 }
 0x88e   :  { %5892 = vmatprep.subr.bf16.mxu0 %v8773_v34 }
 0x894   :  { %5654 = vmatmul.mubr.msk.bf16.vlgmr.msra.gmra.mxu1 %vm3508_vm5, %v4786_v57  ;;  %5656 = vmatmul.mubr.msk.bf16.vlgmr.msra.gmra.mxu0 %vm3508_vm5, %v4786_v57 }
 0x895   :  { %5046 = vmatprep.mubr.bf16.mxu1 %v8789_v17  ;;  %5885 = vmatpush3.bf16.msra.mxu1 %v6238_v29 }
 0x896   :  { %5886 = vmatprep.subr.bf16.mxu1 %v6239_v4  ;;  %5094 = vmatprep.mubr.bf16.mxu0 %v8789_v17  ;;  %v6241_v17 = vld [vmem:[%s8718_s19 + $0x30] sm:$0xff]  }
 0x897   :  { %5893 = vmatpush3.bf16.msra.mxu0 %v6240_v63 }
 0x898   :  { %5894 = vmatprep.subr.bf16.mxu0 %v8773_v34 }
 0x899   :  { %5887 = vmatpush3.bf16.msra.mxu1 %v6239_v4 }
 0x89b   :  { %5895 = vmatpush3.bf16.msra.mxu0 %v6241_v17 }
 0x89c   :  { %5655 = vmatmul.mubr.msk.bf16.gmra.mxu1 %vm3508_vm5, %v4787_v30  ;;  %5657 = vmatmul.mubr.msk.bf16.gmra.mxu0 %vm3508_vm5, %v4787_v30 }
 0x89d   :  { %5888 = vmatprep.mubr.msk.bf16.mxu1 %vm3508_vm5, %v4786_v57  ;;  %5908 = vmatprep.mubr.msk.bf16.mxu0 %vm6263_vm7, %v8773_v34 }
 0x89e   :  { %5896 = vmatprep.subr.bf16.mxu0 %v8773_v34 }
 0x89f   :  { %5897 = vmatpush3.bf16.msra.mxu0 %v6242_v47 }
 0x8a0   :  { %5898 = vmatprep.subr.bf16.mxu0 %v8773_v34 }
 0x8a3   :  { %5899 = vmatpush3.bf16.msra.mxu0 %v6243_v48 }
 0x8a4   :  { %5889 = vmatmul.mubr.msk.bf16.vlgmr.msra.gmra.mxu1 %vm3508_vm5, %v4787_v30  ;;  %5900 = vmatprep.subr.bf16.mxu0 %v8773_v34  ;;  %vm5396_vm5 = vcmask 1024  }
 0x8a7   :  { %5901 = vmatpush3.bf16.msra.mxu0 %v6244_v20 }
 0x8a8   :  { %5902 = vmatprep.subr.bf16.mxu0 %v8773_v34 }
 0x8ab   :  { %5903 = vmatpush3.bf16.msra.mxu0 %v6245_v13 }
 0x8ac   :  { %5904 = vmatprep.subr.bf16.mxu0 %v8773_v34 }
 0x8af   :  { %5905 = vmatpush3.bf16.msra.mxu0 %v6246_v53 }
 0x8b0   :  { %5906 = vmatprep.subr.bf16.mxu0 %v8773_v34 }
 0x8b3   :  { %5907 = vmatpush3.bf16.msra.mxu0 %v6247_v19 }
 0x944   :  { %v4940_v32 = vpop.f32.mrf.mxu1  ;;  %v4989_v40 = vpop.f32.mrf.mxu0 }
 0x945   :  { %v5154_v14 = vrot.slane %v4989_v40, 2 }
 0x946   :  { %v4942_v51 = vpop.f32.mrf.mxu1  ;;  %v4991_v62 = vpop.f32.mrf.mxu0 }
 0x947   :  { %v5150_v42 = vrot.slane %v4942_v51, 1  ;;  %v5158_v16 = vrot.slane %v4991_v62, 3 }
 0x948   :  { %v4944_v44 = vpop.f32.mrf.mxu1  ;;  %v4993_v39 = vpop.f32.mrf.mxu0 }
 0x949   :  { %v5152_v34 = vadd.f32 %v5150_v42, %v4940_v32  ;;  %v5183_v61 = vrot.slane %v4993_v39, 2 }
 0x94a   :  { %v4946_v10 = vpop.f32.mrf.mxu1  ;;  %v4995_v41 = vpop.f32.mrf.mxu0 }
 0x94b   :  { %v5179_v6 = vrot.slane %v4946_v10, 1  ;;  %v5156_v50 = vadd.f32 %v5154_v14, %v5152_v34  ;;  %v5187_v21 = vrot.slane %v4995_v41, 3 }
 0x94c   :  { %v4950_v2 = vpop.f32.mrf.mxu1  ;;  %v4999_v22 = vpop.f32.mrf.mxu0 }
 0x94d   :  { %v5181_v31 = vadd.f32 %v5179_v6, %v4944_v44  ;;  %v5160_v11 = vadd.f32 %v5158_v16, %v5156_v50 }
 0x94e   :  { %v4951_v1 = vpop.f32.mrf.mxu1  ;;  %v5000_v15 = vpop.f32.mrf.mxu0 }
 0x94f   :  { %v5185_v27 = vadd.f32 %v5183_v61, %v5181_v31 }
 0x950   :  { %v4952_v59 = vpop.f32.mrf.mxu1  ;;  %v5001_v25 = vpop.f32.mrf.mxu0 }
 0x951   :  { %v5189_v28 = vadd.f32 %v5187_v21, %v5185_v27 }
 0x952   :  { %v4953_v37 = vpop.f32.mrf.mxu1  ;;  %v5002_v12 = vpop.f32.mrf.mxu0 }
 0x954   :  { %v5038_v38 = vpop.f32.mrf.mxu1  ;;  %v5087_v36 = vpop.f32.mrf.mxu0 }
 0x955   :  { %v5162_v55 = vrot.slane %v5038_v38, 4  ;;  %v5170_v52 = vrot.slane %v5087_v36, 6 }
 0x956   :  { %v5040_v35 = vpop.f32.mrf.mxu1  ;;  %v5089_v26 = vpop.f32.mrf.mxu0 }
 0x957   :  { %v5164_v9 = vadd.f32 %v5162_v55, %v5160_v11  ;;  %v5166_v24 = vrot.slane %v5040_v35, 5  ;;  %v5174_v20 = vrot.slane %v5089_v26, 7  ;;  %v5208_v26 = vld [vmem:[%s8719_s17] sm:$0x1] }
 0x958   :  { %v5042_v56 = vpop.f32.mrf.mxu1  ;;  %v5091_v60 = vpop.f32.mrf.mxu0 }
 0x959   :  { %v5191_v58 = vrot.slane %v5042_v56, 4  ;;  %v5168_v5 = vadd.f32 %v5166_v24, %v5164_v9  ;;  %v5199_v30 = vrot.slane %v5091_v60, 6  ;;  %v5209_v56 = vld [vmem:[%s8720_s18] sm:$0x1] }
 0x95a   :  { %v5044_v3 = vpop.f32.mrf.mxu1  ;;  %v5093_v7 = vpop.f32.mrf.mxu0 }
 0x95b   :  { %v5193_v45 = vadd.f32 %v5191_v58, %v5189_v28  ;;  %v5195_v18 = vrot.slane %v5044_v3, 5  ;;  %v5172_v63 = vadd.f32 %v5170_v52, %v5168_v5 }
 0x95c   :  { %v5048_v33 = vpop.f32.mrf.mxu1  ;;  %v5096_v0 = vpop.f32.mrf.mxu0 }
 0x95d   :  { %v5197_v49 = vadd.f32 %v5195_v18, %v5193_v45  ;;  %v5176_v19 = vadd.f32 %v5174_v20, %v5172_v63  ;;  %v28_v33 = vstv %s8721_s22  ;;  %v5660_v0 = vld [vmem:[%s8722_s20] ss:$0 sm:$0xff] }
 0x95e   :  { %v5049_v46 = vpop.f32.mrf.mxu1  ;;  %v5097_v23 = vpop.f32.mrf.mxu0  ;;  %29 = vst [vmem:[#allocation2] sm:$0x1] %v28_v33  ;;  %v5669_v18 = vld [vmem:[%s8723_s21] ss:$0 sm:$0xff] }
 0x95f   :  { %v5201_v17 = vadd.f32 %v5199_v30, %v5197_v49  ;;  %v5203_v47 = vrot.slane %v5097_v23, 7 }
 0x960   :  { %v5050_v57 = vpop.f32.mrf.mxu1  ;;  %v5099_v54 = vpop.f32.mrf.mxu0 }
 0x961   :  { %v5205_v53 = vadd.f32 %v5203_v47, %v5201_v17 }
 0x962   :  { %v5051_v43 = vpop.f32.mrf.mxu1  ;;  %v5100_v29 = vpop.f32.mrf.mxu0 }
 0x964   :  { %v5890_v4 = vpop.f32.mrf.mxu1 }
 0x965   :  { %v5206_v40 = vadd.f32 %v5890_v4, %v5205_v53  ;;  %v5670_v49 = vld [vmem:[#allocation2] ss:$0 sm:$0xff] }
 0x966   :  { %v5136_v48 = vpop.f32.mrf.mxu1 }
 0x968   :  { %v5891_v13 = vpop.f32.mrf.mxu1 }
 0x96a   :  { %v5138_v32 = vpop.f32.mrf.mxu1 }
 0x96b   :  { %v5177_v51 = vadd.f32 %v5176_v19, %v5138_v32 }
 0x96d   :  { %v5207_v62 = vsel %vm999_vm2, %v5177_v51, %v5206_v40 }
 0x96e   :  { %v5210_v44 = vsel %vm314_vm0, %v5207_v62, 0.0  ;;  %v5217_v39 = vmul.f32 %v5207_v62, %v5207_v62 }
 0x96f   :  { %v5211_v10 = vrot.slane %v5210_v44, 4 }
 0x970   :  { %v5218_v41 = vsel %vm314_vm0, %v5217_v39, 0.0 }
 0x971   :  { %v5212_v2 = vadd.f32 %v5211_v10, %v5210_v44  ;;  %v5219_v22 = vrot.slane %v5218_v41, 4 }
 0x973   :  { %v5213_v1 = vrot.slane %v5212_v2, 2  ;;  %v5220_v15 = vadd.f32 %v5219_v22, %v5218_v41 }
 0x975   :  { %v5214_v42 = vadd.f32 %v5213_v1, %v5212_v2  ;;  %v5221_v6 = vrot.slane %v5220_v15, 2 }
 0x977   :  { %v5215_v59 = vrot.slane %v5214_v42, 1  ;;  %v5222_v25 = vadd.f32 %v5221_v6, %v5220_v15 }
 0x979   :  { %v5216_v37 = vadd.f32 %v5215_v59, %v5214_v42  ;;  %v5223_v12 = vrot.slane %v5222_v25, 1 }
 0x97b   :  { %v5224_v34 = vadd.f32 %v5223_v12, %v5222_v25  ;;  %v5225_v31 = vmul.f32 0.5, %v5216_v37 }
 0x97d   :  { %v5226_v38 = vmul.f32 0.5, %v5224_v34  ;;  %v5227_v36 = vmul.f32 %v5225_v31, %v5225_v31 }
 0x97f   :  { %v5228_v14 = vsub.f32 %v5226_v38, %v5227_v36 }
 0x981   :  { %v5229_v61 = vmax.f32 %v5228_v14, 0.0 }
 0x983   :  { %v5230_v35 = vadd.f32 1e-05, %v5229_v61 }
 0x985   :  { %6254 = vrsqrt.f32 %v5230_v35 }
 0x992   :  { %v6255_v50 = vpop.eup %6254 }
 0x993   :  { %v5232_v27 = vmul.f32 %v6255_v50, %v5208_v26 }
 0x995   :  { %v5233_v60 = vmul.f32 %v5232_v27, %v5225_v31  ;;  %v5239_v16 = vrot.slane %v5232_v27, %v7367_v8 }
 0x997   :  { %v5234_v21 = vsub.f32 %v5209_v56, %v5233_v60  ;;  %v5241_v55 = vmul.f32 %v5239_v16, %v5207_v62 }
 0x999   :  { %v5246_v58 = vrot.slane %v5234_v21, %v7367_v8 }
 0x99b   :  { %v5248_v3 = vadd.f32 %v5246_v58, %v5241_v55 }
 0x99d   :  { %vm5249_vm2 = vcmp.ge.f32.partialorder %v5248_v3, 0.0  ;;  %v5250_v7 = vmul.f32 0.2, %v5248_v3 }
 0x99f   :  { %v5251_v11 = vsel %vm5249_vm2, %v5248_v3, %v5250_v7 }
 0x9a0   :  { %v5252_v28 = vpack.c.bf16 %v5251_v11, %v5251_v11 }
 0x9a2   :  { %5909 = vmatmul.mubr.bf16.vlgmr.msra.gmra.mxu0 %v5252_v28 }
 0xa62   :  { %v5358_v9 = vpop.f32.mrf.mxu0 }
 0xa63   :  { %v5359_v24 = vadd.f32 %v5660_v0, %v5358_v9 }
 0xa64   :  { %v5910_v45 = vpop.f32.mrf.mxu0 }
 0xa65   :  { %vm5364_vm7 = vcmp.ge.f32.partialorder %v5359_v24, 0.0  ;;  %v5365_v8 = vmul.f32 0.2, %v5359_v24 }
 0xa66   :  { %v5361_v46 = vpop.f32.mrf.mxu0 }
 0xa67   :  { %v5366_v23 = vsel %vm5364_vm7, %v5359_v24, %v5365_v8 }
 0xa68   :  { %v5374_v57 = vmul.f32 %v5669_v18, %v5366_v23  ;;  %v5911_v54 = vpop.f32.mrf.mxu0 }
 0xa6a   :  { %v5375_v5 = vsel %vm314_vm0, %v5374_v57, 0.0 }
 0xa6b   :  { %5376 = vadd.xlane.f32.xlu1 %v5375_v5 }
 0xaf4   :  { %v5377_v43 = vpop.xlane.xlu1 %5376 }
 0xaf5   :  { %v5385_v29 = vadd.f32 %v5670_v49, %v5377_v43 }
 0xaf7   :  { %v5386_v52 = vand.u32 2147483647, %v5385_v29  ;;  %vm5390_vm10 = vcmp.ge.f32.partialorder %v5385_v29, 0.0 }
 0xaf9   :  { %v5387_v30 = vsub.f32 0.0, %v5386_v52 }
 0xafb   :  { %v5388_v4 = vmul.f32 1.442695, %v5387_v30 }
 0xafd   :  { %6256 = vpow2.f32 %v5388_v4 }
 0xb0a   :  { %v6257_v63 = vpop.eup %6256 }
 0xb0b   :  { %v5391_v17 = vadd.f32 1.0, %v6257_v63 }
 0xb0d   :  { %6258 = vrcp.f32 %v5391_v17 }
 0xb1a   :  { %v6259_v47 = vpop.eup %6258 }
 0xb1b   :  { %v5394_v48 = vmul.f32 %v6259_v47, %v6257_v63 }
 0xb1d   :  { %v5395_v20 = vsel %vm5390_vm10, %v6259_v47, %v5394_v48 }
 0xb1e   :  { %5397 = vst.msk [vmem:[%s8724_s23] sm:$0x3] %vm5396_vm5, %v5395_v20 }

</bundles_post_ra>
